<compile_context>
chip_gen: v6e
topology: v6e:2x2x1
jax: 0.10.0
libtpu: 0.0.40
codegen_flags: <defaults>
</compile_context>

<pallas_src>
import functools

import jax
import jax.numpy as jnp
import numpy as np
from jax.experimental import pallas as pl
from jax.experimental.pallas import tpu as pltpu


def _round_up(x, m):
    return ((x + m - 1) // m) * m


# -----------------------------------------------------------------------------
# Fused kernel. grid=(nlayer, n_row_tiles): outer axis = GNN layer, inner = row tile.
# -----------------------------------------------------------------------------
def _make_kernel(mlp_pos, hp, n_out, tm):
    def kernel(init_ref, adj_ref,
               wi_ref, bi_ref, wh_ref, bh_ref,
               wm1_ref, bm1_ref, wm2_ref, bm2_ref,
               wo1_ref, bo1_ref, wo2_ref, bo2_ref,
               *rest):
        out_refs = rest[:n_out]
        state = rest[n_out]                      # (2, Np, Hp) bf16 ping-pong scratch

        layer = pl.program_id(0)
        tile = pl.program_id(1)
        row0 = pl.multiple_of(tile * tm, tm)

        nxt = layer % 2                          # buffer written by this layer
        prv = 1 - nxt                            # buffer holding previous layer's state

        # First grid step: seed the ping-pong with the precomputed initial state.
        @pl.when((layer == 0) & (tile == 0))
        def _():
            state[1, :, :] = init_ref[...]

        prev = state.at[prv]                     # ref-view, no load yet
        h_full_bf = prev[...]                    # (Np, Hp) bf16: full previous state
        h_tile_bf = prev[pl.ds(row0, tm), :]     # (tm, Hp) bf16: this tile's rows
        h_tile = h_tile_bf.astype(jnp.float32)

        # --- propagation: ax = adj[rows] @ h  (torch.spmm as dense bf16 MXU matmul) ---
        ax = jnp.dot(adj_ref[...], h_full_bf, preferred_element_type=jnp.float32)

        # --- GRUCell(ax, h): six matmuls collapsed into two lane-dense ones ----------
        gi = jnp.dot(ax.astype(jnp.bfloat16), wi_ref[0],
                     preferred_element_type=jnp.float32) + bi_ref[0]
        gh = jnp.dot(h_tile_bf, wh_ref[0],
                     preferred_element_type=jnp.float32) + bh_ref[0]
        r = jax.nn.sigmoid(gi[:, 0 * hp:1 * hp] + gh[:, 0 * hp:1 * hp])
        z = jax.nn.sigmoid(gi[:, 1 * hp:2 * hp] + gh[:, 1 * hp:2 * hp])
        ng = jnp.tanh(gi[:, 2 * hp:3 * hp] + r * gh[:, 2 * hp:3 * hp])
        g = (1.0 - z) * ng + z * h_tile          # PyTorch GRUCell update

        # --- per-layer MLP([nhid, nhid, nhid]) followed by F.relu --------------------
        m = jnp.dot(g.astype(jnp.bfloat16), wm1_ref[0],
                    preferred_element_type=jnp.float32) + bm1_ref[0]
        m = jnp.maximum(m, 0.0)
        m = jnp.dot(m.astype(jnp.bfloat16), wm2_ref[0],
                    preferred_element_type=jnp.float32) + bm2_ref[0]
        new_tile = jnp.maximum(m, 0.0)
        new_bf = new_tile.astype(jnp.bfloat16)

        # --- write this tile's rows into the "next" buffer (static index per parity) -
        @pl.when(nxt == 0)
        def _():
            state[0, pl.ds(row0, tm), :] = new_bf

        @pl.when(nxt == 1)
        def _():
            state[1, pl.ds(row0, tm), :] = new_bf

        # --- outputer heads: head j's weights are streamed at layer mlp_pos[j] -------
        for j, pos in enumerate(mlp_pos):
            @pl.when(layer == pos)
            def _(j=j):
                hh = jnp.dot(new_bf, wo1_ref[0],
                             preferred_element_type=jnp.float32) + bo1_ref[0]
                hh = jnp.maximum(hh, 0.0)
                out_refs[j][pl.ds(row0, tm), :] = (
                    jnp.dot(hh.astype(jnp.bfloat16), wo2_ref[0],
                            preferred_element_type=jnp.float32) + bo2_ref[0])

    return kernel


# -----------------------------------------------------------------------------
# Forward wrapper: one pallas_call for the whole network.
# -----------------------------------------------------------------------------
@functools.partial(jax.jit,
                   static_argnames=("nlayer", "mlp_pos", "nclasses",
                                    "tile_rows", "single_buffer"))
def deepgraphlet_forward(features, adj, packed, *, nlayer, mlp_pos, nclasses,
                         tile_rows=256, single_buffer=True):
    n = features.shape[0]
    nhid = packed["w1"].shape[1]
    hp = packed["bm1"].shape[2]              # padded hidden width (multiple of 128)
    cp = packed["bo2"].shape[2]              # padded class width  (multiple of 128)
    n_out = len(mlp_pos)

    assert len(set(mlp_pos)) == n_out, "mlp_pos entries must be distinct"
    assert all(0 <= p < nlayer for p in mlp_pos), "every mlp_pos must be < nlayer"
    assert tile_rows % 16 == 0, "row tile must be a multiple of 16 (bf16 sublane packing)"

    # One-shot mlp1 (+ReLU) in plain XLA, outside the kernel.
    x0 = jnp.maximum(features.astype(jnp.float32) @ packed["w1"] + packed["b1"], 0.0)

    # Row padding / tiling.  Production sizes: tile_rows=128 (v5e) / 256 (v6e, v7x).
    tm = min(tile_rows, _round_up(n, 16))
    np_rows = _round_up(n, tm)
    n_tiles = np_rows // tm

    init = (jnp.zeros((np_rows, hp), jnp.float32)
            .at[:n, :nhid].set(x0).astype(jnp.bfloat16))
    adj_p = (jnp.zeros((np_rows, np_rows), jnp.float32)
             .at[:n, :n].set(adj.astype(jnp.float32)).astype(jnp.bfloat16))

    resident = dict(pipeline_mode=pl.Buffered(1)) if single_buffer else {}

    def const_spec(shape):                   # resident block, same for every grid step
        nd = len(shape)
        return pl.BlockSpec(tuple(shape), lambda l, i, nd=nd: (0,) * nd, **resident)

    def layer_spec(shape):                   # stream layer l's params along axis 0
        nd = len(shape)
        return pl.BlockSpec((1,) + tuple(shape[1:]),
                            lambda l, i, nd=nd: (l,) + (0,) * (nd - 1))

    # head_table[l] = head streamed at layer l (carry previous head => no extra DMA
    # on layers that do not emit an output).
    head_table = []
    cur = 0
    for l in range(nlayer):
        for j, p in enumerate(mlp_pos):
            if p == l:
                cur = j
        head_table.append(cur)

    def head_spec(shape):
        nd = len(shape)

        def imap(l, i, nd=nd):
            h = jnp.int32(0)
            for ll, hv in enumerate(head_table):
                h = jnp.where(l == ll, jnp.int32(hv), h)
            return (h,) + (0,) * (nd - 1)

        return pl.BlockSpec((1,) + tuple(shape[1:]), imap)

    args = (init, adj_p,
            packed["wi"], packed["bi"], packed["wh"], packed["bh"],
            packed["wm1"], packed["bm1"], packed["wm2"], packed["bm2"],
            packed["wo1"], packed["bo1"], packed["wo2"], packed["bo2"])

    in_specs = [
        const_spec(init.shape),
        pl.BlockSpec((tm, np_rows), lambda l, i: (i, 0)),     # adj row tile
        layer_spec(packed["wi"].shape), layer_spec(packed["bi"].shape),
        layer_spec(packed["wh"].shape), layer_spec(packed["bh"].shape),
        layer_spec(packed["wm1"].shape), layer_spec(packed["bm1"].shape),
        layer_spec(packed["wm2"].shape), layer_spec(packed["bm2"].shape),
        head_spec(packed["wo1"].shape), head_spec(packed["bo1"].shape),
        head_spec(packed["wo2"].shape), head_spec(packed["bo2"].shape),
    ]

    out_shape = tuple(jax.ShapeDtypeStruct((np_rows, cp), jnp.float32)
                      for _ in range(n_out))
    out_specs = tuple(pl.BlockSpec((np_rows, cp), lambda l, i: (0, 0), **resident)
                      for _ in range(n_out))

    # Explicit VMEM budget: real footprint with headroom, clamped to a safe ceiling.
    nbuf = 1 if single_buffer else 2
    resident_bytes = 0
    resident_bytes += 2 * tm * np_rows * 2                          # adj tiles (x2 buffers)
    resident_bytes += nbuf * np_rows * hp * 2                       # initial state (bf16)
    resident_bytes += 2 * (2 * (hp * 3 * hp) * 2 + 2 * (3 * hp) * 4
                           + 2 * (hp * hp) * 2 + 2 * hp * 4)        # per-layer GRU/MLP
    resident_bytes += 2 * ((hp * hp + hp * cp) * 2 + (hp + cp) * 4)  # streamed head params
    resident_bytes += nbuf * n_out * np_rows * cp * 4               # head outputs
    resident_bytes += 2 * np_rows * hp * 2                          # state ping-pong scratch
    vmem_limit = int(min(max(2 * resident_bytes + (8 << 20), 32 << 20), 100 << 20))

    flops = nlayer * (2 * np_rows * np_rows * hp                    # adj @ h
                      + 2 * (2 * np_rows * hp * 3 * hp)             # fused GRU matmuls
                      + 2 * (2 * np_rows * hp * hp))                # per-layer MLP
    flops += n_out * (2 * np_rows * hp * hp + 2 * np_rows * hp * cp)
    transcendentals = nlayer * 3 * np_rows * hp
    bytes_accessed = (sum(int(np.prod(a.shape)) * a.dtype.itemsize for a in args)
                      + n_out * np_rows * cp * 4)

    outs = pl.pallas_call(
        _make_kernel(mlp_pos, hp, n_out, tm),
        out_shape=out_shape,
        grid_spec=pltpu.PrefetchScalarGridSpec(
            num_scalar_prefetch=0,
            grid=(nlayer, n_tiles),
            in_specs=in_specs,
            out_specs=out_specs,
            scratch_shapes=[pltpu.VMEM((2, np_rows, hp), jnp.bfloat16)],
        ),
        compiler_params=pltpu.CompilerParams(
            # Both axes carry sequential dependences through the state ping-pong.
            dimension_semantics=("arbitrary", "arbitrary"),
            vmem_limit_bytes=vmem_limit,
        ),
        cost_estimate=pl.CostEstimate(
            flops=int(flops),
            transcendentals=int(transcendentals),
            bytes_accessed=int(bytes_accessed),
        ),
    )(*args)

    # Slice away row padding and class-lane padding of each head.
    return tuple(outs[j][:n, :nclasses[j]] for j in range(n_out))


# -----------------------------------------------------------------------------
# Parameter construction (logical shapes, (in, out) layout) and packing.
# -----------------------------------------------------------------------------
def _uniform(key, shape, bound):
    return jax.random.uniform(key, shape, jnp.float32, -bound, bound)


def init_params(key, nfeat, nhid, nlayer, mlp_pos, nclasses):
    params = {}
    key, k1, k2 = jax.random.split(key, 3)
    lin_bound = 1.0 / float(np.sqrt(nfeat))
    params["mlp1"] = {
        "w": _uniform(k1, (nfeat, nhid), lin_bound),   # stored (in, out)
        "b": _uniform(k2, (1, nhid), lin_bound),
    }

    gru_bound = 1.0 / float(np.sqrt(nhid))
    h_bound = 1.0 / float(np.sqrt(nhid))
    params["layers"] = []
    for _ in range(nlayer):
        keys = jax.random.split(key, 17)
        key = keys[0]
        gru = {
            "wir": _uniform(keys[1], (nhid, nhid), gru_bound),
            "wiz": _uniform(keys[2], (nhid, nhid), gru_bound),
            "win": _uniform(keys[3], (nhid, nhid), gru_bound),
            "whr": _uniform(keys[4], (nhid, nhid), gru_bound),
            "whz": _uniform(keys[5], (nhid, nhid), gru_bound),
            "whn": _uniform(keys[6], (nhid, nhid), gru_bound),
            "bir": _uniform(keys[7], (1, nhid), gru_bound),
            "biz": _uniform(keys[8], (1, nhid), gru_bound),
            "bin": _uniform(keys[9], (1, nhid), gru_bound),
            "bhr": _uniform(keys[10], (1, nhid), gru_bound),
            "bhz": _uniform(keys[11], (1, nhid), gru_bound),
            "bhn": _uniform(keys[12], (1, nhid), gru_bound),
        }
        mlp = {
            "w1": _uniform(keys[13], (nhid, nhid), h_bound),
            "b1": _uniform(keys[14], (1, nhid), h_bound),
            "w2": _uniform(keys[15], (nhid, nhid), h_bound),
            "b2": _uniform(keys[16], (1, nhid), h_bound),
        }
        params["layers"].append({"gru": gru, "mlp": mlp})

    params["outputers"] = []
    for j in range(len(mlp_pos)):
        keys = jax.random.split(key, 5)
        key = keys[0]
        params["outputers"].append({
            "w1": _uniform(keys[1], (nhid, nhid), h_bound),
            "b1": _uniform(keys[2], (1, nhid), h_bound),
            "w2": _uniform(keys[3], (nhid, nclasses[j]), h_bound),
            "b2": _uniform(keys[4], (1, nclasses[j]), h_bound),
        })
    return params


def pack_params(params, hp, cp):
    """Pad to lane-dense widths, fuse GRU gate weights, stack per layer / per head."""
    wdt = jnp.bfloat16

    def padw(w, rows, cols):  # zero-pad a weight (in, out) -> (rows, cols), bf16
        out = jnp.zeros((rows, cols), jnp.float32)
        out = out.at[:w.shape[0], :w.shape[1]].set(w)
        return out.astype(wdt)

    def padb(b, cols):        # zero-pad a bias (1, c) -> (1, cols), f32
        out = jnp.zeros((1, cols), jnp.float32)
        return out.at[:, :b.shape[1]].set(b)

    p = {}
    # mlp1 stays f32 / unpadded: it runs once in plain XLA outside the kernel.
    p["w1"] = params["mlp1"]["w"]
    p["b1"] = params["mlp1"]["b"]

    wi, bi, wh, bh = [], [], [], []
    wm1, bm1, wm2, bm2 = [], [], [], []
    for lp in params["layers"]:
        g = lp["gru"]
        # Gate order r, z, n — matches torch.nn.GRUCell.
        wi.append(jnp.concatenate([padw(g["wir"], hp, hp),
                                   padw(g["wiz"], hp, hp),
                                   padw(g["win"], hp, hp)], axis=1))
        wh.append(jnp.concatenate([padw(g["whr"], hp, hp),
                                   padw(g["whz"], hp, hp),
                                   padw(g["whn"], hp, hp)], axis=1))
        bi.append(jnp.concatenate([padb(g["bir"], hp),
                                   padb(g["biz"], hp),
                                   padb(g["bin"], hp)], axis=1))
        bh.append(jnp.concatenate([padb(g["bhr"], hp),
                                   padb(g["bhz"], hp),
                                   padb(g["bhn"], hp)], axis=1))
        m = lp["mlp"]
        wm1.append(padw(m["w1"], hp, hp)); bm1.append(padb(m["b1"], hp))
        wm2.append(padw(m["w2"], hp, hp)); bm2.append(padb(m["b2"], hp))

    p["wi"], p["bi"] = jnp.stack(wi), jnp.stack(bi)      # (L, Hp, 3Hp), (L, 1, 3Hp)
    p["wh"], p["bh"] = jnp.stack(wh), jnp.stack(bh)
    p["wm1"], p["bm1"] = jnp.stack(wm1), jnp.stack(bm1)  # (L, Hp, Hp), (L, 1, Hp)
    p["wm2"], p["bm2"] = jnp.stack(wm2), jnp.stack(bm2)

    p["wo1"] = jnp.stack([padw(o["w1"], hp, hp) for o in params["outputers"]])
    p["bo1"] = jnp.stack([padb(o["b1"], hp) for o in params["outputers"]])
    p["wo2"] = jnp.stack([padw(o["w2"], hp, cp) for o in params["outputers"]])
    p["bo2"] = jnp.stack([padb(o["b2"], cp) for o in params["outputers"]])
    return p


# -----------------------------------------------------------------------------
# Pure-JAX f32 reference (mirrors the PyTorch module exactly) for validation.
# -----------------------------------------------------------------------------
def reference_forward(features, adj, params, nlayer, mlp_pos):
    outs = []
    x = jnp.maximum(features @ params["mlp1"]["w"] + params["mlp1"]["b"], 0.0)
    layer_info = x
    for i in range(nlayer):
        lp = params["layers"][i]
        g = lp["gru"]
        ax = adj @ x
        r = jax.nn.sigmoid(ax @ g["wir"] + g["bir"] + layer_info @ g["whr"] + g["bhr"])
        z = jax.nn.sigmoid(ax @ g["wiz"] + g["biz"] + layer_info @ g["whz"] + g["bhz"])
        nn_ = jnp.tanh(ax @ g["win"] + g["bin"] + r * (layer_info @ g["whn"] + g["bhn"]))
        h = (1.0 - z) * nn_ + z * layer_info
        m = lp["mlp"]
        x = jnp.maximum(h @ m["w1"] + m["b1"], 0.0)
        x = jnp.maximum(x @ m["w2"] + m["b2"], 0.0)
        for j, pos in enumerate(mlp_pos):
            if i == pos:
                o = params["outputers"][j]
                hh = jnp.maximum(x @ o["w1"] + o["b1"], 0.0)
                outs.append(hh @ o["w2"] + o["b2"])
        layer_info = x
    return outs


# -----------------------------------------------------------------------------
if __name__ == "__main__":
    N, nfeat, nhid, nlayer = 32, 8, 32, 3
    mlpPos = (0, 1, 2)
    nclasses = (4, 8, 16)

    hp = _round_up(nhid, 128)           # lane-dense hidden width
    cp = _round_up(max(nclasses), 128)  # lane-dense class width

    key = jax.random.PRNGKey(0)
    k_feat, k_adj, k_param = jax.random.split(key, 3)

    features = jax.random.normal(k_feat, (N, nfeat), dtype=jnp.float32)
    # Dense, row-normalized adjacency (torch.spmm done as a dense matmul on the MXU).
    adj_raw = (jax.random.uniform(k_adj, (N, N)) < 0.3).astype(jnp.float32)
    adj_raw = adj_raw + jnp.eye(N, dtype=jnp.float32)
    adj = adj_raw / jnp.sum(adj_raw, axis=1, keepdims=True)

    params = init_params(k_param, nfeat, nhid, nlayer, mlpPos, nclasses)
    packed = pack_params(params, hp, cp)
    refs = reference_forward(features, adj, params, nlayer, mlpPos)

    def run(single_buffer):
        # tile_rows=16 keeps two row tiles at this toy shape so the row-tiled
        # adj path and the bf16 state ping-pong are actually exercised.
        outs = deepgraphlet_forward(
            features, adj, packed, nlayer=nlayer, mlp_pos=mlpPos,
            nclasses=nclasses, tile_rows=16, single_buffer=single_buffer)
        outs = jax.block_until_ready(outs)
        assert len(outs) == len(mlpPos)
        for j, o in enumerate(outs):
            assert o.shape == (N, nclasses[j]), o.shape
            np.testing.assert_allclose(np.asarray(o), np.asarray(refs[j]),
                                       rtol=5e-2, atol=5e-2)
        return outs

    try:
        outs = run(single_buffer=True)    # pl.Buffered(1) on resident constant-index blocks
    except Exception:
        # Graceful fallback if this JAX build does not accept single-buffered
        # (pipeline_mode=pl.Buffered(1)) block specs in pallas_call.
        outs = run(single_buffer=False)

    print("KERNEL_OK")
</pallas_src>

<mosaic_0001>
module attributes {stable_mosaic.version = 11 : i64} {
  func.func @kernel(%arg0: i32, %arg1: i32, %arg2: memref<32x128xbf16, #tpu.memory_space<vmem>>, %arg3: memref<16x32xbf16, #tpu.memory_space<vmem>>, %arg4: memref<1x128x384xbf16, #tpu.memory_space<vmem>>, %arg5: memref<1x1x384xf32, #tpu.memory_space<vmem>>, %arg6: memref<1x128x384xbf16, #tpu.memory_space<vmem>>, %arg7: memref<1x1x384xf32, #tpu.memory_space<vmem>>, %arg8: memref<1x128x128xbf16, #tpu.memory_space<vmem>>, %arg9: memref<1x1x128xf32, #tpu.memory_space<vmem>>, %arg10: memref<1x128x128xbf16, #tpu.memory_space<vmem>>, %arg11: memref<1x1x128xf32, #tpu.memory_space<vmem>>, %arg12: memref<1x128x128xbf16, #tpu.memory_space<vmem>>, %arg13: memref<1x1x128xf32, #tpu.memory_space<vmem>>, %arg14: memref<1x128x128xbf16, #tpu.memory_space<vmem>>, %arg15: memref<1x1x128xf32, #tpu.memory_space<vmem>>, %arg16: memref<32x128xf32, #tpu.memory_space<vmem>>, %arg17: memref<32x128xf32, #tpu.memory_space<vmem>>, %arg18: memref<32x128xf32, #tpu.memory_space<vmem>>, %arg19: memref<2x32x128xbf16, #tpu.memory_space<vmem>>) attributes {dimension_semantics = [#tpu.dimension_semantics<arbitrary>, #tpu.dimension_semantics<arbitrary>], iteration_bounds = array<i64: 3, 2>, scalar_prefetch = 0 : i64, scratch_operands = 1 : i64, tpu.core_type = #tpu.core_type<tc>, window_params = [{pipeline_mode = #tpu.pipeline_mode<synchronous>, transform_indices = @transform_0, window_bounds = array<i64: 32, 128>}, {transform_indices = @transform_1, window_bounds = array<i64: 16, 32>}, {transform_indices = @transform_2, window_bounds = array<i64: 1, 128, 384>}, {transform_indices = @transform_3, window_bounds = array<i64: 1, 1, 384>}, {transform_indices = @transform_4, window_bounds = array<i64: 1, 128, 384>}, {transform_indices = @transform_5, window_bounds = array<i64: 1, 1, 384>}, {transform_indices = @transform_6, window_bounds = array<i64: 1, 128, 128>}, {transform_indices = @transform_7, window_bounds = array<i64: 1, 1, 128>}, {transform_indices = @transform_8, window_bounds = array<i64: 1, 128, 128>}, {transform_indices = @transform_9, window_bounds = array<i64: 1, 1, 128>}, {transform_indices = @transform_10, window_bounds = array<i64: 1, 128, 128>}, {transform_indices = @transform_11, window_bounds = array<i64: 1, 1, 128>}, {transform_indices = @transform_12, window_bounds = array<i64: 1, 128, 128>}, {transform_indices = @transform_13, window_bounds = array<i64: 1, 1, 128>}, {pipeline_mode = #tpu.pipeline_mode<synchronous>, transform_indices = @transform_14, window_bounds = array<i64: 32, 128>}, {pipeline_mode = #tpu.pipeline_mode<synchronous>, transform_indices = @transform_15, window_bounds = array<i64: 32, 128>}, {pipeline_mode = #tpu.pipeline_mode<synchronous>, transform_indices = @transform_16, window_bounds = array<i64: 32, 128>}]} {
    %c16_i32 = arith.constant 16 : i32
    %0 = arith.muli %arg1, %c16_i32 : i32
    %1 = tpu.assume_multiple %0, 16 : i32
    %c2_i32 = arith.constant 2 : i32
    %c0_i32 = arith.constant 0 : i32
    %2 = arith.cmpi eq, %c2_i32, %c0_i32 : i32
    %c1_i32 = arith.constant 1 : i32
    %3 = arith.select %2, %c1_i32, %c2_i32 : i32
    %4 = arith.remsi %arg0, %3 : i32
    %c0_i32_0 = arith.constant 0 : i32
    %5 = arith.cmpi ne, %4, %c0_i32_0 : i32
    %c0_i32_1 = arith.constant 0 : i32
    %6 = arith.cmpi slt, %4, %c0_i32_1 : i32
    %c0_i32_2 = arith.constant 0 : i32
    %7 = arith.cmpi slt, %3, %c0_i32_2 : i32
    %8 = arith.xori %6, %7 : i1
    %9 = arith.andi %8, %5 : i1
    %10 = arith.addi %4, %3 : i32
    %11 = arith.select %9, %10, %4 : i32
    %c1_i32_3 = arith.constant 1 : i32
    %12 = arith.subi %c1_i32_3, %11 : i32
    %c0_i32_4 = arith.constant 0 : i32
    %13 = arith.cmpi eq, %arg0, %c0_i32_4 : i32
    %c0_i32_5 = arith.constant 0 : i32
    %14 = arith.cmpi eq, %arg1, %c0_i32_5 : i32
    %15 = arith.andi %13, %14 : i1
    %16 = arith.extui %15 : i1 to i32
    %c0_i32_6 = arith.constant 0 : i32
    %17 = arith.cmpi ne, %16, %c0_i32_6 : i32
    scf.if %17 {
      %c0_56 = arith.constant 0 : index
      %c0_57 = arith.constant 0 : index
      %105 = vector.load %arg2[%c0_56, %c0_57] : memref<32x128xbf16, #tpu.memory_space<vmem>>, vector<32x128xbf16>
      %c1 = arith.constant 1 : index
      %c0_58 = arith.constant 0 : index
      %c0_59 = arith.constant 0 : index
      %106 = vector.load %arg19[%c1, %c0_58, %c0_59] : memref<2x32x128xbf16, #tpu.memory_space<vmem>>, vector<1x32x128xbf16>
      %107 = vector.shape_cast %106 : vector<1x32x128xbf16> to vector<32x128xbf16>
      %108 = vector.shape_cast %105 : vector<32x128xbf16> to vector<1x32x128xbf16>
      tpu.vector_store %arg19[%c1, %c0_58, %c0_59], %108 {strides = array<i32>} : memref<2x32x128xbf16, #tpu.memory_space<vmem>>, vector<1x32x128xbf16>,
    } else {
    }
    %18 = arith.index_cast %12 : i32 to index
    %c0 = arith.constant 0 : index
    %c0_7 = arith.constant 0 : index
    %19 = vector.load %arg19[%18, %c0, %c0_7] : memref<2x32x128xbf16, #tpu.memory_space<vmem>>, vector<1x32x128xbf16>
    %20 = vector.shape_cast %19 : vector<1x32x128xbf16> to vector<32x128xbf16>
    %c0_i32_8 = arith.constant 0 : i32
    %c0_i32_9 = arith.constant 0 : i32
    %21 = tpu.memref_slice %arg19[%12, %c0_i32_8, %c0_i32_9] : memref<2x32x128xbf16, #tpu.memory_space<vmem>> -> memref<1x32x128xbf16, #tpu.memory_space<vmem>>
    %22 = tpu.memref_squeeze %21 : memref<1x32x128xbf16, #tpu.memory_space<vmem>> -> memref<32x128xbf16, #tpu.memory_space<vmem>>
    %23 = arith.index_cast %1 : i32 to index
    %c0_10 = arith.constant 0 : index
    %24 = vector.load %22[%23, %c0_10] : memref<32x128xbf16, #tpu.memory_space<vmem>>, vector<16x128xbf16>
    %25 = arith.extf %24 : vector<16x128xbf16> to vector<16x128xf32>
    %c0_11 = arith.constant 0 : index
    %c0_12 = arith.constant 0 : index
    %26 = vector.load %arg3[%c0_11, %c0_12] : memref<16x32xbf16, #tpu.memory_space<vmem>>, vector<16x32xbf16>
    %cst = arith.constant dense<0.000000e+00> : vector<16x128xf32>
    %27 = tpu.matmul %26, %20, %cst {dimension_numbers = #tpu.dot_dimension_numbers<[1], [0], [0], [1], [0, 0, 1, 1], [], []>} : vector<16x32xbf16>, vector<32x128xbf16>, vector<16x128xf32> -> vector<16x128xf32>
    %28 = arith.truncf %27 : vector<16x128xf32> to vector<16x128xbf16>
    %c0_13 = arith.constant 0 : index
    %c0_14 = arith.constant 0 : index
    %c0_15 = arith.constant 0 : index
    %29 = vector.load %arg4[%c0_13, %c0_14, %c0_15] : memref<1x128x384xbf16, #tpu.memory_space<vmem>>, vector<1x128x384xbf16>
    %30 = vector.shape_cast %29 : vector<1x128x384xbf16> to vector<128x384xbf16>
    %cst_16 = arith.constant dense<0.000000e+00> : vector<16x384xf32>
    %31 = tpu.matmul %28, %30, %cst_16 {dimension_numbers = #tpu.dot_dimension_numbers<[1], [0], [0], [1], [0, 0, 1, 1], [], []>} : vector<16x128xbf16>, vector<128x384xbf16>, vector<16x384xf32> -> vector<16x384xf32>
    %c0_17 = arith.constant 0 : index
    %c0_18 = arith.constant 0 : index
    %c0_19 = arith.constant 0 : index
    %32 = vector.load %arg5[%c0_17, %c0_18, %c0_19] : memref<1x1x384xf32, #tpu.memory_space<vmem>>, vector<1x1x384xf32>
    %33 = vector.shape_cast %32 : vector<1x1x384xf32> to vector<1x384xf32>
    %34 = vector.broadcast %33 : vector<1x384xf32> to vector<16x384xf32>
    %35 = arith.addf %31, %34 : vector<16x384xf32>
    %c0_20 = arith.constant 0 : index
    %c0_21 = arith.constant 0 : index
    %c0_22 = arith.constant 0 : index
    %36 = vector.load %arg6[%c0_20, %c0_21, %c0_22] : memref<1x128x384xbf16, #tpu.memory_space<vmem>>, vector<1x128x384xbf16>
    %37 = vector.shape_cast %36 : vector<1x128x384xbf16> to vector<128x384xbf16>
    %cst_23 = arith.constant dense<0.000000e+00> : vector<16x384xf32>
    %38 = tpu.matmul %24, %37, %cst_23 {dimension_numbers = #tpu.dot_dimension_numbers<[1], [0], [0], [1], [0, 0, 1, 1], [], []>} : vector<16x128xbf16>, vector<128x384xbf16>, vector<16x384xf32> -> vector<16x384xf32>
    %c0_24 = arith.constant 0 : index
    %c0_25 = arith.constant 0 : index
    %c0_26 = arith.constant 0 : index
    %39 = vector.load %arg7[%c0_24, %c0_25, %c0_26] : memref<1x1x384xf32, #tpu.memory_space<vmem>>, vector<1x1x384xf32>
    %40 = vector.shape_cast %39 : vector<1x1x384xf32> to vector<1x384xf32>
    %41 = vector.broadcast %40 : vector<1x384xf32> to vector<16x384xf32>
    %42 = arith.addf %38, %41 : vector<16x384xf32>
    %43 = vector.extract_strided_slice %35 {offsets = [0, 0], sizes = [16, 128], strides = [1, 1]} : vector<16x384xf32> to vector<16x128xf32>
    %44 = vector.extract_strided_slice %42 {offsets = [0, 0], sizes = [16, 128], strides = [1, 1]} : vector<16x384xf32> to vector<16x128xf32>
    %45 = arith.addf %43, %44 : vector<16x128xf32>
    %46 = arith.negf %45 : vector<16x128xf32>
    %47 = math.exp %46 : vector<16x128xf32>
    %cst_27 = arith.constant 1.000000e+00 : f32
    %48 = vector.broadcast %cst_27 : f32 to vector<16x128xf32>
    %49 = arith.addf %48, %47 : vector<16x128xf32>
    %50 = arith.divf %48, %49 : vector<16x128xf32>
    %51 = vector.extract_strided_slice %35 {offsets = [0, 128], sizes = [16, 128], strides = [1, 1]} : vector<16x384xf32> to vector<16x128xf32>
    %52 = vector.extract_strided_slice %42 {offsets = [0, 128], sizes = [16, 128], strides = [1, 1]} : vector<16x384xf32> to vector<16x128xf32>
    %53 = arith.addf %51, %52 : vector<16x128xf32>
    %54 = arith.negf %53 : vector<16x128xf32>
    %55 = math.exp %54 : vector<16x128xf32>
    %cst_28 = arith.constant 1.000000e+00 : f32
    %56 = vector.broadcast %cst_28 : f32 to vector<16x128xf32>
    %57 = arith.addf %56, %55 : vector<16x128xf32>
    %58 = arith.divf %56, %57 : vector<16x128xf32>
    %59 = vector.extract_strided_slice %35 {offsets = [0, 256], sizes = [16, 128], strides = [1, 1]} : vector<16x384xf32> to vector<16x128xf32>
    %60 = vector.extract_strided_slice %42 {offsets = [0, 256], sizes = [16, 128], strides = [1, 1]} : vector<16x384xf32> to vector<16x128xf32>
    %61 = arith.mulf %50, %60 : vector<16x128xf32>
    %62 = arith.addf %59, %61 : vector<16x128xf32>
    %63 = math.tanh %62 : vector<16x128xf32>
    %cst_29 = arith.constant 1.000000e+00 : f32
    %64 = vector.broadcast %cst_29 : f32 to vector<16x128xf32>
    %65 = arith.subf %64, %58 : vector<16x128xf32>
    %66 = arith.mulf %65, %63 : vector<16x128xf32>
    %67 = arith.mulf %58, %25 : vector<16x128xf32>
    %68 = arith.addf %66, %67 : vector<16x128xf32>
    %69 = arith.truncf %68 : vector<16x128xf32> to vector<16x128xbf16>
    %c0_30 = arith.constant 0 : index
    %c0_31 = arith.constant 0 : index
    %c0_32 = arith.constant 0 : index
    %70 = vector.load %arg8[%c0_30, %c0_31, %c0_32] : memref<1x128x128xbf16, #tpu.memory_space<vmem>>, vector<1x128x128xbf16>
    %71 = vector.shape_cast %70 : vector<1x128x128xbf16> to vector<128x128xbf16>
    %cst_33 = arith.constant dense<0.000000e+00> : vector<16x128xf32>
    %72 = tpu.matmul %69, %71, %cst_33 {dimension_numbers = #tpu.dot_dimension_numbers<[1], [0], [0], [1], [0, 0, 1, 1], [], []>} : vector<16x128xbf16>, vector<128x128xbf16>, vector<16x128xf32> -> vector<16x128xf32>
    %c0_34 = arith.constant 0 : index
    %c0_35 = arith.constant 0 : index
    %c0_36 = arith.constant 0 : index
    %73 = vector.load %arg9[%c0_34, %c0_35, %c0_36] : memref<1x1x128xf32, #tpu.memory_space<vmem>>, vector<1x1x128xf32>
    %74 = vector.shape_cast %73 : vector<1x1x128xf32> to vector<1x128xf32>
    %75 = vector.broadcast %74 : vector<1x128xf32> to vector<16x128xf32>
    %76 = arith.addf %72, %75 : vector<16x128xf32>
    %cst_37 = arith.constant 0.000000e+00 : f32
    %77 = vector.broadcast %cst_37 : f32 to vector<16x128xf32>
    %78 = arith.maximumf %76, %77 : vector<16x128xf32>
    %79 = arith.truncf %78 : vector<16x128xf32> to vector<16x128xbf16>
    %c0_38 = arith.constant 0 : index
    %c0_39 = arith.constant 0 : index
    %c0_40 = arith.constant 0 : index
    %80 = vector.load %arg10[%c0_38, %c0_39, %c0_40] : memref<1x128x128xbf16, #tpu.memory_space<vmem>>, vector<1x128x128xbf16>
    %81 = vector.shape_cast %80 : vector<1x128x128xbf16> to vector<128x128xbf16>
    %cst_41 = arith.constant dense<0.000000e+00> : vector<16x128xf32>
    %82 = tpu.matmul %79, %81, %cst_41 {dimension_numbers = #tpu.dot_dimension_numbers<[1], [0], [0], [1], [0, 0, 1, 1], [], []>} : vector<16x128xbf16>, vector<128x128xbf16>, vector<16x128xf32> -> vector<16x128xf32>
    %c0_42 = arith.constant 0 : index
    %c0_43 = arith.constant 0 : index
    %c0_44 = arith.constant 0 : index
    %83 = vector.load %arg11[%c0_42, %c0_43, %c0_44] : memref<1x1x128xf32, #tpu.memory_space<vmem>>, vector<1x1x128xf32>
    %84 = vector.shape_cast %83 : vector<1x1x128xf32> to vector<1x128xf32>
    %85 = vector.broadcast %84 : vector<1x128xf32> to vector<16x128xf32>
    %86 = arith.addf %82, %85 : vector<16x128xf32>
    %cst_45 = arith.constant 0.000000e+00 : f32
    %87 = vector.broadcast %cst_45 : f32 to vector<16x128xf32>
    %88 = arith.maximumf %86, %87 : vector<16x128xf32>
    %89 = arith.truncf %88 : vector<16x128xf32> to vector<16x128xbf16>
    %c0_i32_46 = arith.constant 0 : i32
    %90 = arith.cmpi eq, %11, %c0_i32_46 : i32
    %91 = arith.extui %90 : i1 to i32
    %c0_i32_47 = arith.constant 0 : i32
    %92 = arith.cmpi ne, %91, %c0_i32_47 : i32
    scf.if %92 {
      %c0_56 = arith.constant 0 : index
      %105 = arith.index_cast %1 : i32 to index
      %c0_57 = arith.constant 0 : index
      %106 = vector.load %arg19[%c0_56, %105, %c0_57] : memref<2x32x128xbf16, #tpu.memory_space<vmem>>, vector<1x16x128xbf16>
      %107 = vector.shape_cast %106 : vector<1x16x128xbf16> to vector<16x128xbf16>
      %108 = vector.shape_cast %89 : vector<16x128xbf16> to vector<1x16x128xbf16>
      tpu.vector_store %arg19[%c0_56, %105, %c0_57], %108 {strides = array<i32>} : memref<2x32x128xbf16, #tpu.memory_space<vmem>>, vector<1x16x128xbf16>,
    } else {
    }
    %c1_i32_48 = arith.constant 1 : i32
    %93 = arith.cmpi eq, %11, %c1_i32_48 : i32
    %94 = arith.extui %93 : i1 to i32
    %c0_i32_49 = arith.constant 0 : i32
    %95 = arith.cmpi ne, %94, %c0_i32_49 : i32
    scf.if %95 {
      %c1 = arith.constant 1 : index
      %105 = arith.index_cast %1 : i32 to index
      %c0_56 = arith.constant 0 : index
      %106 = vector.load %arg19[%c1, %105, %c0_56] : memref<2x32x128xbf16, #tpu.memory_space<vmem>>, vector<1x16x128xbf16>
      %107 = vector.shape_cast %106 : vector<1x16x128xbf16> to vector<16x128xbf16>
      %108 = vector.shape_cast %89 : vector<16x128xbf16> to vector<1x16x128xbf16>
      tpu.vector_store %arg19[%c1, %105, %c0_56], %108 {strides = array<i32>} : memref<2x32x128xbf16, #tpu.memory_space<vmem>>, vector<1x16x128xbf16>,
    } else {
    }
    %c0_i32_50 = arith.constant 0 : i32
    %96 = arith.cmpi eq, %arg0, %c0_i32_50 : i32
    %97 = arith.extui %96 : i1 to i32
    %c0_i32_51 = arith.constant 0 : i32
    %98 = arith.cmpi ne, %97, %c0_i32_51 : i32
    scf.if %98 {
      %c0_56 = arith.constant 0 : index
      %c0_57 = arith.constant 0 : index
      %c0_58 = arith.constant 0 : index
      %105 = vector.load %arg12[%c0_56, %c0_57, %c0_58] : memref<1x128x128xbf16, #tpu.memory_space<vmem>>, vector<1x128x128xbf16>
      %106 = vector.shape_cast %105 : vector<1x128x128xbf16> to vector<128x128xbf16>
      %cst_59 = arith.constant dense<0.000000e+00> : vector<16x128xf32>
      %107 = tpu.matmul %89, %106, %cst_59 {dimension_numbers = #tpu.dot_dimension_numbers<[1], [0], [0], [1], [0, 0, 1, 1], [], []>} : vector<16x128xbf16>, vector<128x128xbf16>, vector<16x128xf32> -> vector<16x128xf32>
      %c0_60 = arith.constant 0 : index
      %c0_61 = arith.constant 0 : index
      %c0_62 = arith.constant 0 : index
      %108 = vector.load %arg13[%c0_60, %c0_61, %c0_62] : memref<1x1x128xf32, #tpu.memory_space<vmem>>, vector<1x1x128xf32>
      %109 = vector.shape_cast %108 : vector<1x1x128xf32> to vector<1x128xf32>
      %110 = vector.broadcast %109 : vector<1x128xf32> to vector<16x128xf32>
      %111 = arith.addf %107, %110 : vector<16x128xf32>
      %cst_63 = arith.constant 0.000000e+00 : f32
      %112 = vector.broadcast %cst_63 : f32 to vector<16x128xf32>
      %113 = arith.maximumf %111, %112 : vector<16x128xf32>
      %114 = arith.truncf %113 : vector<16x128xf32> to vector<16x128xbf16>
      %c0_64 = arith.constant 0 : index
      %c0_65 = arith.constant 0 : index
      %c0_66 = arith.constant 0 : index
      %115 = vector.load %arg14[%c0_64, %c0_65, %c0_66] : memref<1x128x128xbf16, #tpu.memory_space<vmem>>, vector<1x128x128xbf16>
      %116 = vector.shape_cast %115 : vector<1x128x128xbf16> to vector<128x128xbf16>
      %cst_67 = arith.constant dense<0.000000e+00> : vector<16x128xf32>
      %117 = tpu.matmul %114, %116, %cst_67 {dimension_numbers = #tpu.dot_dimension_numbers<[1], [0], [0], [1], [0, 0, 1, 1], [], []>} : vector<16x128xbf16>, vector<128x128xbf16>, vector<16x128xf32> -> vector<16x128xf32>
      %c0_68 = arith.constant 0 : index
      %c0_69 = arith.constant 0 : index
      %c0_70 = arith.constant 0 : index
      %118 = vector.load %arg15[%c0_68, %c0_69, %c0_70] : memref<1x1x128xf32, #tpu.memory_space<vmem>>, vector<1x1x128xf32>
      %119 = vector.shape_cast %118 : vector<1x1x128xf32> to vector<1x128xf32>
      %120 = vector.broadcast %119 : vector<1x128xf32> to vector<16x128xf32>
      %121 = arith.addf %117, %120 : vector<16x128xf32>
      %122 = arith.index_cast %1 : i32 to index
      %c0_71 = arith.constant 0 : index
      %123 = vector.load %arg16[%122, %c0_71] : memref<32x128xf32, #tpu.memory_space<vmem>>, vector<16x128xf32>
      tpu.vector_store %arg16[%122, %c0_71], %121 {strides = array<i32>} : memref<32x128xf32, #tpu.memory_space<vmem>>, vector<16x128xf32>,
    } else {
    }
    %c1_i32_52 = arith.constant 1 : i32
    %99 = arith.cmpi eq, %arg0, %c1_i32_52 : i32
    %100 = arith.extui %99 : i1 to i32
    %c0_i32_53 = arith.constant 0 : i32
    %101 = arith.cmpi ne, %100, %c0_i32_53 : i32
    scf.if %101 {
      %c0_56 = arith.constant 0 : index
      %c0_57 = arith.constant 0 : index
      %c0_58 = arith.constant 0 : index
      %105 = vector.load %arg12[%c0_56, %c0_57, %c0_58] : memref<1x128x128xbf16, #tpu.memory_space<vmem>>, vector<1x128x128xbf16>
      %106 = vector.shape_cast %105 : vector<1x128x128xbf16> to vector<128x128xbf16>
      %cst_59 = arith.constant dense<0.000000e+00> : vector<16x128xf32>
      %107 = tpu.matmul %89, %106, %cst_59 {dimension_numbers = #tpu.dot_dimension_numbers<[1], [0], [0], [1], [0, 0, 1, 1], [], []>} : vector<16x128xbf16>, vector<128x128xbf16>, vector<16x128xf32> -> vector<16x128xf32>
      %c0_60 = arith.constant 0 : index
      %c0_61 = arith.constant 0 : index
      %c0_62 = arith.constant 0 : index
      %108 = vector.load %arg13[%c0_60, %c0_61, %c0_62] : memref<1x1x128xf32, #tpu.memory_space<vmem>>, vector<1x1x128xf32>
      %109 = vector.shape_cast %108 : vector<1x1x128xf32> to vector<1x128xf32>
      %110 = vector.broadcast %109 : vector<1x128xf32> to vector<16x128xf32>
      %111 = arith.addf %107, %110 : vector<16x128xf32>
      %cst_63 = arith.constant 0.000000e+00 : f32
      %112 = vector.broadcast %cst_63 : f32 to vector<16x128xf32>
      %113 = arith.maximumf %111, %112 : vector<16x128xf32>
      %114 = arith.truncf %113 : vector<16x128xf32> to vector<16x128xbf16>
      %c0_64 = arith.constant 0 : index
      %c0_65 = arith.constant 0 : index
      %c0_66 = arith.constant 0 : index
      %115 = vector.load %arg14[%c0_64, %c0_65, %c0_66] : memref<1x128x128xbf16, #tpu.memory_space<vmem>>, vector<1x128x128xbf16>
      %116 = vector.shape_cast %115 : vector<1x128x128xbf16> to vector<128x128xbf16>
      %cst_67 = arith.constant dense<0.000000e+00> : vector<16x128xf32>
      %117 = tpu.matmul %114, %116, %cst_67 {dimension_numbers = #tpu.dot_dimension_numbers<[1], [0], [0], [1], [0, 0, 1, 1], [], []>} : vector<16x128xbf16>, vector<128x128xbf16>, vector<16x128xf32> -> vector<16x128xf32>
      %c0_68 = arith.constant 0 : index
      %c0_69 = arith.constant 0 : index
      %c0_70 = arith.constant 0 : index
      %118 = vector.load %arg15[%c0_68, %c0_69, %c0_70] : memref<1x1x128xf32, #tpu.memory_space<vmem>>, vector<1x1x128xf32>
      %119 = vector.shape_cast %118 : vector<1x1x128xf32> to vector<1x128xf32>
      %120 = vector.broadcast %119 : vector<1x128xf32> to vector<16x128xf32>
      %121 = arith.addf %117, %120 : vector<16x128xf32>
      %122 = arith.index_cast %1 : i32 to index
      %c0_71 = arith.constant 0 : index
      %123 = vector.load %arg17[%122, %c0_71] : memref<32x128xf32, #tpu.memory_space<vmem>>, vector<16x128xf32>
      tpu.vector_store %arg17[%122, %c0_71], %121 {strides = array<i32>} : memref<32x128xf32, #tpu.memory_space<vmem>>, vector<16x128xf32>,
    } else {
    }
    %c2_i32_54 = arith.constant 2 : i32
    %102 = arith.cmpi eq, %arg0, %c2_i32_54 : i32
    %103 = arith.extui %102 : i1 to i32
    %c0_i32_55 = arith.constant 0 : i32
    %104 = arith.cmpi ne, %103, %c0_i32_55 : i32
    scf.if %104 {
      %c0_56 = arith.constant 0 : index
      %c0_57 = arith.constant 0 : index
      %c0_58 = arith.constant 0 : index
      %105 = vector.load %arg12[%c0_56, %c0_57, %c0_58] : memref<1x128x128xbf16, #tpu.memory_space<vmem>>, vector<1x128x128xbf16>
      %106 = vector.shape_cast %105 : vector<1x128x128xbf16> to vector<128x128xbf16>
      %cst_59 = arith.constant dense<0.000000e+00> : vector<16x128xf32>
      %107 = tpu.matmul %89, %106, %cst_59 {dimension_numbers = #tpu.dot_dimension_numbers<[1], [0], [0], [1], [0, 0, 1, 1], [], []>} : vector<16x128xbf16>, vector<128x128xbf16>, vector<16x128xf32> -> vector<16x128xf32>
      %c0_60 = arith.constant 0 : index
      %c0_61 = arith.constant 0 : index
      %c0_62 = arith.constant 0 : index
      %108 = vector.load %arg13[%c0_60, %c0_61, %c0_62] : memref<1x1x128xf32, #tpu.memory_space<vmem>>, vector<1x1x128xf32>
      %109 = vector.shape_cast %108 : vector<1x1x128xf32> to vector<1x128xf32>
      %110 = vector.broadcast %109 : vector<1x128xf32> to vector<16x128xf32>
      %111 = arith.addf %107, %110 : vector<16x128xf32>
      %cst_63 = arith.constant 0.000000e+00 : f32
      %112 = vector.broadcast %cst_63 : f32 to vector<16x128xf32>
      %113 = arith.maximumf %111, %112 : vector<16x128xf32>
      %114 = arith.truncf %113 : vector<16x128xf32> to vector<16x128xbf16>
      %c0_64 = arith.constant 0 : index
      %c0_65 = arith.constant 0 : index
      %c0_66 = arith.constant 0 : index
      %115 = vector.load %arg14[%c0_64, %c0_65, %c0_66] : memref<1x128x128xbf16, #tpu.memory_space<vmem>>, vector<1x128x128xbf16>
      %116 = vector.shape_cast %115 : vector<1x128x128xbf16> to vector<128x128xbf16>
      %cst_67 = arith.constant dense<0.000000e+00> : vector<16x128xf32>
      %117 = tpu.matmul %114, %116, %cst_67 {dimension_numbers = #tpu.dot_dimension_numbers<[1], [0], [0], [1], [0, 0, 1, 1], [], []>} : vector<16x128xbf16>, vector<128x128xbf16>, vector<16x128xf32> -> vector<16x128xf32>
      %c0_68 = arith.constant 0 : index
      %c0_69 = arith.constant 0 : index
      %c0_70 = arith.constant 0 : index
      %118 = vector.load %arg15[%c0_68, %c0_69, %c0_70] : memref<1x1x128xf32, #tpu.memory_space<vmem>>, vector<1x1x128xf32>
      %119 = vector.shape_cast %118 : vector<1x1x128xf32> to vector<1x128xf32>
      %120 = vector.broadcast %119 : vector<1x128xf32> to vector<16x128xf32>
      %121 = arith.addf %117, %120 : vector<16x128xf32>
      %122 = arith.index_cast %1 : i32 to index
      %c0_71 = arith.constant 0 : index
      %123 = vector.load %arg18[%122, %c0_71] : memref<32x128xf32, #tpu.memory_space<vmem>>, vector<16x128xf32>
      tpu.vector_store %arg18[%122, %c0_71], %121 {strides = array<i32>} : memref<32x128xf32, #tpu.memory_space<vmem>>, vector<16x128xf32>,
    } else {
    }
    return
  }
  func.func @transform_0(%arg0: i32, %arg1: i32) -> (i32, i32) {
    %c0_i32 = arith.constant 0 : i32
    %c0_i32_0 = arith.constant 0 : i32
    %c0_i32_1 = arith.constant 0 : i32
    return %c0_i32, %c0_i32_0 : i32, i32
  }
  func.func @transform_1(%arg0: i32, %arg1: i32) -> (i32, i32) {
    %c0_i32 = arith.constant 0 : i32
    %c0_i32_0 = arith.constant 0 : i32
    return %arg1, %c0_i32 : i32, i32
  }
  func.func @transform_2(%arg0: i32, %arg1: i32) -> (i32, i32, i32) {
    %c0_i32 = arith.constant 0 : i32
    %c0_i32_0 = arith.constant 0 : i32
    %c0_i32_1 = arith.constant 0 : i32
    return %arg0, %c0_i32, %c0_i32_0 : i32, i32, i32
  }
  func.func @transform_3(%arg0: i32, %arg1: i32) -> (i32, i32, i32) {
    %c0_i32 = arith.constant 0 : i32
    %c0_i32_0 = arith.constant 0 : i32
    %c0_i32_1 = arith.constant 0 : i32
    return %arg0, %c0_i32, %c0_i32_0 : i32, i32, i32
  }
  func.func @transform_4(%arg0: i32, %arg1: i32) -> (i32, i32, i32) {
    %c0_i32 = arith.constant 0 : i32
    %c0_i32_0 = arith.constant 0 : i32
    %c0_i32_1 = arith.constant 0 : i32
    return %arg0, %c0_i32, %c0_i32_0 : i32, i32, i32
  }
  func.func @transform_5(%arg0: i32, %arg1: i32) -> (i32, i32, i32) {
    %c0_i32 = arith.constant 0 : i32
    %c0_i32_0 = arith.constant 0 : i32
    %c0_i32_1 = arith.constant 0 : i32
    return %arg0, %c0_i32, %c0_i32_0 : i32, i32, i32
  }
  func.func @transform_6(%arg0: i32, %arg1: i32) -> (i32, i32, i32) {
    %c0_i32 = arith.constant 0 : i32
    %c0_i32_0 = arith.constant 0 : i32
    %c0_i32_1 = arith.constant 0 : i32
    return %arg0, %c0_i32, %c0_i32_0 : i32, i32, i32
  }
  func.func @transform_7(%arg0: i32, %arg1: i32) -> (i32, i32, i32) {
    %c0_i32 = arith.constant 0 : i32
    %c0_i32_0 = arith.constant 0 : i32
    %c0_i32_1 = arith.constant 0 : i32
    return %arg0, %c0_i32, %c0_i32_0 : i32, i32, i32
  }
  func.func @transform_8(%arg0: i32, %arg1: i32) -> (i32, i32, i32) {
    %c0_i32 = arith.constant 0 : i32
    %c0_i32_0 = arith.constant 0 : i32
    %c0_i32_1 = arith.constant 0 : i32
    return %arg0, %c0_i32, %c0_i32_0 : i32, i32, i32
  }
  func.func @transform_9(%arg0: i32, %arg1: i32) -> (i32, i32, i32) {
    %c0_i32 = arith.constant 0 : i32
    %c0_i32_0 = arith.constant 0 : i32
    %c0_i32_1 = arith.constant 0 : i32
    return %arg0, %c0_i32, %c0_i32_0 : i32, i32, i32
  }
  func.func @transform_10(%arg0: i32, %arg1: i32) -> (i32, i32, i32) {
    %c0_i32 = arith.constant 0 : i32
    %0 = arith.cmpi eq, %arg0, %c0_i32 : i32
    %c0_i32_0 = arith.constant 0 : i32
    %c0_i32_1 = arith.constant 0 : i32
    %1 = arith.select %0, %c0_i32_0, %c0_i32_1 : i32
    %c1_i32 = arith.constant 1 : i32
    %2 = arith.cmpi eq, %arg0, %c1_i32 : i32
    %c1_i32_2 = arith.constant 1 : i32
    %3 = arith.select %2, %c1_i32_2, %1 : i32
    %c2_i32 = arith.constant 2 : i32
    %4 = arith.cmpi eq, %arg0, %c2_i32 : i32
    %c2_i32_3 = arith.constant 2 : i32
    %5 = arith.select %4, %c2_i32_3, %3 : i32
    %c0_i32_4 = arith.constant 0 : i32
    %c0_i32_5 = arith.constant 0 : i32
    %c0_i32_6 = arith.constant 0 : i32
    return %5, %c0_i32_4, %c0_i32_5 : i32, i32, i32
  }
  func.func @transform_11(%arg0: i32, %arg1: i32) -> (i32, i32, i32) {
    %c0_i32 = arith.constant 0 : i32
    %0 = arith.cmpi eq, %arg0, %c0_i32 : i32
    %c0_i32_0 = arith.constant 0 : i32
    %c0_i32_1 = arith.constant 0 : i32
    %1 = arith.select %0, %c0_i32_0, %c0_i32_1 : i32
    %c1_i32 = arith.constant 1 : i32
    %2 = arith.cmpi eq, %arg0, %c1_i32 : i32
    %c1_i32_2 = arith.constant 1 : i32
    %3 = arith.select %2, %c1_i32_2, %1 : i32
    %c2_i32 = arith.constant 2 : i32
    %4 = arith.cmpi eq, %arg0, %c2_i32 : i32
    %c2_i32_3 = arith.constant 2 : i32
    %5 = arith.select %4, %c2_i32_3, %3 : i32
    %c0_i32_4 = arith.constant 0 : i32
    %c0_i32_5 = arith.constant 0 : i32
    %c0_i32_6 = arith.constant 0 : i32
    return %5, %c0_i32_4, %c0_i32_5 : i32, i32, i32
  }
  func.func @transform_12(%arg0: i32, %arg1: i32) -> (i32, i32, i32) {
    %c0_i32 = arith.constant 0 : i32
    %0 = arith.cmpi eq, %arg0, %c0_i32 : i32
    %c0_i32_0 = arith.constant 0 : i32
    %c0_i32_1 = arith.constant 0 : i32
    %1 = arith.select %0, %c0_i32_0, %c0_i32_1 : i32
    %c1_i32 = arith.constant 1 : i32
    %2 = arith.cmpi eq, %arg0, %c1_i32 : i32
    %c1_i32_2 = arith.constant 1 : i32
    %3 = arith.select %2, %c1_i32_2, %1 : i32
    %c2_i32 = arith.constant 2 : i32
    %4 = arith.cmpi eq, %arg0, %c2_i32 : i32
    %c2_i32_3 = arith.constant 2 : i32
    %5 = arith.select %4, %c2_i32_3, %3 : i32
    %c0_i32_4 = arith.constant 0 : i32
    %c0_i32_5 = arith.constant 0 : i32
    %c0_i32_6 = arith.constant 0 : i32
    return %5, %c0_i32_4, %c0_i32_5 : i32, i32, i32
  }
  func.func @transform_13(%arg0: i32, %arg1: i32) -> (i32, i32, i32) {
    %c0_i32 = arith.constant 0 : i32
    %0 = arith.cmpi eq, %arg0, %c0_i32 : i32
    %c0_i32_0 = arith.constant 0 : i32
    %c0_i32_1 = arith.constant 0 : i32
    %1 = arith.select %0, %c0_i32_0, %c0_i32_1 : i32
    %c1_i32 = arith.constant 1 : i32
    %2 = arith.cmpi eq, %arg0, %c1_i32 : i32
    %c1_i32_2 = arith.constant 1 : i32
    %3 = arith.select %2, %c1_i32_2, %1 : i32
    %c2_i32 = arith.constant 2 : i32
    %4 = arith.cmpi eq, %arg0, %c2_i32 : i32
    %c2_i32_3 = arith.constant 2 : i32
    %5 = arith.select %4, %c2_i32_3, %3 : i32
    %c0_i32_4 = arith.constant 0 : i32
    %c0_i32_5 = arith.constant 0 : i32
    %c0_i32_6 = arith.constant 0 : i32
    return %5, %c0_i32_4, %c0_i32_5 : i32, i32, i32
  }
  func.func @transform_14(%arg0: i32, %arg1: i32) -> (i32, i32) {
    %c0_i32 = arith.constant 0 : i32
    %c0_i32_0 = arith.constant 0 : i32
    %c0_i32_1 = arith.constant 0 : i32
    return %c0_i32, %c0_i32_0 : i32, i32
  }
  func.func @transform_15(%arg0: i32, %arg1: i32) -> (i32, i32) {
    %c0_i32 = arith.constant 0 : i32
    %c0_i32_0 = arith.constant 0 : i32
    %c0_i32_1 = arith.constant 0 : i32
    return %c0_i32, %c0_i32_0 : i32, i32
  }
  func.func @transform_16(%arg0: i32, %arg1: i32) -> (i32, i32) {
    %c0_i32 = arith.constant 0 : i32
    %c0_i32_0 = arith.constant 0 : i32
    %c0_i32_1 = arith.constant 0 : i32
    return %c0_i32, %c0_i32_0 : i32, i32
  }
}

module attributes {stable_mosaic.version = 11 : i64} {
  func.func @kernel(%arg0: i32, %arg1: i32, %arg2: memref<32x128xbf16, #tpu.memory_space<vmem>>, %arg3: memref<16x32xbf16, #tpu.memory_space<vmem>>, %arg4: memref<1x128x384xbf16, #tpu.memory_space<vmem>>, %arg5: memref<1x1x384xf32, #tpu.memory_space<vmem>>, %arg6: memref<1x128x384xbf16, #tpu.memory_space<vmem>>, %arg7: memref<1x1x384xf32, #tpu.memory_space<vmem>>, %arg8: memref<1x128x128xbf16, #tpu.memory_space<vmem>>, %arg9: memref<1x1x128xf32, #tpu.memory_space<vmem>>, %arg10: memref<1x128x128xbf16, #tpu.memory_space<vmem>>, %arg11: memref<1x1x128xf32, #tpu.memory_space<vmem>>, %arg12: memref<1x128x128xbf16, #tpu.memory_space<vmem>>, %arg13: memref<1x1x128xf32, #tpu.memory_space<vmem>>, %arg14: memref<1x128x128xbf16, #tpu.memory_space<vmem>>, %arg15: memref<1x1x128xf32, #tpu.memory_space<vmem>>, %arg16: memref<32x128xf32, #tpu.memory_space<vmem>>, %arg17: memref<32x128xf32, #tpu.memory_space<vmem>>, %arg18: memref<32x128xf32, #tpu.memory_space<vmem>>, %arg19: memref<2x32x128xbf16, #tpu.memory_space<vmem>>) attributes {dimension_semantics = [#tpu.dimension_semantics<arbitrary>, #tpu.dimension_semantics<arbitrary>], iteration_bounds = array<i64: 3, 2>, scalar_prefetch = 0 : i64, scratch_operands = 1 : i64, tpu.core_type = #tpu.core_type<tc>, window_params = [{pipeline_mode = #tpu.pipeline_mode<synchronous>, transform_indices = @transform_0, window_bounds = array<i64: 32, 128>}, {transform_indices = @transform_1, window_bounds = array<i64: 16, 32>}, {transform_indices = @transform_2, window_bounds = array<i64: 1, 128, 384>}, {transform_indices = @transform_3, window_bounds = array<i64: 1, 1, 384>}, {transform_indices = @transform_4, window_bounds = array<i64: 1, 128, 384>}, {transform_indices = @transform_5, window_bounds = array<i64: 1, 1, 384>}, {transform_indices = @transform_6, window_bounds = array<i64: 1, 128, 128>}, {transform_indices = @transform_7, window_bounds = array<i64: 1, 1, 128>}, {transform_indices = @transform_8, window_bounds = array<i64: 1, 128, 128>}, {transform_indices = @transform_9, window_bounds = array<i64: 1, 1, 128>}, {transform_indices = @transform_10, window_bounds = array<i64: 1, 128, 128>}, {transform_indices = @transform_11, window_bounds = array<i64: 1, 1, 128>}, {transform_indices = @transform_12, window_bounds = array<i64: 1, 128, 128>}, {transform_indices = @transform_13, window_bounds = array<i64: 1, 1, 128>}, {pipeline_mode = #tpu.pipeline_mode<synchronous>, transform_indices = @transform_14, window_bounds = array<i64: 32, 128>}, {pipeline_mode = #tpu.pipeline_mode<synchronous>, transform_indices = @transform_15, window_bounds = array<i64: 32, 128>}, {pipeline_mode = #tpu.pipeline_mode<synchronous>, transform_indices = @transform_16, window_bounds = array<i64: 32, 128>}]} {
    %c16_i32 = arith.constant 16 : i32
    %0 = arith.muli %arg1, %c16_i32 : i32
    %1 = tpu.assume_multiple %0, 16 : i32
    %c2_i32 = arith.constant 2 : i32
    %c0_i32 = arith.constant 0 : i32
    %2 = arith.cmpi eq, %c2_i32, %c0_i32 : i32
    %c1_i32 = arith.constant 1 : i32
    %3 = arith.select %2, %c1_i32, %c2_i32 : i32
    %4 = arith.remsi %arg0, %3 : i32
    %c0_i32_0 = arith.constant 0 : i32
    %5 = arith.cmpi ne, %4, %c0_i32_0 : i32
    %c0_i32_1 = arith.constant 0 : i32
    %6 = arith.cmpi slt, %4, %c0_i32_1 : i32
    %c0_i32_2 = arith.constant 0 : i32
    %7 = arith.cmpi slt, %3, %c0_i32_2 : i32
    %8 = arith.xori %6, %7 : i1
    %9 = arith.andi %8, %5 : i1
    %10 = arith.addi %4, %3 : i32
    %11 = arith.select %9, %10, %4 : i32
    %c1_i32_3 = arith.constant 1 : i32
    %12 = arith.subi %c1_i32_3, %11 : i32
    %c0_i32_4 = arith.constant 0 : i32
    %13 = arith.cmpi eq, %arg0, %c0_i32_4 : i32
    %c0_i32_5 = arith.constant 0 : i32
    %14 = arith.cmpi eq, %arg1, %c0_i32_5 : i32
    %15 = arith.andi %13, %14 : i1
    %16 = arith.extui %15 : i1 to i32
    %c0_i32_6 = arith.constant 0 : i32
    %17 = arith.cmpi ne, %16, %c0_i32_6 : i32
    scf.if %17 {
      %c0_56 = arith.constant 0 : index
      %c0_57 = arith.constant 0 : index
      %105 = vector.load %arg2[%c0_56, %c0_57] : memref<32x128xbf16, #tpu.memory_space<vmem>>, vector<32x128xbf16>
      %c1 = arith.constant 1 : index
      %c0_58 = arith.constant 0 : index
      %c0_59 = arith.constant 0 : index
      %106 = vector.load %arg19[%c1, %c0_58, %c0_59] : memref<2x32x128xbf16, #tpu.memory_space<vmem>>, vector<1x32x128xbf16>
      %107 = vector.shape_cast %106 : vector<1x32x128xbf16> to vector<32x128xbf16>
      %108 = vector.shape_cast %105 : vector<32x128xbf16> to vector<1x32x128xbf16>
      tpu.vector_store %arg19[%c1, %c0_58, %c0_59], %108 {strides = array<i32>} : memref<2x32x128xbf16, #tpu.memory_space<vmem>>, vector<1x32x128xbf16>,
    } else {
    }
    %18 = arith.index_cast %12 : i32 to index
    %c0 = arith.constant 0 : index
    %c0_7 = arith.constant 0 : index
    %19 = vector.load %arg19[%18, %c0, %c0_7] : memref<2x32x128xbf16, #tpu.memory_space<vmem>>, vector<1x32x128xbf16>
    %20 = vector.shape_cast %19 : vector<1x32x128xbf16> to vector<32x128xbf16>
    %c0_i32_8 = arith.constant 0 : i32
    %c0_i32_9 = arith.constant 0 : i32
    %21 = tpu.memref_slice %arg19[%12, %c0_i32_8, %c0_i32_9] : memref<2x32x128xbf16, #tpu.memory_space<vmem>> -> memref<1x32x128xbf16, #tpu.memory_space<vmem>>
    %22 = tpu.memref_squeeze %21 : memref<1x32x128xbf16, #tpu.memory_space<vmem>> -> memref<32x128xbf16, #tpu.memory_space<vmem>>
    %23 = arith.index_cast %1 : i32 to index
    %c0_10 = arith.constant 0 : index
    %24 = vector.load %22[%23, %c0_10] : memref<32x128xbf16, #tpu.memory_space<vmem>>, vector<16x128xbf16>
    %25 = arith.extf %24 : vector<16x128xbf16> to vector<16x128xf32>
    %c0_11 = arith.constant 0 : index
    %c0_12 = arith.constant 0 : index
    %26 = vector.load %arg3[%c0_11, %c0_12] : memref<16x32xbf16, #tpu.memory_space<vmem>>, vector<16x32xbf16>
    %cst = arith.constant dense<0.000000e+00> : vector<16x128xf32>
    %27 = tpu.matmul %26, %20, %cst {dimension_numbers = #tpu.dot_dimension_numbers<[1], [0], [0], [1], [0, 0, 1, 1], [], []>} : vector<16x32xbf16>, vector<32x128xbf16>, vector<16x128xf32> -> vector<16x128xf32>
    %28 = arith.truncf %27 : vector<16x128xf32> to vector<16x128xbf16>
    %c0_13 = arith.constant 0 : index
    %c0_14 = arith.constant 0 : index
    %c0_15 = arith.constant 0 : index
    %29 = vector.load %arg4[%c0_13, %c0_14, %c0_15] : memref<1x128x384xbf16, #tpu.memory_space<vmem>>, vector<1x128x384xbf16>
    %30 = vector.shape_cast %29 : vector<1x128x384xbf16> to vector<128x384xbf16>
    %cst_16 = arith.constant dense<0.000000e+00> : vector<16x384xf32>
    %31 = tpu.matmul %28, %30, %cst_16 {dimension_numbers = #tpu.dot_dimension_numbers<[1], [0], [0], [1], [0, 0, 1, 1], [], []>} : vector<16x128xbf16>, vector<128x384xbf16>, vector<16x384xf32> -> vector<16x384xf32>
    %c0_17 = arith.constant 0 : index
    %c0_18 = arith.constant 0 : index
    %c0_19 = arith.constant 0 : index
    %32 = vector.load %arg5[%c0_17, %c0_18, %c0_19] : memref<1x1x384xf32, #tpu.memory_space<vmem>>, vector<1x1x384xf32>
    %33 = vector.shape_cast %32 : vector<1x1x384xf32> to vector<1x384xf32>
    %34 = vector.broadcast %33 : vector<1x384xf32> to vector<16x384xf32>
    %35 = arith.addf %31, %34 : vector<16x384xf32>
    %c0_20 = arith.constant 0 : index
    %c0_21 = arith.constant 0 : index
    %c0_22 = arith.constant 0 : index
    %36 = vector.load %arg6[%c0_20, %c0_21, %c0_22] : memref<1x128x384xbf16, #tpu.memory_space<vmem>>, vector<1x128x384xbf16>
    %37 = vector.shape_cast %36 : vector<1x128x384xbf16> to vector<128x384xbf16>
    %cst_23 = arith.constant dense<0.000000e+00> : vector<16x384xf32>
    %38 = tpu.matmul %24, %37, %cst_23 {dimension_numbers = #tpu.dot_dimension_numbers<[1], [0], [0], [1], [0, 0, 1, 1], [], []>} : vector<16x128xbf16>, vector<128x384xbf16>, vector<16x384xf32> -> vector<16x384xf32>
    %c0_24 = arith.constant 0 : index
    %c0_25 = arith.constant 0 : index
    %c0_26 = arith.constant 0 : index
    %39 = vector.load %arg7[%c0_24, %c0_25, %c0_26] : memref<1x1x384xf32, #tpu.memory_space<vmem>>, vector<1x1x384xf32>
    %40 = vector.shape_cast %39 : vector<1x1x384xf32> to vector<1x384xf32>
    %41 = vector.broadcast %40 : vector<1x384xf32> to vector<16x384xf32>
    %42 = arith.addf %38, %41 : vector<16x384xf32>
    %43 = vector.extract_strided_slice %35 {offsets = [0, 0], sizes = [16, 128], strides = [1, 1]} : vector<16x384xf32> to vector<16x128xf32>
    %44 = vector.extract_strided_slice %42 {offsets = [0, 0], sizes = [16, 128], strides = [1, 1]} : vector<16x384xf32> to vector<16x128xf32>
    %45 = arith.addf %43, %44 : vector<16x128xf32>
    %46 = arith.negf %45 : vector<16x128xf32>
    %47 = math.exp %46 : vector<16x128xf32>
    %cst_27 = arith.constant 1.000000e+00 : f32
    %48 = vector.broadcast %cst_27 : f32 to vector<16x128xf32>
    %49 = arith.addf %48, %47 : vector<16x128xf32>
    %50 = arith.divf %48, %49 : vector<16x128xf32>
    %51 = vector.extract_strided_slice %35 {offsets = [0, 128], sizes = [16, 128], strides = [1, 1]} : vector<16x384xf32> to vector<16x128xf32>
    %52 = vector.extract_strided_slice %42 {offsets = [0, 128], sizes = [16, 128], strides = [1, 1]} : vector<16x384xf32> to vector<16x128xf32>
    %53 = arith.addf %51, %52 : vector<16x128xf32>
    %54 = arith.negf %53 : vector<16x128xf32>
    %55 = math.exp %54 : vector<16x128xf32>
    %cst_28 = arith.constant 1.000000e+00 : f32
    %56 = vector.broadcast %cst_28 : f32 to vector<16x128xf32>
    %57 = arith.addf %56, %55 : vector<16x128xf32>
    %58 = arith.divf %56, %57 : vector<16x128xf32>
    %59 = vector.extract_strided_slice %35 {offsets = [0, 256], sizes = [16, 128], strides = [1, 1]} : vector<16x384xf32> to vector<16x128xf32>
    %60 = vector.extract_strided_slice %42 {offsets = [0, 256], sizes = [16, 128], strides = [1, 1]} : vector<16x384xf32> to vector<16x128xf32>
    %61 = arith.mulf %50, %60 : vector<16x128xf32>
    %62 = arith.addf %59, %61 : vector<16x128xf32>
    %63 = math.tanh %62 : vector<16x128xf32>
    %cst_29 = arith.constant 1.000000e+00 : f32
    %64 = vector.broadcast %cst_29 : f32 to vector<16x128xf32>
    %65 = arith.subf %64, %58 : vector<16x128xf32>
    %66 = arith.mulf %65, %63 : vector<16x128xf32>
    %67 = arith.mulf %58, %25 : vector<16x128xf32>
    %68 = arith.addf %66, %67 : vector<16x128xf32>
    %69 = arith.truncf %68 : vector<16x128xf32> to vector<16x128xbf16>
    %c0_30 = arith.constant 0 : index
    %c0_31 = arith.constant 0 : index
    %c0_32 = arith.constant 0 : index
    %70 = vector.load %arg8[%c0_30, %c0_31, %c0_32] : memref<1x128x128xbf16, #tpu.memory_space<vmem>>, vector<1x128x128xbf16>
    %71 = vector.shape_cast %70 : vector<1x128x128xbf16> to vector<128x128xbf16>
    %cst_33 = arith.constant dense<0.000000e+00> : vector<16x128xf32>
    %72 = tpu.matmul %69, %71, %cst_33 {dimension_numbers = #tpu.dot_dimension_numbers<[1], [0], [0], [1], [0, 0, 1, 1], [], []>} : vector<16x128xbf16>, vector<128x128xbf16>, vector<16x128xf32> -> vector<16x128xf32>
    %c0_34 = arith.constant 0 : index
    %c0_35 = arith.constant 0 : index
    %c0_36 = arith.constant 0 : index
    %73 = vector.load %arg9[%c0_34, %c0_35, %c0_36] : memref<1x1x128xf32, #tpu.memory_space<vmem>>, vector<1x1x128xf32>
    %74 = vector.shape_cast %73 : vector<1x1x128xf32> to vector<1x128xf32>
    %75 = vector.broadcast %74 : vector<1x128xf32> to vector<16x128xf32>
    %76 = arith.addf %72, %75 : vector<16x128xf32>
    %cst_37 = arith.constant 0.000000e+00 : f32
    %77 = vector.broadcast %cst_37 : f32 to vector<16x128xf32>
    %78 = arith.maximumf %76, %77 : vector<16x128xf32>
    %79 = arith.truncf %78 : vector<16x128xf32> to vector<16x128xbf16>
    %c0_38 = arith.constant 0 : index
    %c0_39 = arith.constant 0 : index
    %c0_40 = arith.constant 0 : index
    %80 = vector.load %arg10[%c0_38, %c0_39, %c0_40] : memref<1x128x128xbf16, #tpu.memory_space<vmem>>, vector<1x128x128xbf16>
    %81 = vector.shape_cast %80 : vector<1x128x128xbf16> to vector<128x128xbf16>
    %cst_41 = arith.constant dense<0.000000e+00> : vector<16x128xf32>
    %82 = tpu.matmul %79, %81, %cst_41 {dimension_numbers = #tpu.dot_dimension_numbers<[1], [0], [0], [1], [0, 0, 1, 1], [], []>} : vector<16x128xbf16>, vector<128x128xbf16>, vector<16x128xf32> -> vector<16x128xf32>
    %c0_42 = arith.constant 0 : index
    %c0_43 = arith.constant 0 : index
    %c0_44 = arith.constant 0 : index
    %83 = vector.load %arg11[%c0_42, %c0_43, %c0_44] : memref<1x1x128xf32, #tpu.memory_space<vmem>>, vector<1x1x128xf32>
    %84 = vector.shape_cast %83 : vector<1x1x128xf32> to vector<1x128xf32>
    %85 = vector.broadcast %84 : vector<1x128xf32> to vector<16x128xf32>
    %86 = arith.addf %82, %85 : vector<16x128xf32>
    %cst_45 = arith.constant 0.000000e+00 : f32
    %87 = vector.broadcast %cst_45 : f32 to vector<16x128xf32>
    %88 = arith.maximumf %86, %87 : vector<16x128xf32>
    %89 = arith.truncf %88 : vector<16x128xf32> to vector<16x128xbf16>
    %c0_i32_46 = arith.constant 0 : i32
    %90 = arith.cmpi eq, %11, %c0_i32_46 : i32
    %91 = arith.extui %90 : i1 to i32
    %c0_i32_47 = arith.constant 0 : i32
    %92 = arith.cmpi ne, %91, %c0_i32_47 : i32
    scf.if %92 {
      %c0_56 = arith.constant 0 : index
      %105 = arith.index_cast %1 : i32 to index
      %c0_57 = arith.constant 0 : index
      %106 = vector.load %arg19[%c0_56, %105, %c0_57] : memref<2x32x128xbf16, #tpu.memory_space<vmem>>, vector<1x16x128xbf16>
      %107 = vector.shape_cast %106 : vector<1x16x128xbf16> to vector<16x128xbf16>
      %108 = vector.shape_cast %89 : vector<16x128xbf16> to vector<1x16x128xbf16>
      tpu.vector_store %arg19[%c0_56, %105, %c0_57], %108 {strides = array<i32>} : memref<2x32x128xbf16, #tpu.memory_space<vmem>>, vector<1x16x128xbf16>,
    } else {
    }
    %c1_i32_48 = arith.constant 1 : i32
    %93 = arith.cmpi eq, %11, %c1_i32_48 : i32
    %94 = arith.extui %93 : i1 to i32
    %c0_i32_49 = arith.constant 0 : i32
    %95 = arith.cmpi ne, %94, %c0_i32_49 : i32
    scf.if %95 {
      %c1 = arith.constant 1 : index
      %105 = arith.index_cast %1 : i32 to index
      %c0_56 = arith.constant 0 : index
      %106 = vector.load %arg19[%c1, %105, %c0_56] : memref<2x32x128xbf16, #tpu.memory_space<vmem>>, vector<1x16x128xbf16>
      %107 = vector.shape_cast %106 : vector<1x16x128xbf16> to vector<16x128xbf16>
      %108 = vector.shape_cast %89 : vector<16x128xbf16> to vector<1x16x128xbf16>
      tpu.vector_store %arg19[%c1, %105, %c0_56], %108 {strides = array<i32>} : memref<2x32x128xbf16, #tpu.memory_space<vmem>>, vector<1x16x128xbf16>,
    } else {
    }
    %c0_i32_50 = arith.constant 0 : i32
    %96 = arith.cmpi eq, %arg0, %c0_i32_50 : i32
    %97 = arith.extui %96 : i1 to i32
    %c0_i32_51 = arith.constant 0 : i32
    %98 = arith.cmpi ne, %97, %c0_i32_51 : i32
    scf.if %98 {
      %c0_56 = arith.constant 0 : index
      %c0_57 = arith.constant 0 : index
      %c0_58 = arith.constant 0 : index
      %105 = vector.load %arg12[%c0_56, %c0_57, %c0_58] : memref<1x128x128xbf16, #tpu.memory_space<vmem>>, vector<1x128x128xbf16>
      %106 = vector.shape_cast %105 : vector<1x128x128xbf16> to vector<128x128xbf16>
      %cst_59 = arith.constant dense<0.000000e+00> : vector<16x128xf32>
      %107 = tpu.matmul %89, %106, %cst_59 {dimension_numbers = #tpu.dot_dimension_numbers<[1], [0], [0], [1], [0, 0, 1, 1], [], []>} : vector<16x128xbf16>, vector<128x128xbf16>, vector<16x128xf32> -> vector<16x128xf32>
      %c0_60 = arith.constant 0 : index
      %c0_61 = arith.constant 0 : index
      %c0_62 = arith.constant 0 : index
      %108 = vector.load %arg13[%c0_60, %c0_61, %c0_62] : memref<1x1x128xf32, #tpu.memory_space<vmem>>, vector<1x1x128xf32>
      %109 = vector.shape_cast %108 : vector<1x1x128xf32> to vector<1x128xf32>
      %110 = vector.broadcast %109 : vector<1x128xf32> to vector<16x128xf32>
      %111 = arith.addf %107, %110 : vector<16x128xf32>
      %cst_63 = arith.constant 0.000000e+00 : f32
      %112 = vector.broadcast %cst_63 : f32 to vector<16x128xf32>
      %113 = arith.maximumf %111, %112 : vector<16x128xf32>
      %114 = arith.truncf %113 : vector<16x128xf32> to vector<16x128xbf16>
      %c0_64 = arith.constant 0 : index
      %c0_65 = arith.constant 0 : index
      %c0_66 = arith.constant 0 : index
      %115 = vector.load %arg14[%c0_64, %c0_65, %c0_66] : memref<1x128x128xbf16, #tpu.memory_space<vmem>>, vector<1x128x128xbf16>
      %116 = vector.shape_cast %115 : vector<1x128x128xbf16> to vector<128x128xbf16>
      %cst_67 = arith.constant dense<0.000000e+00> : vector<16x128xf32>
      %117 = tpu.matmul %114, %116, %cst_67 {dimension_numbers = #tpu.dot_dimension_numbers<[1], [0], [0], [1], [0, 0, 1, 1], [], []>} : vector<16x128xbf16>, vector<128x128xbf16>, vector<16x128xf32> -> vector<16x128xf32>
      %c0_68 = arith.constant 0 : index
      %c0_69 = arith.constant 0 : index
      %c0_70 = arith.constant 0 : index
      %118 = vector.load %arg15[%c0_68, %c0_69, %c0_70] : memref<1x1x128xf32, #tpu.memory_space<vmem>>, vector<1x1x128xf32>
      %119 = vector.shape_cast %118 : vector<1x1x128xf32> to vector<1x128xf32>
      %120 = vector.broadcast %119 : vector<1x128xf32> to vector<16x128xf32>
      %121 = arith.addf %117, %120 : vector<16x128xf32>
      %122 = arith.index_cast %1 : i32 to index
      %c0_71 = arith.constant 0 : index
      %123 = vector.load %arg16[%122, %c0_71] : memref<32x128xf32, #tpu.memory_space<vmem>>, vector<16x128xf32>
      tpu.vector_store %arg16[%122, %c0_71], %121 {strides = array<i32>} : memref<32x128xf32, #tpu.memory_space<vmem>>, vector<16x128xf32>,
    } else {
    }
    %c1_i32_52 = arith.constant 1 : i32
    %99 = arith.cmpi eq, %arg0, %c1_i32_52 : i32
    %100 = arith.extui %99 : i1 to i32
    %c0_i32_53 = arith.constant 0 : i32
    %101 = arith.cmpi ne, %100, %c0_i32_53 : i32
    scf.if %101 {
      %c0_56 = arith.constant 0 : index
      %c0_57 = arith.constant 0 : index
      %c0_58 = arith.constant 0 : index
      %105 = vector.load %arg12[%c0_56, %c0_57, %c0_58] : memref<1x128x128xbf16, #tpu.memory_space<vmem>>, vector<1x128x128xbf16>
      %106 = vector.shape_cast %105 : vector<1x128x128xbf16> to vector<128x128xbf16>
      %cst_59 = arith.constant dense<0.000000e+00> : vector<16x128xf32>
      %107 = tpu.matmul %89, %106, %cst_59 {dimension_numbers = #tpu.dot_dimension_numbers<[1], [0], [0], [1], [0, 0, 1, 1], [], []>} : vector<16x128xbf16>, vector<128x128xbf16>, vector<16x128xf32> -> vector<16x128xf32>
      %c0_60 = arith.constant 0 : index
      %c0_61 = arith.constant 0 : index
      %c0_62 = arith.constant 0 : index
      %108 = vector.load %arg13[%c0_60, %c0_61, %c0_62] : memref<1x1x128xf32, #tpu.memory_space<vmem>>, vector<1x1x128xf32>
      %109 = vector.shape_cast %108 : vector<1x1x128xf32> to vector<1x128xf32>
      %110 = vector.broadcast %109 : vector<1x128xf32> to vector<16x128xf32>
      %111 = arith.addf %107, %110 : vector<16x128xf32>
      %cst_63 = arith.constant 0.000000e+00 : f32
      %112 = vector.broadcast %cst_63 : f32 to vector<16x128xf32>
      %113 = arith.maximumf %111, %112 : vector<16x128xf32>
      %114 = arith.truncf %113 : vector<16x128xf32> to vector<16x128xbf16>
      %c0_64 = arith.constant 0 : index
      %c0_65 = arith.constant 0 : index
      %c0_66 = arith.constant 0 : index
      %115 = vector.load %arg14[%c0_64, %c0_65, %c0_66] : memref<1x128x128xbf16, #tpu.memory_space<vmem>>, vector<1x128x128xbf16>
      %116 = vector.shape_cast %115 : vector<1x128x128xbf16> to vector<128x128xbf16>
      %cst_67 = arith.constant dense<0.000000e+00> : vector<16x128xf32>
      %117 = tpu.matmul %114, %116, %cst_67 {dimension_numbers = #tpu.dot_dimension_numbers<[1], [0], [0], [1], [0, 0, 1, 1], [], []>} : vector<16x128xbf16>, vector<128x128xbf16>, vector<16x128xf32> -> vector<16x128xf32>
      %c0_68 = arith.constant 0 : index
      %c0_69 = arith.constant 0 : index
      %c0_70 = arith.constant 0 : index
      %118 = vector.load %arg15[%c0_68, %c0_69, %c0_70] : memref<1x1x128xf32, #tpu.memory_space<vmem>>, vector<1x1x128xf32>
      %119 = vector.shape_cast %118 : vector<1x1x128xf32> to vector<1x128xf32>
      %120 = vector.broadcast %119 : vector<1x128xf32> to vector<16x128xf32>
      %121 = arith.addf %117, %120 : vector<16x128xf32>
      %122 = arith.index_cast %1 : i32 to index
      %c0_71 = arith.constant 0 : index
      %123 = vector.load %arg17[%122, %c0_71] : memref<32x128xf32, #tpu.memory_space<vmem>>, vector<16x128xf32>
      tpu.vector_store %arg17[%122, %c0_71], %121 {strides = array<i32>} : memref<32x128xf32, #tpu.memory_space<vmem>>, vector<16x128xf32>,
    } else {
    }
    %c2_i32_54 = arith.constant 2 : i32
    %102 = arith.cmpi eq, %arg0, %c2_i32_54 : i32
    %103 = arith.extui %102 : i1 to i32
    %c0_i32_55 = arith.constant 0 : i32
    %104 = arith.cmpi ne, %103, %c0_i32_55 : i32
    scf.if %104 {
      %c0_56 = arith.constant 0 : index
      %c0_57 = arith.constant 0 : index
      %c0_58 = arith.constant 0 : index
      %105 = vector.load %arg12[%c0_56, %c0_57, %c0_58] : memref<1x128x128xbf16, #tpu.memory_space<vmem>>, vector<1x128x128xbf16>
      %106 = vector.shape_cast %105 : vector<1x128x128xbf16> to vector<128x128xbf16>
      %cst_59 = arith.constant dense<0.000000e+00> : vector<16x128xf32>
      %107 = tpu.matmul %89, %106, %cst_59 {dimension_numbers = #tpu.dot_dimension_numbers<[1], [0], [0], [1], [0, 0, 1, 1], [], []>} : vector<16x128xbf16>, vector<128x128xbf16>, vector<16x128xf32> -> vector<16x128xf32>
      %c0_60 = arith.constant 0 : index
      %c0_61 = arith.constant 0 : index
      %c0_62 = arith.constant 0 : index
      %108 = vector.load %arg13[%c0_60, %c0_61, %c0_62] : memref<1x1x128xf32, #tpu.memory_space<vmem>>, vector<1x1x128xf32>
      %109 = vector.shape_cast %108 : vector<1x1x128xf32> to vector<1x128xf32>
      %110 = vector.broadcast %109 : vector<1x128xf32> to vector<16x128xf32>
      %111 = arith.addf %107, %110 : vector<16x128xf32>
      %cst_63 = arith.constant 0.000000e+00 : f32
      %112 = vector.broadcast %cst_63 : f32 to vector<16x128xf32>
      %113 = arith.maximumf %111, %112 : vector<16x128xf32>
      %114 = arith.truncf %113 : vector<16x128xf32> to vector<16x128xbf16>
      %c0_64 = arith.constant 0 : index
      %c0_65 = arith.constant 0 : index
      %c0_66 = arith.constant 0 : index
      %115 = vector.load %arg14[%c0_64, %c0_65, %c0_66] : memref<1x128x128xbf16, #tpu.memory_space<vmem>>, vector<1x128x128xbf16>
      %116 = vector.shape_cast %115 : vector<1x128x128xbf16> to vector<128x128xbf16>
      %cst_67 = arith.constant dense<0.000000e+00> : vector<16x128xf32>
      %117 = tpu.matmul %114, %116, %cst_67 {dimension_numbers = #tpu.dot_dimension_numbers<[1], [0], [0], [1], [0, 0, 1, 1], [], []>} : vector<16x128xbf16>, vector<128x128xbf16>, vector<16x128xf32> -> vector<16x128xf32>
      %c0_68 = arith.constant 0 : index
      %c0_69 = arith.constant 0 : index
      %c0_70 = arith.constant 0 : index
      %118 = vector.load %arg15[%c0_68, %c0_69, %c0_70] : memref<1x1x128xf32, #tpu.memory_space<vmem>>, vector<1x1x128xf32>
      %119 = vector.shape_cast %118 : vector<1x1x128xf32> to vector<1x128xf32>
      %120 = vector.broadcast %119 : vector<1x128xf32> to vector<16x128xf32>
      %121 = arith.addf %117, %120 : vector<16x128xf32>
      %122 = arith.index_cast %1 : i32 to index
      %c0_71 = arith.constant 0 : index
      %123 = vector.load %arg18[%122, %c0_71] : memref<32x128xf32, #tpu.memory_space<vmem>>, vector<16x128xf32>
      tpu.vector_store %arg18[%122, %c0_71], %121 {strides = array<i32>} : memref<32x128xf32, #tpu.memory_space<vmem>>, vector<16x128xf32>,
    } else {
    }
    return
  }
  func.func @transform_0(%arg0: i32, %arg1: i32) -> (i32, i32) {
    %c0_i32 = arith.constant 0 : i32
    %c0_i32_0 = arith.constant 0 : i32
    %c0_i32_1 = arith.constant 0 : i32
    return %c0_i32, %c0_i32_0 : i32, i32
  }
  func.func @transform_1(%arg0: i32, %arg1: i32) -> (i32, i32) {
    %c0_i32 = arith.constant 0 : i32
    %c0_i32_0 = arith.constant 0 : i32
    return %arg1, %c0_i32 : i32, i32
  }
  func.func @transform_2(%arg0: i32, %arg1: i32) -> (i32, i32, i32) {
    %c0_i32 = arith.constant 0 : i32
    %c0_i32_0 = arith.constant 0 : i32
    %c0_i32_1 = arith.constant 0 : i32
    return %arg0, %c0_i32, %c0_i32_0 : i32, i32, i32
  }
  func.func @transform_3(%arg0: i32, %arg1: i32) -> (i32, i32, i32) {
    %c0_i32 = arith.constant 0 : i32
    %c0_i32_0 = arith.constant 0 : i32
    %c0_i32_1 = arith.constant 0 : i32
    return %arg0, %c0_i32, %c0_i32_0 : i32, i32, i32
  }
  func.func @transform_4(%arg0: i32, %arg1: i32) -> (i32, i32, i32) {
    %c0_i32 = arith.constant 0 : i32
    %c0_i32_0 = arith.constant 0 : i32
    %c0_i32_1 = arith.constant 0 : i32
    return %arg0, %c0_i32, %c0_i32_0 : i32, i32, i32
  }
  func.func @transform_5(%arg0: i32, %arg1: i32) -> (i32, i32, i32) {
    %c0_i32 = arith.constant 0 : i32
    %c0_i32_0 = arith.constant 0 : i32
    %c0_i32_1 = arith.constant 0 : i32
    return %arg0, %c0_i32, %c0_i32_0 : i32, i32, i32
  }
  func.func @transform_6(%arg0: i32, %arg1: i32) -> (i32, i32, i32) {
    %c0_i32 = arith.constant 0 : i32
    %c0_i32_0 = arith.constant 0 : i32
    %c0_i32_1 = arith.constant 0 : i32
    return %arg0, %c0_i32, %c0_i32_0 : i32, i32, i32
  }
  func.func @transform_7(%arg0: i32, %arg1: i32) -> (i32, i32, i32) {
    %c0_i32 = arith.constant 0 : i32
    %c0_i32_0 = arith.constant 0 : i32
    %c0_i32_1 = arith.constant 0 : i32
    return %arg0, %c0_i32, %c0_i32_0 : i32, i32, i32
  }
  func.func @transform_8(%arg0: i32, %arg1: i32) -> (i32, i32, i32) {
    %c0_i32 = arith.constant 0 : i32
    %c0_i32_0 = arith.constant 0 : i32
    %c0_i32_1 = arith.constant 0 : i32
    return %arg0, %c0_i32, %c0_i32_0 : i32, i32, i32
  }
  func.func @transform_9(%arg0: i32, %arg1: i32) -> (i32, i32, i32) {
    %c0_i32 = arith.constant 0 : i32
    %c0_i32_0 = arith.constant 0 : i32
    %c0_i32_1 = arith.constant 0 : i32
    return %arg0, %c0_i32, %c0_i32_0 : i32, i32, i32
  }
  func.func @transform_10(%arg0: i32, %arg1: i32) -> (i32, i32, i32) {
    %c0_i32 = arith.constant 0 : i32
    %0 = arith.cmpi eq, %arg0, %c0_i32 : i32
    %c0_i32_0 = arith.constant 0 : i32
    %c0_i32_1 = arith.constant 0 : i32
    %1 = arith.select %0, %c0_i32_0, %c0_i32_1 : i32
    %c1_i32 = arith.constant 1 : i32
    %2 = arith.cmpi eq, %arg0, %c1_i32 : i32
    %c1_i32_2 = arith.constant 1 : i32
    %3 = arith.select %2, %c1_i32_2, %1 : i32
    %c2_i32 = arith.constant 2 : i32
    %4 = arith.cmpi eq, %arg0, %c2_i32 : i32
    %c2_i32_3 = arith.constant 2 : i32
    %5 = arith.select %4, %c2_i32_3, %3 : i32
    %c0_i32_4 = arith.constant 0 : i32
    %c0_i32_5 = arith.constant 0 : i32
    %c0_i32_6 = arith.constant 0 : i32
    return %5, %c0_i32_4, %c0_i32_5 : i32, i32, i32
  }
  func.func @transform_11(%arg0: i32, %arg1: i32) -> (i32, i32, i32) {
    %c0_i32 = arith.constant 0 : i32
    %0 = arith.cmpi eq, %arg0, %c0_i32 : i32
    %c0_i32_0 = arith.constant 0 : i32
    %c0_i32_1 = arith.constant 0 : i32
    %1 = arith.select %0, %c0_i32_0, %c0_i32_1 : i32
    %c1_i32 = arith.constant 1 : i32
    %2 = arith.cmpi eq, %arg0, %c1_i32 : i32
    %c1_i32_2 = arith.constant 1 : i32
    %3 = arith.select %2, %c1_i32_2, %1 : i32
    %c2_i32 = arith.constant 2 : i32
    %4 = arith.cmpi eq, %arg0, %c2_i32 : i32
    %c2_i32_3 = arith.constant 2 : i32
    %5 = arith.select %4, %c2_i32_3, %3 : i32
    %c0_i32_4 = arith.constant 0 : i32
    %c0_i32_5 = arith.constant 0 : i32
    %c0_i32_6 = arith.constant 0 : i32
    return %5, %c0_i32_4, %c0_i32_5 : i32, i32, i32
  }
  func.func @transform_12(%arg0: i32, %arg1: i32) -> (i32, i32, i32) {
    %c0_i32 = arith.constant 0 : i32
    %0 = arith.cmpi eq, %arg0, %c0_i32 : i32
    %c0_i32_0 = arith.constant 0 : i32
    %c0_i32_1 = arith.constant 0 : i32
    %1 = arith.select %0, %c0_i32_0, %c0_i32_1 : i32
    %c1_i32 = arith.constant 1 : i32
    %2 = arith.cmpi eq, %arg0, %c1_i32 : i32
    %c1_i32_2 = arith.constant 1 : i32
    %3 = arith.select %2, %c1_i32_2, %1 : i32
    %c2_i32 = arith.constant 2 : i32
    %4 = arith.cmpi eq, %arg0, %c2_i32 : i32
    %c2_i32_3 = arith.constant 2 : i32
    %5 = arith.select %4, %c2_i32_3, %3 : i32
    %c0_i32_4 = arith.constant 0 : i32
    %c0_i32_5 = arith.constant 0 : i32
    %c0_i32_6 = arith.constant 0 : i32
    return %5, %c0_i32_4, %c0_i32_5 : i32, i32, i32
  }
  func.func @transform_13(%arg0: i32, %arg1: i32) -> (i32, i32, i32) {
    %c0_i32 = arith.constant 0 : i32
    %0 = arith.cmpi eq, %arg0, %c0_i32 : i32
    %c0_i32_0 = arith.constant 0 : i32
    %c0_i32_1 = arith.constant 0 : i32
    %1 = arith.select %0, %c0_i32_0, %c0_i32_1 : i32
    %c1_i32 = arith.constant 1 : i32
    %2 = arith.cmpi eq, %arg0, %c1_i32 : i32
    %c1_i32_2 = arith.constant 1 : i32
    %3 = arith.select %2, %c1_i32_2, %1 : i32
    %c2_i32 = arith.constant 2 : i32
    %4 = arith.cmpi eq, %arg0, %c2_i32 : i32
    %c2_i32_3 = arith.constant 2 : i32
    %5 = arith.select %4, %c2_i32_3, %3 : i32
    %c0_i32_4 = arith.constant 0 : i32
    %c0_i32_5 = arith.constant 0 : i32
    %c0_i32_6 = arith.constant 0 : i32
    return %5, %c0_i32_4, %c0_i32_5 : i32, i32, i32
  }
  func.func @transform_14(%arg0: i32, %arg1: i32) -> (i32, i32) {
    %c0_i32 = arith.constant 0 : i32
    %c0_i32_0 = arith.constant 0 : i32
    %c0_i32_1 = arith.constant 0 : i32
    return %c0_i32, %c0_i32_0 : i32, i32
  }
  func.func @transform_15(%arg0: i32, %arg1: i32) -> (i32, i32) {
    %c0_i32 = arith.constant 0 : i32
    %c0_i32_0 = arith.constant 0 : i32
    %c0_i32_1 = arith.constant 0 : i32
    return %c0_i32, %c0_i32_0 : i32, i32
  }
  func.func @transform_16(%arg0: i32, %arg1: i32) -> (i32, i32) {
    %c0_i32 = arith.constant 0 : i32
    %c0_i32_0 = arith.constant 0 : i32
    %c0_i32_1 = arith.constant 0 : i32
    return %c0_i32, %c0_i32_0 : i32, i32
  }
}

</mosaic_0001>

<bundles_post_ra>
// kernel: deepgraphlet_forward.1
= control target key start
LH: loop header
LB: loop body
LE: loop exit
PB: predicated region body
PF: predicated region fallthrough
CT: control target
= control target key end

     0   :  { %s4585_s0 = inlined_call_operand.vmem [shape: bf16[32,128], index: 0, kind: input, shape index: {}]   ;;  %s4586_s1 = inlined_call_operand.vmem [shape: bf16[32,32], index: 1, kind: input, shape index: {}]   ;;  %s4587_s2 = inlined_call_operand.hbm [shape: bf16[3,128,384], index: 2, kind: input, shape index: {}]   ;;  %s4588_s3 = inlined_call_operand.vmem [shape: f32[3,1,384], index: 3, kind: input, shape index: {}]   ;;  %s4589_s4 = inlined_call_operand.hbm [shape: bf16[3,128,384], index: 4, kind: input, shape index: {}]   ;;  %s4590_s5 = inlined_call_operand.vmem [shape: f32[3,1,384], index: 5, kind: input, shape index: {}]   ;;  %s4591_s6 = inlined_call_operand.hbm [shape: bf16[3,128,128], index: 6, kind: input, shape index: {}]   ;;  %s4592_s7 = inlined_call_operand.vmem [shape: f32[3,1,128], index: 7, kind: input, shape index: {}]   ;;  %s4593_s8 = inlined_call_operand.hbm [shape: bf16[3,128,128], index: 8, kind: input, shape index: {}]   ;;  %s4594_s9 = inlined_call_operand.vmem [shape: f32[3,1,128], index: 9, kind: input, shape index: {}]   ;;  %s4595_s10 = inlined_call_operand.hbm [shape: bf16[3,128,128], index: 10, kind: input, shape index: {}]   ;;  %s4596_s11 = inlined_call_operand.vmem [shape: f32[3,1,128], index: 11, kind: input, shape index: {}]   ;;  %s4597_s12 = inlined_call_operand.hbm [shape: bf16[3,128,128], index: 12, kind: input, shape index: {}]   ;;  %s4598_s13 = inlined_call_operand.vmem [shape: f32[3,1,128], index: 13, kind: input, shape index: {}]   ;;  %s4599_s14 = inlined_call_operand.vmem [shape: f32[32,128], index: 14, kind: output, shape index: {0}]   ;;  %s4600_s15 = inlined_call_operand.vmem [shape: f32[32,128], index: 15, kind: output, shape index: {1}]   ;;  %s4601_s16 = inlined_call_operand.vmem [shape: f32[32,128], index: 16, kind: output, shape index: {2}]  }
   0x1   :  { %4622 = sst [smem:[#allocation32_spill]] %s4585_s0 }
   0x2   :  { %4623 = sst [smem:[#allocation33_spill]] %s4586_s1 }
   0x3   :  { %4624 = sst [smem:[#allocation34_spill]] %s4587_s2 }
   0x4   :  { %4625 = sst [smem:[#allocation35_spill]] %s4588_s3 }
   0x5   :  { %4626 = sst [smem:[#allocation36_spill]] %s4589_s4 }
   0x6   :  { %4627 = sst [smem:[#allocation37_spill]] %s4590_s5 }
   0x7   :  { %4628 = sst [smem:[#allocation38_spill]] %s4591_s6 }
   0x8   :  { %4629 = sst [smem:[#allocation39_spill]] %s4592_s7 }
   0x9   :  { %4630 = sst [smem:[#allocation40_spill]] %s4593_s8 }
   0xa   :  { %4631 = sst [smem:[#allocation41_spill]] %s4594_s9 }
   0xb   :  { %4632 = sst [smem:[#allocation42_spill]] %s4595_s10 }
   0xc   :  { %4633 = sst [smem:[#allocation43_spill]] %s4596_s11 }
   0xd   :  { %4634 = sst [smem:[#allocation44_spill]] %s4597_s12 }
   0xe   :  { %4635 = sst [smem:[#allocation45_spill]] %s4598_s13 }
   0xf   :  { %4636 = sst [smem:[#allocation46_spill]] %s4599_s14 }
  0x10   :  { %4637 = sst [smem:[#allocation47_spill]] %s4600_s15 }
  0x11   :  { %4638 = sst [smem:[#allocation48_spill]] %s4601_s16 }
  0x12   :  { %22 = vsyncpa [#allocation4], 0 }
  0x13   :  { %24 = vsyncpa [#allocation4 + $0x1], 0 }
  0x14   :  { %25 = vsyncpa [#allocation6], 0 }
  0x15   :  { %27 = vsyncpa [#allocation6 + $0x1], 0 }
  0x16   :  { %28 = vsyncpa [#allocation9], 0 }
  0x17   :  { %30 = vsyncpa [#allocation9 + $0x1], 0 }
  0x18   :  { %31 = vsyncpa [#allocation12], 0 }
  0x19   :  { %33 = vsyncpa [#allocation12 + $0x1], 0  ;;  %s3998_s21 = smov 0   ;;  %s4000_s22 = smov 0  }
  0x1a   :  { %s4002_s23 = smov 0   ;;  %s4004_s24 = smov 0  }
  0x1b   :  { %s4006_s25 = smov 0   ;;  %s4008_s26 = smov 0  }
  0x1c   :  { %s4010_s27 = smov 0   ;;  %s4012_s28 = smov 0  }
  0x1d   :  { %s4014_s29 = smov 0   ;;  %s4016_s30 = smov 0  }
  0x1e   :  { %s4018_s0 = smov 0  }
  0x1f LB: > { %4639 = sst [smem:[#allocation18_spill]] %s3856_s22  ;;  %s4604_s17 = sadd.s32 4294967295, %s3892_s0   ;;  %s3892_s0 = sphi %s4018_s0, %s39_s0   ;;  %s3888_s30 = sphi %s4016_s30, %s4703_s30   ;;  %s3884_s29 = sphi %s4014_s29, %s4702_s29   ;;  %s3880_s28 = sphi %s4012_s28, %s4701_s28   ;;  %s3876_s27 = sphi %s4010_s27, %s4700_s27   ;;  %s3872_s26 = sphi %s4008_s26, %s4699_s26   ;;  %s3868_s25 = sphi %s4006_s25, %s4698_s25   ;;  %s3864_s24 = sphi %s4004_s24, %s4697_s24   ;;  %s3860_s23 = sphi %s4002_s23, %s4696_s23   ;;  %s3856_s22 = sphi %s4000_s22, %s4695_s22   ;;  %s3852_s21 = sphi %s3998_s21, %s4694_s21  }
  0x20   : > { %4640 = sst [smem:[#allocation19_spill]] %s3860_s23  ;;  %s48_s18 = sadd.s32 1, %s3884_s29 }
  0x21   : > { %4641 = sst [smem:[#allocation20_spill]] %s3868_s25  ;;  %p49_p0 = scmp.ge.s32.totalorder %s48_s18, 2 }
  0x22   : > { %4642 = sst [smem:[#allocation21_spill]] %s3872_s26  ;;  %s51_s19 = sadd.s32 1, %s3888_s30 }
  0x23   : > { %4643 = sst [smem:[#allocation22_spill]] %s3876_s27  ;;  %s105_s20 = sadd.s32 1, %s3872_s26 }
  0x24   : > { %4644 = sst [smem:[#allocation23_spill]] %s3880_s28  ;;  %p112_p1 = scmp.ne.s32.totalorder %s3872_s26, %s3868_s25 }
  0x25   : > { %4645 = sst [smem:[#allocation24_spill]] %s3884_s29  ;;  %s4705_s18 = smov (%p49_p0, %s48_s18), 0 }
  0x26   : > { %4646 = sst [smem:[#allocation25_spill]] %s3888_s30  ;;  %s4707_s19 = smov (!%p49_p0, %s51_s19), %s3888_s30 }
  0x27   : > { %4647 = sst [smem:[#allocation26_spill]] %s4705_s18  ;;  %p113_p2 = scmp.eq.s32.totalorder %s3892_s0, 0 }
  0x28   : > { %p118_p3 = scmp.ne.s32.totalorder %s3868_s25, %s3864_s24  ;;  %p53_p4 = scmp.ge.s32.totalorder %s4707_s19, 3 }
  0x29   : > { %p4064_p5 = scmp.eq.s32.totalorder %s4604_s17, 0  ;;  %p114_p6 = por %p113_p2, %p112_p1 }
  0x2a   : > { %s4709_s19 = smov (%p53_p4, %s4707_s19), 0  ;;  %p4617_p8 = scmp.lt.s32.totalorder %s3892_s0, 6 }
  0x2b   : > { %4649 = sst [smem:[#allocation27_spill]] %s4709_s19  ;;  %p4074_p7 = por %p4064_p5, %p118_p3 }
  0x2c   : > { %s102_s24 = ssub.s32 %s3888_s30, %s4709_s19  ;;  %s4082_s29 = sand.u32 1, %s3872_s26  }
  0x2d   : > { %s4650_s18 = scalar_select %p4074_p7, 1, 0 }
  0x2e   : > { %p103_p9 = scmp.eq.s32.totalorder %s102_s24, 0  ;;  %s4606_s17 = smul.u32 192, %s4082_s29 }
  0x2f   : > { %4651 = sst [smem:[#allocation28_spill]] %s4650_s18  ;;  %s4607_s15 = smul.u32 3072, %s3888_s30 }
  0x30   : > { %p4088_p10 = pnand %p4617_p8, %p114_p6  ;;  %s4608_s11 = sand.u32 1, %s3892_s0  }
  0x31   : > { %s4093_s13 = scalar_select %p103_p9, %s3872_s26, %s105_s20  }
  0x32   : > { %s4654_s4 = sld [smem:[#allocation36_spill]]  ;;  %s567_s9 = scalar_lea.vmem [#allocation5], %s4606_s17 }
  0x33   : > { %4653 = sst [smem:[#allocation29_spill]] %s4093_s13  ;;  %s574_s24 = sshll.u32 %s567_s9, 4  ;;  %s575_s24 = int_to_ptr.vmem [resolvable:$true] %s574_s24 }
  0x34   : > { %p2847_p11 = scmp.ge.s32.totalorder %s3892_s0, 1  ;;  %s4106_s7 = scalar_lea.sflag [#allocation6], %s4608_s11 }
  0x35   : > { %p3620_p12 = pneg %p4088_p10  ;;  %s3631_s28 = scalar_lea.vmem %s575_s24, 3072 }
  0x36   : > { %p3632_p13 = scmp.ne.s32.totalorder %s575_s24, %s3631_s28  ;;  %s3894_s20 = smov [#allocation5]  }
  0x37   : > { %s3636_s13 = sshll.u32 %s3894_s20, 4  ;;  %s3637_s13 = int_to_ptr.vmem [resolvable:$false] %s3636_s13 }
  0x38   : > { %s573_s1 = scalar_lea.hbm %s4654_s4, %s4607_s15  ;;  %p3634_p0 = pnand %p3632_p13, %p3620_p12 }
  0x39   : > { %s3638_s3 = scalar_lea.vmem %s3637_s13, 6144  ;;  %p3639_p3 = scmp.lt.s32.totalorder %s575_s24, %s3637_s13 }
  0x3a   : > { %p3635_p1 = pneg %p3634_p0  ;;  %p3640_p4 = scmp.lt.s32.totalorder %s3638_s3, %s3631_s28 }
  0x3c   : > { %p3641_p6 = por %p3640_p4, %p3639_p3 }
  0x3e   : > { %p3642_p9 = pnand %p3641_p6, %p3635_p1 }
  0x40   : > { %3645 = shalt.err (!%p3642_p9)
}
  0x41   : > { %s4610_s5 = smov 192   ;;  %s4611_s9 = smov 12  }
  0x42   : > { %3350 = dma.hbm_to_vmem [thread:$0]  (!%p4088_p10), %s573_s1, 3072, %s575_s24, %s4106_s7, %s4610_s5, %s4610_s5, %s4611_s9  }
  0x43   : > { %p721_p13 = scmp.lt.s32.totalorder %s3892_s0, 7  ;;  %s2835_s13 = sshll.u32 %s4082_s29, 6 }
  0x44   : > { %s3005_s28 = sshll.u32 %s3888_s30, 10  ;;  %s4657_s6 = sld [smem:[#allocation38_spill]] }
  0x45   : > { %p4124_p0 = pnand %p2847_p11, %p721_p13  ;;  %s595_s11 = scalar_lea.vmem [#allocation7], %s2835_s13 }
  0x46   : > { %s602_s4 = sshll.u32 %s595_s11, 4  ;;  %s4658_s8 = sld [smem:[#allocation40_spill]]  ;;  %s4133_s4 = int_to_ptr.vmem [resolvable:$true] %s602_s4 }
  0x47   : > { %s4655_s20 = scalar_select %p4124_p0, 1, 0 }
  0x48   : > { %s622_s5 = scalar_lea.vmem [#allocation8], %s2835_s13  ;;  %s4659_s27 = sand.u32 1, %s3892_s0  }
  0x49   : > { %4656 = sst [smem:[#allocation30_spill]] %s4655_s20  ;;  %s629_s9 = sshll.u32 %s622_s5, 4  ;;  %s630_s9 = int_to_ptr.vmem [resolvable:$true] %s629_s9 }
  0x4a   : > { %s4131_s15 = scalar_lea.hbm %s4657_s6, %s3005_s28  ;;  %s4140_s18 = scalar_lea.sflag [#allocation9], %s4659_s27 }
  0x4b   : > { %s3659_s25 = scalar_lea.vmem %s630_s9, 1024  ;;  %s3897_s17 = smov [#allocation8]  }
  0x4c   : > { %s628_s24 = scalar_lea.hbm %s4658_s8, %s3005_s28  ;;  %p3660_p11 = scmp.ne.s32.totalorder %s630_s9, %s3659_s25 }
  0x4d   : > { %s3664_s11 = sshll.u32 %s3897_s17, 4  ;;  %s3665_s11 = int_to_ptr.vmem [resolvable:$false] %s3664_s11 }
  0x4e   : > { %p3662_p1 = pnand %p3660_p11, %p3620_p12  ;;  %s3666_s3 = scalar_lea.vmem %s3665_s11, 2048 }
  0x4f   : > { %p3667_p4 = scmp.lt.s32.totalorder %s630_s9, %s3665_s11  ;;  %p3668_p6 = scmp.lt.s32.totalorder %s3666_s3, %s3659_s25 }
  0x50   : > { %p3663_p3 = pneg %p3662_p1 }
  0x51   : > { %p3669_p9 = por %p3668_p6, %p3667_p4 }
  0x53   : > { %p3670_p13 = pnand %p3669_p9, %p3663_p3 }
  0x55   : > { %3673 = shalt.err (!%p3670_p13)
}
  0x56   : > { %s3898_s26 = smov 64   ;;  %s3899_s27 = smov 4  }
  0x57   : > { %3356 = dma.hbm_to_vmem [thread:$0]  (!%p4088_p10), %s628_s24, 1024, %s630_s9, %s4140_s18, %s3898_s26, %s3898_s26, %s3899_s27  }
  0x58   : > { %s4660_s5 = smul.u32 3072, %s3888_s30  ;;  %s4661_s2 = sld [smem:[#allocation34_spill]] }
  0x59   : > { %s4662_s1 = smul.u32 192, %s4082_s29  ;;  %s536_s3 = scalar_lea.sflag [#allocation4], %s4082_s29 }
  0x5a   : > { %s3900_s8 = smov [#allocation3]  }
  0x5b   : > { %s539_s17 = scalar_lea.vmem [#allocation3], %s4662_s1  ;;  %s3692_s20 = sshll.u32 %s3900_s8, 4  ;;  %s3693_s20 = int_to_ptr.vmem [resolvable:$false] %s3692_s20 }
  0x5c   : > { %s546_s11 = sshll.u32 %s539_s17, 4  ;;  %s3694_s9 = scalar_lea.vmem %s3693_s20, 6144  ;;  %s547_s11 = int_to_ptr.vmem [resolvable:$true] %s546_s11 }
  0x5d   : > { %s3687_s6 = scalar_lea.vmem %s547_s11, 3072  ;;  %p3695_p4 = scmp.lt.s32.totalorder %s547_s11, %s3693_s20 }
  0x5e   : > { %s545_s25 = scalar_lea.hbm %s4661_s2, %s4660_s5  ;;  %p3688_p11 = scmp.ne.s32.totalorder %s547_s11, %s3687_s6 }
  0x5f   : > { %p3696_p6 = scmp.lt.s32.totalorder %s3694_s9, %s3687_s6 }
  0x60   : > { %p3690_p1 = pnand %p3688_p11, %p3620_p12 }
  0x61   : > { %p3697_p9 = por %p3696_p6, %p3695_p4 }
  0x62   : > { %p3691_p3 = pneg %p3690_p1 }
  0x64   : > { %p3698_p13 = pnand %p3697_p9, %p3691_p3 }
  0x66   : > { %3701 = shalt.err (!%p3698_p13)
}
  0x67   : > { %s4663_s24 = smov 12   ;;  %s4664_s5 = smov 192  }
  0x68   : > { %3347 = dma.hbm_to_vmem [thread:$0]  (!%p4088_p10), %s545_s25, 3072, %s547_s11, %s536_s3, %s4664_s5, %s4664_s5, %s4663_s24  }
  0x69   : > { %s3715_s29 = scalar_lea.vmem %s4133_s4, 1024  ;;  %s3901_s6 = smov [#allocation7]  }
  0x6a   : > { %p3716_p11 = scmp.ne.s32.totalorder %s4133_s4, %s3715_s29  ;;  %s3720_s8 = sshll.u32 %s3901_s6, 4  ;;  %s3721_s8 = int_to_ptr.vmem [resolvable:$false] %s3720_s8 }
  0x6b   : > { %s3722_s20 = scalar_lea.vmem %s3721_s8, 2048  ;;  %p3723_p3 = scmp.lt.s32.totalorder %s4133_s4, %s3721_s8 }
  0x6c   : > { %p3718_p1 = pnand %p3716_p11, %p3620_p12  ;;  %p3724_p4 = scmp.lt.s32.totalorder %s3722_s20, %s3715_s29 }
  0x6e   : > { %p3719_p8 = pneg %p3718_p1  ;;  %p3725_p6 = por %p3724_p4, %p3723_p3 }
  0x70   : > { %p3726_p9 = pnand %p3725_p6, %p3719_p8 }
  0x72   : > { %3729 = shalt.err (!%p3726_p9)
}
  0x73   : > { %3353 = dma.hbm_to_vmem [thread:$0]  (!%p4088_p10), %s4131_s15, 1024, %s4133_s4, %s4106_s7, %s3898_s26, %s3898_s26, %s3899_s27  }
  0x74   : > { %p310_p8 = scmp.eq.s32.totalorder %s3888_s30, 1  ;;  %p312_p12 = scmp.eq.s32.totalorder %s3888_s30, 2 }
  0x75   : > { %p314_p13 = scmp.eq.s32.totalorder %s4709_s19, 1  ;;  %p316_p11 = scmp.eq.s32.totalorder %s4709_s19, 2 }
  0x76   : > { %s311_s14 = scalar_select %p310_p8, 1, 0 }
  0x77   : > { %s315_s13 = scalar_select %p314_p13, 1, 0 }
  0x78   : > { %s4711_s14 = smov (%p312_p12, %s311_s14), 2  ;;  %s321_s28 = sadd.s32 1, %s3860_s23 }
  0x79   : > { %s4713_s13 = smov (%p316_p11, %s315_s13), 2  ;;  %p328_p1 = scmp.ne.s32.totalorder %s3860_s23, %s3856_s22 }
  0x7a   : > { %s318_s25 = ssub.s32 %s4711_s14, %s4713_s13  ;;  %p334_p3 = scmp.ne.s32.totalorder %s3856_s22, %s3852_s21 }
  0x7b   : > { %p319_p4 = scmp.eq.s32.totalorder %s318_s25, 0  ;;  %p330_p10 = por %p328_p1, %p113_p2 }
  0x7c   : > { %p4197_p6 = por %p334_p3, %p4064_p5  ;;  %s647_s7 = sand.u32 1, %s3860_s23  }
  0x7d   : > { %s4203_s15 = scalar_select %p319_p4, %s3860_s23, %s321_s28  }
  0x7e   : > { %s2841_s1 = sshll.u32 %s647_s7, 6  ;;  %s3007_s17 = sshll.u32 %s4711_s14, 10 }
  0x7f   : > { %4666 = sst [smem:[#allocation31_spill]] %s4203_s15  ;;  %s649_s24 = scalar_lea.vmem [#allocation10], %s2841_s1 }
  0x80   : > { %s4667_s10 = sld [smem:[#allocation42_spill]]  ;;  %s660_s5 = sshll.u32 %s649_s24, 4  ;;  %s661_s5 = int_to_ptr.vmem [resolvable:$true] %s660_s5 }
  0x81   : > { %p4668_p9 = scmp.lt.s32.totalorder %s3892_s0, 6  ;;  %s3743_s16 = scalar_lea.vmem %s661_s5, 1024 }
  0x82   : > { %p3744_p5 = scmp.ne.s32.totalorder %s661_s5, %s3743_s16  ;;  %s3902_s29 = smov [#allocation10]  }
  0x83   : > { %p4211_p8 = pnand %p4668_p9, %p330_p10  ;;  %s3748_s6 = sshll.u32 %s3902_s29, 4  ;;  %s3749_s6 = int_to_ptr.vmem [resolvable:$false] %s3748_s6 }
  0x84   : > { %s3750_s8 = scalar_lea.vmem %s3749_s6, 2048  ;;  %p3751_p11 = scmp.lt.s32.totalorder %s661_s5, %s3749_s6 }
  0x85   : > { %p3732_p2 = pneg %p4211_p8  ;;  %p3752_p1 = scmp.lt.s32.totalorder %s3750_s8, %s3743_s16 }
  0x86   : > { %s659_s9 = scalar_lea.hbm %s4667_s10, %s3007_s17 }
  0x87   : > { %p3746_p12 = pnand %p3744_p5, %p3732_p2  ;;  %p3753_p3 = por %p3752_p1, %p3751_p11 }
  0x89   : > { %p3747_p13 = pneg %p3746_p12 }
  0x8b   : > { %p3754_p4 = pnand %p3753_p3, %p3747_p13 }
  0x8d   : > { %3757 = shalt.err (!%p3754_p4)
}
  0x8e   : > { %3359 = dma.hbm_to_vmem [thread:$0]  (!%p4211_p8), %s659_s9, 1024, %s661_s5, %s4140_s18, %s3898_s26, %s3898_s26, %s3899_s27  }
  0x8f   : > { %s4670_s12 = sld [smem:[#allocation44_spill]]  ;;  %s688_s28 = scalar_lea.vmem [#allocation11], %s2841_s1 }
  0x90   : > { %s699_s25 = sshll.u32 %s688_s28, 4  ;;  %s685_s11 = scalar_lea.sflag [#allocation12], %s647_s7  ;;  %s700_s25 = int_to_ptr.vmem [resolvable:$true] %s699_s25 }
  0x91   : > { %s3771_s3 = scalar_lea.vmem %s700_s25, 1024  ;;  %s3903_s24 = smov [#allocation11]  }
  0x92   : > { %p3772_p10 = scmp.ne.s32.totalorder %s700_s25, %s3771_s3  ;;  %s3776_s16 = sshll.u32 %s3903_s24, 4  ;;  %s3777_s16 = int_to_ptr.vmem [resolvable:$false] %s3776_s16 }
  0x93   : > { %s3778_s29 = scalar_lea.vmem %s3777_s16, 2048  ;;  %p3779_p12 = scmp.lt.s32.totalorder %s700_s25, %s3777_s16 }
  0x94   : > { %p3774_p9 = pnand %p3772_p10, %p3732_p2  ;;  %p3780_p13 = scmp.lt.s32.totalorder %s3778_s29, %s3771_s3 }
  0x95   : > { %s698_s13 = scalar_lea.hbm %s4670_s12, %s3007_s17 }
  0x96   : > { %p3775_p5 = pneg %p3774_p9  ;;  %p3781_p11 = por %p3780_p13, %p3779_p12 }
  0x98   : > { %p3782_p1 = pnand %p3781_p11, %p3775_p5 }
  0x9a   : > { %3785 = shalt.err (!%p3782_p1)
}
  0x9b   : > { %3362 = dma.hbm_to_vmem [thread:$0]  (!%p4211_p8), %s698_s13, 1024, %s700_s25, %s685_s11, %s3898_s26, %s3898_s26, %s3899_s27  }
  0x9c   : > { %725 = sbr.rel (%p4124_p0) target bundleno = 2475 (0x9ab), region = 76  ;;  %s4672_s7 = sld [smem:[#allocation20_spill]] (!%p4124_p0) }
  0xa2   : > { %s727_s17 = sand.u32 1, %s4672_s7  }
  0xa3   : > { %s3330_s9 = smul.u32 192, %s727_s17  ;;  %s728_s5 = scalar_lea.sflag [#allocation4], %s727_s17 }
  0xa5   : > { %s4240_s6 = scalar_lea.vmem [#allocation3], %s3330_s9 }
  0xa6   : > { %3831 = dma.done.wait (%p4074_p7), %s728_s5, 3072  }
  0xa7   : > { %3833 = vsyncadd (%p4074_p7), %s728_s5, 4294964224  ;;  %s4674_s21 = sadd.s32 4294967295, %s3892_s0   ;;  %s4248_s27 = scalar_lea.vmem [#allocation5], %s3330_s9 }
  0xa8   : > { %s736_s8 = sand.u32 1, %s4674_s21  }
  0xa9   : > { %s737_s26 = scalar_lea.sflag [#allocation6], %s736_s8 }
  0xaa   : > { %3835 = dma.done.wait (%p4074_p7), %s737_s26, 4096  }
  0xab   : > { %3837 = vsyncadd (%p4074_p7), %s737_s26, 4294963200  ;;  %s2848_s20 = sshll.u32 %s727_s17, 6  ;;  %s755_s13 = scalar_lea.sflag [#allocation9], %s736_s8 }
  0xac   : > { %s4254_s14 = scalar_lea.vmem [#allocation7], %s2848_s20  ;;  %s4256_s28 = scalar_lea.vmem [#allocation8], %s2848_s20 }
  0xad   : > { %3839 = dma.done.wait (%p4074_p7), %s755_s13, 1024  }
  0xae   : > { %3841 = vsyncadd (%p4074_p7), %s755_s13, 4294966272  ;;  %s765_s25 = sand.u32 1, %s3856_s22  }
  0xaf   : > { %s2850_s11 = sshll.u32 %s765_s25, 6 }
  0xb0   : > { %s4263_s3 = scalar_lea.vmem [#allocation10], %s2850_s11 }
  0xb1   : > { %3843 = dma.done.wait (%p4197_p6), %s755_s13, 1024  }
  0xb2   : > { %3845 = vsyncadd (%p4197_p6), %s755_s13, 4294966272  ;;  %s773_s24 = scalar_lea.sflag [#allocation12], %s765_s25  ;;  %s4269_s16 = scalar_lea.vmem [#allocation11], %s2850_s11 }
  0xb3   : > { %3847 = dma.done.wait (%p4197_p6), %s773_s24, 1024  }
  0xb4   : > { %3849 = vsyncadd (%p4197_p6), %s773_s24, 4294966272  ;;  %s4675_s29 = sld [smem:[#allocation22_spill]] }
  0xb5   : > { %s4676_s18 = sld [smem:[#allocation23_spill]] }
  0xb6   : > { %s4677_s5 = sld [smem:[#allocation39_spill]] }
  0xb7   : > { %s4678_s13 = sld [smem:[#allocation41_spill]] }
  0xb8   : > { %s4679_s2 = sld [smem:[#allocation33_spill]] }
  0xb9   : > { %s4680_s30 = sld [smem:[#allocation35_spill]] }
  0xba   : > { %s2852_s7 = sshll.u32 %s4675_s29, 1  ;;  %s4681_s17 = sld [smem:[#allocation37_spill]] }
  0xbb   : > { %p884_p7 = scmp.lt.s32.totalorder %s4676_s18, 2  ;;  %p879_p0 = scmp.lt.s32.totalorder %s2852_s7, 3 }
  0xbc   : > { %p902_p8 = scmp.eq.s32.totalorder %s4676_s18, 1  ;;  %p904_p6 = scmp.eq.s32.totalorder %s4676_s18, 2 }
  0xbd   : > { %s4279_s1 = scalar_select %p884_p7, %s4676_s18, 2 }
  0xbe   : > { %s4715_s7 = smov (!%p879_p0, %s2852_s7), 3  ;;  %p930_p2 = scmp.lt.s32.totalorder %s4676_s18, 0 }
  0xbf   : > { %s3331_s4 = smul.u32 3, %s4279_s1  ;;  %s894_s21 = scalar_lea.vmem %s4677_s5, %s4279_s1 }
  0xc0   : > { %s2853_s8 = sshll.u32 %s4715_s7, 2  ;;  %s897_s25 = scalar_lea.vmem %s4678_s13, %s4279_s1 }
  0xc1   : > { %s4293_s10 = scalar_lea.vmem %s4679_s2, %s2853_s8  ;;  %s4298_s15 = scalar_lea.vmem %s4680_s30, %s3331_s4 }
  0xc2   : > { %s4303_s9 = scalar_lea.vmem %s4681_s17, %s3331_s4  ;;  %s4307_s5 = sshll.u32 %s4675_s29, 4 }
  0xc3   : > { %s903_s7 = scalar_select %p902_p8, 1, 0 }
  0xc4   : > { %s931_s26 = ssub.s32 0, %s4676_s18  ;;  %p943_p3 = scmp.eq.s32.totalorder %s4676_s18, 0 }
  0xc5   : > { %s4717_s7 = smov (%p904_p6, %s903_s7), 2  ;;  %s2855_s2 = smin.u32 %s4676_s18, %s931_s26 }
  0xc6   : > { %p906_p4 = scmp.lt.s32.totalorder %s4717_s7, 2  ;;  %s933_s8 = sand.u32 1, %s2855_s2  }
  0xc7   : > { %p944_p10 = scmp.eq.s32.totalorder %s4675_s29, 0  ;;  %s934_s12 = ssub.s32 0, %s933_s8 }
  0xc8   : > { %s4719_s7 = smov (!%p906_p4, %s4717_s7), 2  ;;  %s4682_s22 = sld [smem:[#allocation43_spill]] }
  0xc9   : > { %p945_p9 = pnand %p944_p10, %p943_p3  ;;  %s4683_s13 = sld [smem:[#allocation45_spill]] }
  0xca   : > { %s4721_s12 = smov (!%p930_p2, %s934_s12), %s933_s8  ;;  %s4684_s26 = sld [smem:[#allocation32_spill]] (!%p945_p9) }
  0xcb   : > { %p2857_p5 = scmp.lt.s32.totalorder %s4721_s12, 0  ;;  %s940_s24 = sadd.s32 2, %s4721_s12 }
  0xcc   : > { %948 = sbr.rel (%p945_p9) target bundleno = 211 (0xd3), region = 104 }
  0xcd   : > { %s4723_s24 = smov (!%p2857_p5, %s940_s24), %s4721_s12 }
  0xce   : > { %s4317_s23 = scalar_lea.vmem %s4682_s22, %s4719_s7  ;;  %s942_s29 = ssub.s32 1, %s4723_s24 }
  0xcf   : > { %s4322_s11 = scalar_lea.vmem %s4683_s13, %s4719_s7 }
  0xd0   : > { %s4685_s2 = smov (!%p945_p9), %s4684_s26 }
  0xd1   : > { %v949_v0 = vld [vmem:[%s4684_s26] sm:$0xff]   ;;  %v951_v1 = vld [vmem:[%s4685_s2 + $0x8] sm:$0xff]  }
  0xd2   : > { %954 = vst [vmem:[#allocation2 + $0x10] sm:$0xff] %v949_v0   ;;  %956 = vst [vmem:[#allocation2 + $0x18] sm:$0xff] %v951_v1  }
  0xd3 PF: > { %s3009_s7 = sshll.u32 %s942_s29, 4  ;;  %v3904_v2 = vmov 0.0   ;;  %vm3905_vm0 = vmmov 0   ;;  %v3468_v5 = vld [vmem:[%s4240_s6 + $0xac] ss:$12 sps:$4 sm:$0xff]   ;;  %v3467_v7 = vld [vmem:[%s4293_s10] sm:$0xff]  }
  0xd4   : > { %3118 = vmatprep.subr.bf16.mxu0 %v3904_v2  ;;  %3122 = vmatprep.mubr.msk.bf16.mxu0 %vm3905_vm0, %v3904_v2  ;;  %s4336_s8 = scalar_lea.vmem [#allocation2], %s3009_s7  ;;  %v3470_v6 = vld [vmem:[%s4240_s6 + $0xa8] ss:$12 sps:$4 sm:$0xff]   ;;  %v3471_v8 = vld [vmem:[%s4240_s6 + $0xb0] ss:$12 sps:$4 sm:$0xff]   ;;  %vm992_vm1 = vcmask 261120  }
  0xd5   : > { %1215 = vmatprep.subr.bf16.mxu1 %v3468_v5  ;;  %v3472_v9 = vld [vmem:[%s4240_s6 + $0x94] ss:$12 sps:$4 sm:$0xff]   ;;  %v3474_v10 = vld [vmem:[%s4240_s6 + $0x90] ss:$12 sps:$4 sm:$0xff]   ;;  %v3475_v12 = vld [vmem:[%s4240_s6 + $0x98] ss:$12 sps:$4 sm:$0xff]  }
  0xd6   : > { %1216 = vmatpush1.bf16.msra.mxu1 %v3470_v6  ;;  %v3476_v11 = vld [vmem:[%s4240_s6 + $0x7c] ss:$12 sps:$4 sm:$0xff]   ;;  %v3478_v13 = vld [vmem:[%s4240_s6 + $0x78] ss:$12 sps:$4 sm:$0xff]   ;;  %v3479_v15 = vld [vmem:[%s4240_s6 + $0x80] ss:$12 sps:$4 sm:$0xff]  }
  0xd7   : > { %1217 = vmatprep.subr.bf16.mxu1 %v3472_v9  ;;  %v3480_v14 = vld [vmem:[%s4240_s6 + $0x64] ss:$12 sps:$4 sm:$0xff]   ;;  %v3482_v16 = vld [vmem:[%s4240_s6 + $0x60] ss:$12 sps:$4 sm:$0xff]   ;;  %v3483_v18 = vld [vmem:[%s4240_s6 + $0x68] ss:$12 sps:$4 sm:$0xff]  }
  0xd8   : > { %v3484_v17 = vld [vmem:[%s4240_s6 + $0x4c] ss:$12 sps:$4 sm:$0xff]   ;;  %v3486_v19 = vld [vmem:[%s4240_s6 + $0x48] ss:$12 sps:$4 sm:$0xff]   ;;  %v3490_v21 = vld [vmem:[%s4240_s6 + $0x30] ss:$12 sps:$4 sm:$0xff]  }
  0xd9   : > { %v3465_v3 = vld [vmem:[%s4336_s8 + $0x8] sm:$0xff]   ;;  %v3466_v4 = vld [vmem:[%s4336_s8] sm:$0xff]   ;;  %v3487_v22 = vld [vmem:[%s4240_s6 + $0x50] ss:$12 sps:$4 sm:$0xff]   ;;  %v3906_v31 = vmov 0   ;;  %s965_s10 = sshra.s32 %s4307_s5, 3 }
  0xda   : > { %3119 = vmatpush3.bf16.msra.mxu0 %v3465_v3  ;;  %1218 = vmatpush1.bf16.msra.mxu1 %v3474_v10  ;;  %v3488_v20 = vld [vmem:[%s4240_s6 + $0x34] ss:$12 sps:$4 sm:$0xff]   ;;  %v3492_v23 = vld [vmem:[%s4240_s6 + $0x1c] ss:$12 sps:$4 sm:$0xff]   ;;  %v3494_v24 = vld [vmem:[%s4240_s6 + $0x18] ss:$12 sps:$4 sm:$0xff]  }
  0xdb   : > { %3120 = vmatprep.subr.bf16.mxu0 %v3904_v2  ;;  %1219 = vmatprep.subr.bf16.mxu1 %v3476_v11  ;;  %v3491_v25 = vld [vmem:[%s4240_s6 + $0x38] ss:$12 sps:$4 sm:$0xff]   ;;  %v3495_v26 = vld [vmem:[%s4240_s6 + $0x20] ss:$12 sps:$4 sm:$0xff]   ;;  %v3499_v29 = vld [vmem:[%s4240_s6 + $0x8] ss:$12 sps:$4 sm:$0xff]  }
  0xdc   : > { %v3496_v27 = vld [vmem:[%s4240_s6 + $0x4] ss:$12 sps:$4 sm:$0xff]   ;;  %v3498_v28 = vld [vmem:[%s4240_s6] ss:$12 sps:$4 sm:$0xff]   ;;  %1247 = vmatprep.mubr.bf16.mxu1 %v3906_v31  ;;  %v3500_v35 = vld [vmem:[%s4248_s27 + $0xa8] ss:$12 sps:$4 sm:$0xff]  }
  0xdd   : > { %v3502_v30 = vld [vmem:[%s4248_s27 + $0xac] ss:$12 sps:$4 sm:$0xff]   ;;  %v3524_v36 = vld [vmem:[%s4248_s27 + $0xb0] ss:$12 sps:$4 sm:$0xff]   ;;  %v3505_v38 = vld [vmem:[%s4248_s27 + $0x94] ss:$12 sps:$4 sm:$0xff]  }
  0xde   : > { %3121 = vmatpush3.bf16.msra.mxu0 %v3466_v4  ;;  %1220 = vmatpush1.bf16.msra.mxu1 %v3478_v13  ;;  %v3503_v40 = vld [vmem:[%s4248_s27 + $0x90] ss:$12 sps:$4 sm:$0xff]   ;;  %v3526_v41 = vld [vmem:[%s4248_s27 + $0x98] ss:$12 sps:$4 sm:$0xff]   ;;  %v3527_v44 = vld [vmem:[%s4248_s27 + $0x80] ss:$12 sps:$4 sm:$0xff]  }
  0xdf   : > { %3126 = vmatprep.subr.bf16.mxu0 %v3904_v2  ;;  %1221 = vmatprep.subr.bf16.mxu1 %v3480_v14  ;;  %v3508_v42 = vld [vmem:[%s4248_s27 + $0x7c] ss:$12 sps:$4 sm:$0xff]   ;;  %v3506_v43 = vld [vmem:[%s4248_s27 + $0x78] ss:$12 sps:$4 sm:$0xff]   ;;  %v3509_v46 = vld [vmem:[%s4248_s27 + $0x60] ss:$12 sps:$4 sm:$0xff]  }
  0xe0   : > { %v3511_v45 = vld [vmem:[%s4248_s27 + $0x64] ss:$12 sps:$4 sm:$0xff]   ;;  %v3528_v47 = vld [vmem:[%s4248_s27 + $0x68] ss:$12 sps:$4 sm:$0xff]   ;;  %v3514_v48 = vld [vmem:[%s4248_s27 + $0x4c] ss:$12 sps:$4 sm:$0xff]  }
  0xe1   : > { %3123 = vmatmul.mubr.msk.bf16.vlgmr.msra.gmra.mxu0 %vm992_vm1, %v3467_v7  ;;  %v3512_v49 = vld [vmem:[%s4248_s27 + $0x48] ss:$12 sps:$4 sm:$0xff]   ;;  %v3529_v50 = vld [vmem:[%s4248_s27 + $0x50] ss:$12 sps:$4 sm:$0xff]   ;;  %v3530_v53 = vld [vmem:[%s4248_s27 + $0x38] ss:$12 sps:$4 sm:$0xff]  }
  0xe2   : > { %3127 = vmatpush3.bf16.msra.mxu0 %v3471_v8  ;;  %3142 = vmatprep.mubr.msk.bf16.mxu0 %vm3905_vm0, %v3904_v2  ;;  %v3517_v51 = vld [vmem:[%s4248_s27 + $0x34] ss:$12 sps:$4 sm:$0xff]   ;;  %v3515_v52 = vld [vmem:[%s4248_s27 + $0x30] ss:$12 sps:$4 sm:$0xff]   ;;  %s4404_s6 = sshll.u32 %s965_s10, 2  ;;  %v3535_v63 = vld [vmem:[%s4254_s14 + $0x28] sm:$0xff]  }
  0xe3   : > { %3128 = vmatprep.subr.bf16.mxu0 %v3904_v2  ;;  %1222 = vmatpush1.bf16.msra.mxu1 %v3482_v16  ;;  %v3520_v54 = vld [vmem:[%s4248_s27 + $0x1c] ss:$12 sps:$4 sm:$0xff]   ;;  %v3518_v55 = vld [vmem:[%s4248_s27 + $0x18] ss:$12 sps:$4 sm:$0xff]   ;;  %v3531_v56 = vld [vmem:[%s4248_s27 + $0x20] ss:$12 sps:$4 sm:$0xff]   ;;  %s968_s12 = scalar_lea.vmem %s4336_s8, %s4404_s6 [#allocation2] }
  0xe4   : > { %1223 = vmatprep.subr.bf16.mxu1 %v3484_v17  ;;  %v3523_v57 = vld [vmem:[%s4248_s27 + $0x4] ss:$12 sps:$4 sm:$0xff]   ;;  %v3521_v58 = vld [vmem:[%s4248_s27] ss:$12 sps:$4 sm:$0xff]   ;;  %v3532_v60 = vld [vmem:[%s4248_s27 + $0x8] ss:$12 sps:$4 sm:$0xff]  }
  0xe5   : > { %v4413_v59 = vld [vmem:[%s968_s12] sm:$0xff]   ;;  %v3533_v61 = vld [vmem:[%s4254_s14 + $0x38] sm:$0xff]   ;;  %v3534_v62 = vld [vmem:[%s4254_s14 + $0x30] sm:$0xff]   ;;  %p2936_p12 = scmp.ne.s32.totalorder %s4723_s24, 0 }
  0xe6   : > { %3129 = vmatpush3.bf16.msra.mxu0 %v3475_v12  ;;  %v3536_v0 = vld [vmem:[%s4254_s14 + $0x20] sm:$0xff]   ;;  %v3537_v1 = vld [vmem:[%s4254_s14 + $0x18] sm:$0xff]   ;;  %v3538_v3 = vld [vmem:[%s4254_s14 + $0x10] sm:$0xff]  }
  0xe7   : > { %3130 = vmatprep.subr.bf16.mxu0 %v3904_v2  ;;  %1224 = vmatpush1.bf16.msra.mxu1 %v3486_v19  ;;  %v3539_v4 = vld [vmem:[%s4254_s14 + $0x8] sm:$0xff]   ;;  %v3540_v5 = vld [vmem:[%s4254_s14] sm:$0xff]   ;;  %v3541_v6 = vld [vmem:[%s4256_s28 + $0x38] sm:$0xff]  }
  0xe8   : > { %1225 = vmatprep.subr.bf16.mxu1 %v3488_v20  ;;  %v3542_v7 = vld [vmem:[%s4256_s28 + $0x30] sm:$0xff]   ;;  %v3543_v8 = vld [vmem:[%s4256_s28 + $0x28] sm:$0xff]   ;;  %v3544_v9 = vld [vmem:[%s4256_s28 + $0x20] sm:$0xff]  }
  0xe9   : > { %v3545_v10 = vld [vmem:[%s4256_s28 + $0x18] sm:$0xff]   ;;  %v1070_v20 = vld [vmem:[%s4298_s15] sm:$0x7] }
  0xea   : > { %3131 = vmatpush3.bf16.msra.mxu0 %v3479_v15  ;;  %v1072_v15 = vlaneseq }
  0xeb   : > { %3132 = vmatprep.subr.bf16.mxu0 %v3904_v2  ;;  %1226 = vmatpush1.bf16.msra.mxu1 %v3490_v21 }
  0xec   : > { %1227 = vmatprep.subr.bf16.mxu1 %v3492_v23  ;;  %v1073_v17 = vshrl.u32 %v1072_v15, 7  ;;  %v971_v15 = vunpack.c.l.bf16 %v4413_v59 }
  0xee   : > { %3133 = vmatpush3.bf16.msra.mxu0 %v3483_v18  ;;  %v1074_v19 = vsub.s32 0, %v1073_v17 }
  0xef   : > { %3134 = vmatprep.subr.bf16.mxu0 %v3904_v2  ;;  %1228 = vmatpush1.bf16.msra.mxu1 %v3494_v24 }
  0xf0   : > { %1229 = vmatprep.subr.bf16.mxu1 %v3496_v27  ;;  %v1075_v23 = vrot.slane %v1070_v20, %v1074_v19 }
  0xf2   : > { %3135 = vmatpush3.bf16.msra.mxu0 %v3487_v22  ;;  %v1331_v22 = vld [vmem:[%s4303_s9] sm:$0x7] }
  0xf3   : > { %3136 = vmatprep.subr.bf16.mxu0 %v3904_v2  ;;  %1230 = vmatpush1.bf16.msra.mxu1 %v3498_v28  ;;  %v1336_v24 = vrot.slane %v1331_v22, %v1074_v19 }
  0xf4   : > { %1482 = vmatprep.subr.bf16.mxu1 %v3502_v30 }
  0xf6   : > { %3137 = vmatpush3.bf16.msra.mxu0 %v3491_v25 }
  0xf7   : > { %3138 = vmatprep.subr.bf16.mxu0 %v3904_v2 }
  0xfa   : > { %3139 = vmatpush3.bf16.msra.mxu0 %v3495_v26  ;;  %v1078_v26 = vsub.s32 1, %v1073_v17 }
  0xfb   : > { %3140 = vmatprep.subr.bf16.mxu0 %v3904_v2 }
  0xfe   : > { %3141 = vmatpush3.bf16.msra.mxu0 %v3499_v29 }
  0xff   : > { %3146 = vmatprep.subr.bf16.mxu0 %v3904_v2 }
 0x1a1   : > { %v1030_v32 = vpop.f32.mrf.mxu0 }
 0x1a3   : > { %v3124_v33 = vpop.f32.mrf.mxu0 }
 0x1a5   : > { %v1033_v34 = vpop.f32.mrf.mxu0 }
 0x1a6   : > { %v1037_v37 = vpack.c.bf16 %v1033_v34, %v1030_v32  ;;  %v1079_v34 = vrot.slane %v1070_v20, %v1078_v26 }
 0x1a7   : > { %v3125_v39 = vpop.f32.mrf.mxu0 }
 0x1a8   : > { %1248 = vmatmul.mubr.bf16.vlgmr.msra.gmra.mxu1 %v1037_v37  ;;  %3143 = vmatmul.mubr.bf16.vlgmr.msra.gmra.mxu0 %v1037_v37 }
 0x1a9   : > { %1483 = vmatpush1.bf16.msra.mxu1 %v3500_v35  ;;  %3147 = vmatpush3.bf16.msra.mxu0 %v3524_v36 }
 0x1aa   : > { %1484 = vmatprep.subr.bf16.mxu1 %v3505_v38  ;;  %1514 = vmatprep.mubr.bf16.mxu1 %v3906_v31  ;;  %v1340_v31 = vrot.slane %v1331_v22, %v1078_v26 }
 0x1ab   : > { %3148 = vmatprep.subr.bf16.mxu0 %v3904_v2  ;;  %3162 = vmatprep.mubr.msk.bf16.mxu0 %vm3905_vm0, %v3904_v2 }
 0x1ad   : > { %1485 = vmatpush1.bf16.msra.mxu1 %v3503_v40  ;;  %3149 = vmatpush3.bf16.msra.mxu0 %v3526_v41 }
 0x1ae   : > { %1486 = vmatprep.subr.bf16.mxu1 %v3508_v42  ;;  %3150 = vmatprep.subr.bf16.mxu0 %v3904_v2 }
 0x1b1   : > { %1487 = vmatpush1.bf16.msra.mxu1 %v3506_v43  ;;  %3151 = vmatpush3.bf16.msra.mxu0 %v3527_v44 }
 0x1b2   : > { %1488 = vmatprep.subr.bf16.mxu1 %v3511_v45  ;;  %3152 = vmatprep.subr.bf16.mxu0 %v3904_v2 }
 0x1b5   : > { %1489 = vmatpush1.bf16.msra.mxu1 %v3509_v46  ;;  %3153 = vmatpush3.bf16.msra.mxu0 %v3528_v47 }
 0x1b6   : > { %1490 = vmatprep.subr.bf16.mxu1 %v3514_v48  ;;  %3154 = vmatprep.subr.bf16.mxu0 %v3904_v2 }
 0x1b9   : > { %1491 = vmatpush1.bf16.msra.mxu1 %v3512_v49  ;;  %3155 = vmatpush3.bf16.msra.mxu0 %v3529_v50 }
 0x1ba   : > { %1492 = vmatprep.subr.bf16.mxu1 %v3517_v51  ;;  %3156 = vmatprep.subr.bf16.mxu0 %v3904_v2 }
 0x1bd   : > { %1493 = vmatpush1.bf16.msra.mxu1 %v3515_v52  ;;  %3157 = vmatpush3.bf16.msra.mxu0 %v3530_v53 }
 0x1be   : > { %1494 = vmatprep.subr.bf16.mxu1 %v3520_v54  ;;  %3158 = vmatprep.subr.bf16.mxu0 %v3904_v2 }
 0x1c1   : > { %1495 = vmatpush1.bf16.msra.mxu1 %v3518_v55  ;;  %3159 = vmatpush3.bf16.msra.mxu0 %v3531_v56 }
 0x1c2   : > { %1496 = vmatprep.subr.bf16.mxu1 %v3523_v57  ;;  %3160 = vmatprep.subr.bf16.mxu0 %v3904_v2  ;;  %v1082_v57 = vsub.s32 2, %v1073_v17 }
 0x1c5   : > { %1497 = vmatpush1.bf16.msra.mxu1 %v3521_v58  ;;  %3161 = vmatpush3.bf16.msra.mxu0 %v3532_v60  ;;  %v1344_v58 = vrot.slane %v1331_v22, %v1082_v57 }
 0x1c6   : > { %3166 = vmatprep.subr.bf16.mxu1 %v3904_v2  ;;  %3186 = vmatprep.subr.bf16.mxu0 %v3904_v2 }
 0x1c8   : > { %1515 = vmatmul.mubr.bf16.vlgmr.msra.gmra.mxu1 %v4413_v59  ;;  %3163 = vmatmul.mubr.bf16.vlgmr.msra.gmra.mxu0 %v4413_v59 }
 0x1c9   : > { %3182 = vmatprep.mubr.msk.bf16.mxu1 %vm3905_vm0, %v3904_v2  ;;  %3202 = vmatprep.mubr.msk.bf16.mxu0 %vm3905_vm0, %v3904_v2 }
 0x1ca   : > { %3167 = vmatpush3.bf16.msra.mxu1 %v3533_v61  ;;  %3187 = vmatpush3.bf16.msra.mxu0 %v3541_v6 }
 0x1cb   : > { %3168 = vmatprep.subr.bf16.mxu1 %v3904_v2  ;;  %3188 = vmatprep.subr.bf16.mxu0 %v3904_v2 }
 0x1ce   : > { %3169 = vmatpush3.bf16.msra.mxu1 %v3534_v62  ;;  %3189 = vmatpush3.bf16.msra.mxu0 %v3542_v7  ;;  %v1083_v62 = vrot.slane %v1070_v20, %v1082_v57 }
 0x1cf   : > { %3170 = vmatprep.subr.bf16.mxu1 %v3904_v2  ;;  %3190 = vmatprep.subr.bf16.mxu0 %v3904_v2 }
 0x1d2   : > { %3171 = vmatpush3.bf16.msra.mxu1 %v3535_v63  ;;  %3191 = vmatpush3.bf16.msra.mxu0 %v3543_v8 }
 0x1d3   : > { %3172 = vmatprep.subr.bf16.mxu1 %v3904_v2  ;;  %3192 = vmatprep.subr.bf16.mxu0 %v3904_v2 }
 0x1d6   : > { %3173 = vmatpush3.bf16.msra.mxu1 %v3536_v0  ;;  %3193 = vmatpush3.bf16.msra.mxu0 %v3544_v9 }
 0x1d7   : > { %3174 = vmatprep.subr.bf16.mxu1 %v3904_v2  ;;  %3194 = vmatprep.subr.bf16.mxu0 %v3904_v2 }
 0x1da   : > { %3175 = vmatpush3.bf16.msra.mxu1 %v3537_v1  ;;  %3195 = vmatpush3.bf16.msra.mxu0 %v3545_v10 }
 0x1db   : > { %3176 = vmatprep.subr.bf16.mxu1 %v3904_v2  ;;  %3196 = vmatprep.subr.bf16.mxu0 %v3904_v2 }
 0x1de   : > { %3177 = vmatpush3.bf16.msra.mxu1 %v3538_v3 }
 0x1df   : > { %3178 = vmatprep.subr.bf16.mxu1 %v3904_v2 }
 0x1e2   : > { %3179 = vmatpush3.bf16.msra.mxu1 %v3539_v4 }
 0x1e3   : > { %3180 = vmatprep.subr.bf16.mxu1 %v3904_v2 }
 0x1e6   : > { %3181 = vmatpush3.bf16.msra.mxu1 %v3540_v5 }
 0x268   : > { %v1292_v11 = vpop.f32.mrf.mxu0  ;;  %v1249_v16 = vpop.f32.mrf.mxu1 }
 0x269   : > { %v1250_v29 = vadd.f32 %v1249_v16, %v1075_v23  ;;  %v1293_v4 = vadd.f32 %v1292_v11, %v1083_v62 }
 0x26a   : > { %v3144_v12 = vpop.f32.mrf.mxu0  ;;  %v1251_v18 = vpop.f32.mrf.mxu1 }
 0x26b   : > { %v1252_v44 = vadd.f32 %v1251_v18, %v1079_v34  ;;  %v972_v18 = vunpack.c.h.bf16 %v4413_v59  ;;  %v3548_v59 = vld [vmem:[%s4256_s28] sm:$0xff]  }
 0x26c   : > { %v4450_v13 = vpop.f32.mrf.mxu0  ;;  %v1253_v21 = vpop.f32.mrf.mxu1 }
 0x26d   : > { %v1254_v38 = vadd.f32 %v1253_v21, %v1075_v23  ;;  %v1296_v9 = vadd.f32 %v4450_v13, %v1083_v62 }
 0x26e   : > { %v3145_v14 = vpop.f32.mrf.mxu0  ;;  %v1255_v25 = vpop.f32.mrf.mxu1 }
 0x26f   : > { %v1256_v49 = vadd.f32 %v1255_v25, %v1079_v34 }
 0x288   : > { %v1516_v27 = vpop.f32.mrf.mxu1  ;;  %v1559_v28 = vpop.f32.mrf.mxu0 }
 0x289   : > { %v1517_v30 = vadd.f32 %v1516_v27, %v1336_v24  ;;  %v1560_v0 = vadd.f32 %v1559_v28, %v1344_v58  ;;  %v3546_v27 = vld [vmem:[%s4256_s28 + $0x10] sm:$0xff]   ;;  %v3547_v28 = vld [vmem:[%s4256_s28 + $0x8] sm:$0xff]   ;;  %s1851_s28 = scalar_lea.vmem (!%p2936_p12), [#allocation2], %s4404_s6 }
 0x28a   : > { %v1518_v32 = vpop.f32.mrf.mxu1  ;;  %v3164_v33 = vpop.f32.mrf.mxu0  ;;  %3197 = vmatpush3.bf16.msra.mxu0 %v3546_v27 }
 0x28b   : > { %v1566_v35 = vadd.f32 %v1517_v30, %v1250_v29  ;;  %v1519_v40 = vadd.f32 %v1518_v32, %v1340_v31  ;;  %3198 = vmatprep.subr.bf16.mxu0 %v3904_v2  ;;  %v2918_v29 = vld [vmem:[%s894_s21] ss:$0 sm:$0xff] }
 0x28c   : > { %v1520_v36 = vpop.f32.mrf.mxu1  ;;  %v1562_v37 = vpop.f32.mrf.mxu0 }
 0x28d   : > { %v2914_v39 = vmul.f32 -1.442695, %v1566_v35  ;;  %v1521_v41 = vadd.f32 %v1520_v36, %v1336_v24  ;;  %v1580_v47 = vadd.f32 %v1519_v40, %v1252_v44  ;;  %v1563_v7 = vadd.f32 %v1562_v37, %v1344_v58 }
 0x28e   : > { %v1522_v42 = vpop.f32.mrf.mxu1  ;;  %v3165_v43 = vpop.f32.mrf.mxu0  ;;  %3199 = vmatpush3.bf16.msra.mxu0 %v3547_v28 }
 0x28f   : > { %3550 = vpow2.f32 %v2914_v39  ;;  %v1567_v45 = vadd.f32 %v1521_v41, %v1254_v38  ;;  %v1523_v46 = vadd.f32 %v1522_v42, %v1340_v31  ;;  %v2916_v51 = vmul.f32 -1.442695, %v1580_v47  ;;  %3200 = vmatprep.subr.bf16.mxu0 %v3904_v2  ;;  %v2927_v2 = vld [vmem:[%s897_s25] ss:$0 sm:$0xff] }
 0x291   : > { %v2915_v48 = vmul.f32 -1.442695, %v1567_v45  ;;  %v1581_v50 = vadd.f32 %v1523_v46, %v1256_v49 }
 0x292   : > { %3201 = vmatpush3.bf16.msra.mxu0 %v3548_v59 }
 0x293   : > { %3552 = vpow2.f32 %v2915_v48  ;;  %v2917_v52 = vmul.f32 -1.442695, %v1581_v50 }
 0x294   : > { %3554 = vpow2.f32 %v2916_v51 }
 0x295   : > { %3556 = vpow2.f32 %v2917_v52 }
 0x29c   : > { %v3551_v53 = vpop.eup %3550 }
 0x29d   : > { %v1574_v54 = vadd.f32 1.0, %v3551_v53 }
 0x29f   : > { %3558 = vrcp.f32 %v1574_v54 }
 0x2a0   : > { %v3553_v55 = vpop.eup %3552 }
 0x2a1   : > { %v1575_v56 = vadd.f32 1.0, %v3553_v55  ;;  %v3555_v60 = vpop.eup %3554 }
 0x2a2   : > { %v3557_v61 = vpop.eup %3556  ;;  %v1588_v63 = vadd.f32 1.0, %v3555_v60 }
 0x2a3   : > { %3560 = vrcp.f32 %v1575_v56  ;;  %v1589_v3 = vadd.f32 1.0, %v3557_v61 }
 0x2a4   : > { %3562 = vrcp.f32 %v1588_v63 }
 0x2a5   : > { %3564 = vrcp.f32 %v1589_v3 }
 0x2ac   : > { %v3559_v1 = vpop.eup %3558 }
 0x2ad   : > { %v1594_v5 = vmul.f32 %v3559_v1, %v1560_v0 }
 0x2af   : > { %v1596_v6 = vadd.f32 %v1594_v5, %v1293_v4 }
 0x2b0   : > { %v3561_v8 = vpop.eup %3560 }
 0x2b1   : > { %3566 = vtanh.f32 %v1596_v6  ;;  %v1595_v10 = vmul.f32 %v3561_v8, %v1563_v7  ;;  %v3563_v14 = vpop.eup %3562 }
 0x2b2   : > { %v3565_v16 = vpop.eup %3564  ;;  %v1600_v17 = vsub.f32 1.0, %v3563_v14  ;;  %v1604_v20 = vmul.f32 %v3563_v14, %v971_v15 }
 0x2b3   : > { %v1597_v12 = vadd.f32 %v1595_v10, %v1296_v9  ;;  %v1601_v21 = vsub.f32 1.0, %v3565_v16  ;;  %v1605_v24 = vmul.f32 %v3565_v16, %v972_v18 }
 0x2b5   : > { %3568 = vtanh.f32 %v1597_v12 }
 0x2be   : > { %v3567_v11 = vpop.eup %3566 }
 0x2bf   : > { %v1602_v19 = vmul.f32 %v3567_v11, %v1600_v17 }
 0x2c1   : > { %v1606_v13 = vadd.f32 %v1604_v20, %v1602_v19 }
 0x2c2   : > { %v3569_v22 = vpop.eup %3568 }
 0x2c3   : > { %v1603_v23 = vmul.f32 %v3569_v22, %v1601_v21 }
 0x2c5   : > { %v1607_v25 = vadd.f32 %v1605_v24, %v1603_v23 }
 0x2c7   : > { %v1608_v26 = vpack.c.bf16 %v1607_v25, %v1606_v13 }
 0x2c9   : > { %3183 = vmatmul.mubr.bf16.vlgmr.msra.gmra.mxu1 %v1608_v26 }
 0x389   : > { %v1714_v30 = vpop.f32.mrf.mxu1 }
 0x38a   : > { %v1715_v32 = vadd.f32 %v2918_v29, %v1714_v30 }
 0x38b   : > { %v3184_v31 = vpop.f32.mrf.mxu1 }
 0x38c   : > { %v1721_v36 = vmax.f32 %v1715_v32, 0.0 }
 0x38d   : > { %v1717_v33 = vpop.f32.mrf.mxu1 }
 0x38e   : > { %v1718_v34 = vadd.f32 %v2918_v29, %v1717_v33 }
 0x38f   : > { %v3185_v35 = vpop.f32.mrf.mxu1 }
 0x390   : > { %v1722_v37 = vmax.f32 %v1718_v34, 0.0 }
 0x392   : > { %v1723_v38 = vpack.c.bf16 %v1722_v37, %v1721_v36 }
 0x394   : > { %3203 = vmatmul.mubr.bf16.vlgmr.msra.gmra.mxu0 %v1723_v38 }
 0x454   : > { %v1829_v39 = vpop.f32.mrf.mxu0 }
 0x455   : > { %v1830_v41 = vadd.f32 %v2927_v2, %v1829_v39 }
 0x456   : > { %v3204_v40 = vpop.f32.mrf.mxu0 }
 0x457   : > { %v1836_v45 = vmax.f32 %v1830_v41, 0.0 }
 0x458   : > { %v1832_v42 = vpop.f32.mrf.mxu0 }
 0x459   : > { %v1833_v43 = vadd.f32 %v2927_v2, %v1832_v42  ;;  %1842 = sbr.rel (%p2936_p12) target bundleno = 1120 (0x460), region = 108 }
 0x45a   : > { %v3205_v44 = vpop.f32.mrf.mxu0 }
 0x45b   : > { %v1837_v46 = vmax.f32 %v1833_v43, 0.0 }
 0x45d   : > { %v4472_v47 = vpack.c.bf16 %v1837_v46, %v1836_v45 }
 0x45f   : > { %3018 = vst [vmem:[%s1851_s28] sm:$0xff] %v4472_v47  }
 0x460 PF: > { %p2940_p13 = scmp.ne.s32.totalorder %s4723_s24, 1 }
 0x461   : > { %s2709_s1 = scalar_lea.vmem (!%p2940_p13), [#allocation2], %s4404_s6 }
 0x462   : > { %1857 = sbr.rel (%p2940_p13) target bundleno = 1128 (0x468), region = 112 }
 0x467   : > { %3024 = vst [vmem:[%s2709_s1 + $0x10] sm:$0xff] %v4472_v47  }
 0x468 PF: > { %s4688_s21 = sld [smem:[#allocation23_spill]] }
 0x46e   : > { %p2946_p11 = scmp.ne.s32.totalorder %s4688_s21, 0 }
 0x46f   : > { %s4689_s13 = sld [smem:[#allocation46_spill]] (!%p2946_p11) }
 0x470   : > { %1872 = sbr.rel (%p2946_p11) target bundleno = 1577 (0x629), region = 116 }
 0x475   : > { %v3570_v48 = vld [vmem:[%s4263_s3 + $0x38] sm:$0xff]   ;;  %v3907_v49 = vmov 0.0   ;;  %v3571_v50 = vld [vmem:[%s4263_s3 + $0x30] sm:$0xff]   ;;  %vm3908_vm2 = vmmov 0   ;;  %v3572_v51 = vld [vmem:[%s4263_s3 + $0x28] sm:$0xff]   ;;  %s2100_s24 = scalar_lea.vmem %s4689_s13, %s4307_s5 }
 0x476   : > { %3206 = vmatprep.subr.bf16.mxu0 %v3907_v49  ;;  %3226 = vmatprep.subr.bf16.mxu1 %v3907_v49  ;;  %v3578_v52 = vld [vmem:[%s4269_s16 + $0x38] sm:$0xff]   ;;  %v3573_v53 = vld [vmem:[%s4263_s3 + $0x20] sm:$0xff]   ;;  %v3579_v54 = vld [vmem:[%s4269_s16 + $0x30] sm:$0xff]  }
 0x477   : > { %3207 = vmatpush3.bf16.msra.mxu0 %v3570_v48  ;;  %3222 = vmatprep.mubr.msk.bf16.mxu0 %vm3908_vm2, %v3907_v49  ;;  %v3574_v55 = vld [vmem:[%s4263_s3 + $0x18] sm:$0xff]   ;;  %v3580_v56 = vld [vmem:[%s4269_s16 + $0x28] sm:$0xff]   ;;  %v3575_v57 = vld [vmem:[%s4263_s3 + $0x10] sm:$0xff]  }
 0x478   : > { %3208 = vmatprep.subr.bf16.mxu0 %v3907_v49  ;;  %3242 = vmatprep.mubr.msk.bf16.mxu1 %vm3908_vm2, %v3907_v49  ;;  %v3581_v58 = vld [vmem:[%s4269_s16 + $0x20] sm:$0xff]   ;;  %v3576_v60 = vld [vmem:[%s4263_s3 + $0x8] sm:$0xff]   ;;  %v3582_v61 = vld [vmem:[%s4269_s16 + $0x18] sm:$0xff]  }
 0x479   : > { %3227 = vmatpush3.bf16.msra.mxu1 %v3578_v52  ;;  %v3577_v62 = vld [vmem:[%s4263_s3] sm:$0xff]   ;;  %v3583_v63 = vld [vmem:[%s4269_s16 + $0x10] sm:$0xff]   ;;  %v3584_v0 = vld [vmem:[%s4269_s16 + $0x8] sm:$0xff]  }
 0x47a   : > { %3228 = vmatprep.subr.bf16.mxu1 %v3907_v49  ;;  %v3585_v1 = vld [vmem:[%s4269_s16] sm:$0xff]  }
 0x47b   : > { %3209 = vmatpush3.bf16.msra.mxu0 %v3571_v50  ;;  %v2947_v3 = vld [vmem:[%s4317_s23] ss:$0 sm:$0xff] }
 0x47c   : > { %3210 = vmatprep.subr.bf16.mxu0 %v3907_v49  ;;  %v2956_v15 = vld [vmem:[%s4322_s11] ss:$0 sm:$0xff] }
 0x47d   : > { %3229 = vmatpush3.bf16.msra.mxu1 %v3579_v54 }
 0x47e   : > { %3230 = vmatprep.subr.bf16.mxu1 %v3907_v49 }
 0x47f   : > { %3211 = vmatpush3.bf16.msra.mxu0 %v3572_v51 }
 0x480   : > { %3212 = vmatprep.subr.bf16.mxu0 %v3907_v49 }
 0x481   : > { %3231 = vmatpush3.bf16.msra.mxu1 %v3580_v56 }
 0x482   : > { %3232 = vmatprep.subr.bf16.mxu1 %v3907_v49 }
 0x483   : > { %3213 = vmatpush3.bf16.msra.mxu0 %v3573_v53 }
 0x484   : > { %3214 = vmatprep.subr.bf16.mxu0 %v3907_v49 }
 0x485   : > { %3233 = vmatpush3.bf16.msra.mxu1 %v3581_v58 }
 0x486   : > { %3234 = vmatprep.subr.bf16.mxu1 %v3907_v49 }
 0x487   : > { %3215 = vmatpush3.bf16.msra.mxu0 %v3574_v55 }
 0x488   : > { %3216 = vmatprep.subr.bf16.mxu0 %v3907_v49 }
 0x489   : > { %3235 = vmatpush3.bf16.msra.mxu1 %v3582_v61 }
 0x48a   : > { %3236 = vmatprep.subr.bf16.mxu1 %v3907_v49 }
 0x48b   : > { %3217 = vmatpush3.bf16.msra.mxu0 %v3575_v57 }
 0x48c   : > { %3218 = vmatprep.subr.bf16.mxu0 %v3907_v49 }
 0x48d   : > { %3237 = vmatpush3.bf16.msra.mxu1 %v3583_v63 }
 0x48e   : > { %3238 = vmatprep.subr.bf16.mxu1 %v3907_v49 }
 0x48f   : > { %3219 = vmatpush3.bf16.msra.mxu0 %v3576_v60 }
 0x490   : > { %3220 = vmatprep.subr.bf16.mxu0 %v3907_v49 }
 0x491   : > { %3239 = vmatpush3.bf16.msra.mxu1 %v3584_v0 }
 0x492   : > { %3240 = vmatprep.subr.bf16.mxu1 %v3907_v49 }
 0x493   : > { %3221 = vmatpush3.bf16.msra.mxu0 %v3577_v62 }
 0x495   : > { %3241 = vmatpush3.bf16.msra.mxu1 %v3585_v1 }
 0x496   : > { %3223 = vmatmul.mubr.bf16.vlgmr.msra.gmra.mxu0 %v4472_v47 }
 0x556   : > { %v1978_v4 = vpop.f32.mrf.mxu0 }
 0x557   : > { %v1979_v6 = vadd.f32 %v2947_v3, %v1978_v4 }
 0x558   : > { %v3224_v5 = vpop.f32.mrf.mxu0 }
 0x559   : > { %v1985_v10 = vmax.f32 %v1979_v6, 0.0 }
 0x55a   : > { %v1981_v7 = vpop.f32.mrf.mxu0 }
 0x55b   : > { %v1982_v8 = vadd.f32 %v2947_v3, %v1981_v7 }
 0x55c   : > { %v3225_v9 = vpop.f32.mrf.mxu0 }
 0x55d   : > { %v1986_v12 = vmax.f32 %v1982_v8, 0.0 }
 0x55f   : > { %v1987_v14 = vpack.c.bf16 %v1986_v12, %v1985_v10 }
 0x561   : > { %3243 = vmatmul.mubr.bf16.vlgmr.msra.gmra.mxu1 %v1987_v14 }
 0x621   : > { %v2093_v16 = vpop.f32.mrf.mxu1 }
 0x622   : > { %v2094_v17 = vadd.f32 %v2956_v15, %v2093_v16 }
 0x623   : > { %v3244_v11 = vpop.f32.mrf.mxu1 }
 0x624   : > { %2101 = vst [vmem:[%s2100_s24] sm:$0xff] %v2094_v17 }
 0x625   : > { %v2096_v18 = vpop.f32.mrf.mxu1 }
 0x626   : > { %v2097_v19 = vadd.f32 %v2956_v15, %v2096_v18 }
 0x627   : > { %v3245_v20 = vpop.f32.mrf.mxu1 }
 0x628   : > { %2102 = vst [vmem:[%s2100_s24 + $0x8] sm:$0xff] %v2097_v19 }
 0x629 PF: > { %s4690_s29 = sld [smem:[#allocation23_spill]] }
 0x62f   : > { %p2965_p1 = scmp.ne.s32.totalorder %s4690_s29, 1 }
 0x630   : > { %s4691_s26 = sld [smem:[#allocation47_spill]] (!%p2965_p1) }
 0x631   : > { %2106 = sbr.rel (%p2965_p1) target bundleno = 2026 (0x7ea), region = 120 }
 0x636   : > { %v3586_v21 = vld [vmem:[%s4263_s3 + $0x38] sm:$0xff]   ;;  %v3909_v13 = vmov 0.0   ;;  %v3587_v22 = vld [vmem:[%s4263_s3 + $0x30] sm:$0xff]   ;;  %vm3910_vm3 = vmmov 0   ;;  %v3588_v23 = vld [vmem:[%s4263_s3 + $0x28] sm:$0xff]   ;;  %s2334_s30 = scalar_lea.vmem %s4691_s26, %s4307_s5 }
 0x637   : > { %3246 = vmatprep.subr.bf16.mxu0 %v3909_v13  ;;  %3266 = vmatprep.subr.bf16.mxu1 %v3909_v13  ;;  %v3594_v24 = vld [vmem:[%s4269_s16 + $0x38] sm:$0xff]   ;;  %v3589_v25 = vld [vmem:[%s4263_s3 + $0x20] sm:$0xff]   ;;  %v3595_v26 = vld [vmem:[%s4269_s16 + $0x30] sm:$0xff]  }
 0x638   : > { %3247 = vmatpush3.bf16.msra.mxu0 %v3586_v21  ;;  %3262 = vmatprep.mubr.msk.bf16.mxu0 %vm3910_vm3, %v3909_v13  ;;  %v3590_v27 = vld [vmem:[%s4263_s3 + $0x18] sm:$0xff]   ;;  %v3596_v28 = vld [vmem:[%s4269_s16 + $0x28] sm:$0xff]   ;;  %v3591_v59 = vld [vmem:[%s4263_s3 + $0x10] sm:$0xff]  }
 0x639   : > { %3248 = vmatprep.subr.bf16.mxu0 %v3909_v13  ;;  %3282 = vmatprep.mubr.msk.bf16.mxu1 %vm3910_vm3, %v3909_v13  ;;  %v3597_v29 = vld [vmem:[%s4269_s16 + $0x20] sm:$0xff]   ;;  %v3592_v30 = vld [vmem:[%s4263_s3 + $0x8] sm:$0xff]   ;;  %v3598_v31 = vld [vmem:[%s4269_s16 + $0x18] sm:$0xff]  }
 0x63a   : > { %3267 = vmatpush3.bf16.msra.mxu1 %v3594_v24  ;;  %v3593_v32 = vld [vmem:[%s4263_s3] sm:$0xff]   ;;  %v3599_v33 = vld [vmem:[%s4269_s16 + $0x10] sm:$0xff]   ;;  %v3600_v34 = vld [vmem:[%s4269_s16 + $0x8] sm:$0xff]  }
 0x63b   : > { %3268 = vmatprep.subr.bf16.mxu1 %v3909_v13  ;;  %v3601_v35 = vld [vmem:[%s4269_s16] sm:$0xff]  }
 0x63c   : > { %3249 = vmatpush3.bf16.msra.mxu0 %v3587_v22  ;;  %v2966_v36 = vld [vmem:[%s4317_s23] ss:$0 sm:$0xff] }
 0x63d   : > { %3250 = vmatprep.subr.bf16.mxu0 %v3909_v13  ;;  %v2975_v45 = vld [vmem:[%s4322_s11] ss:$0 sm:$0xff] }
 0x63e   : > { %3269 = vmatpush3.bf16.msra.mxu1 %v3595_v26 }
 0x63f   : > { %3270 = vmatprep.subr.bf16.mxu1 %v3909_v13 }
 0x640   : > { %3251 = vmatpush3.bf16.msra.mxu0 %v3588_v23 }
 0x641   : > { %3252 = vmatprep.subr.bf16.mxu0 %v3909_v13 }
 0x642   : > { %3271 = vmatpush3.bf16.msra.mxu1 %v3596_v28 }
 0x643   : > { %3272 = vmatprep.subr.bf16.mxu1 %v3909_v13 }
 0x644   : > { %3253 = vmatpush3.bf16.msra.mxu0 %v3589_v25 }
 0x645   : > { %3254 = vmatprep.subr.bf16.mxu0 %v3909_v13 }
 0x646   : > { %3273 = vmatpush3.bf16.msra.mxu1 %v3597_v29 }
 0x647   : > { %3274 = vmatprep.subr.bf16.mxu1 %v3909_v13 }
 0x648   : > { %3255 = vmatpush3.bf16.msra.mxu0 %v3590_v27 }
 0x649   : > { %3256 = vmatprep.subr.bf16.mxu0 %v3909_v13 }
 0x64a   : > { %3275 = vmatpush3.bf16.msra.mxu1 %v3598_v31 }
 0x64b   : > { %3276 = vmatprep.subr.bf16.mxu1 %v3909_v13 }
 0x64c   : > { %3257 = vmatpush3.bf16.msra.mxu0 %v3591_v59 }
 0x64d   : > { %3258 = vmatprep.subr.bf16.mxu0 %v3909_v13 }
 0x64e   : > { %3277 = vmatpush3.bf16.msra.mxu1 %v3599_v33 }
 0x64f   : > { %3278 = vmatprep.subr.bf16.mxu1 %v3909_v13 }
 0x650   : > { %3259 = vmatpush3.bf16.msra.mxu0 %v3592_v30 }
 0x651   : > { %3260 = vmatprep.subr.bf16.mxu0 %v3909_v13 }
 0x652   : > { %3279 = vmatpush3.bf16.msra.mxu1 %v3600_v34 }
 0x653   : > { %3280 = vmatprep.subr.bf16.mxu1 %v3909_v13 }
 0x654   : > { %3261 = vmatpush3.bf16.msra.mxu0 %v3593_v32 }
 0x656   : > { %3281 = vmatpush3.bf16.msra.mxu1 %v3601_v35 }
 0x657   : > { %3263 = vmatmul.mubr.bf16.vlgmr.msra.gmra.mxu0 %v4472_v47 }
 0x717   : > { %v2212_v37 = vpop.f32.mrf.mxu0 }
 0x718   : > { %v2213_v2 = vadd.f32 %v2966_v36, %v2212_v37 }
 0x719   : > { %v3264_v38 = vpop.f32.mrf.mxu0 }
 0x71a   : > { %v2219_v42 = vmax.f32 %v2213_v2, 0.0 }
 0x71b   : > { %v2215_v39 = vpop.f32.mrf.mxu0 }
 0x71c   : > { %v2216_v40 = vadd.f32 %v2966_v36, %v2215_v39 }
 0x71d   : > { %v3265_v41 = vpop.f32.mrf.mxu0 }
 0x71e   : > { %v2220_v43 = vmax.f32 %v2216_v40, 0.0 }
 0x720   : > { %v2221_v44 = vpack.c.bf16 %v2220_v43, %v2219_v42 }
 0x722   : > { %3283 = vmatmul.mubr.bf16.vlgmr.msra.gmra.mxu1 %v2221_v44 }
 0x7e2   : > { %v2327_v46 = vpop.f32.mrf.mxu1 }
 0x7e3   : > { %v2328_v48 = vadd.f32 %v2975_v45, %v2327_v46 }
 0x7e4   : > { %v3284_v49 = vpop.f32.mrf.mxu1 }
 0x7e5   : > { %2335 = vst [vmem:[%s2334_s30] sm:$0xff] %v2328_v48 }
 0x7e6   : > { %v2330_v50 = vpop.f32.mrf.mxu1 }
 0x7e7   : > { %v2331_v51 = vadd.f32 %v2975_v45, %v2330_v50 }
 0x7e8   : > { %v3285_v52 = vpop.f32.mrf.mxu1 }
 0x7e9   : > { %2336 = vst [vmem:[%s2334_s30 + $0x8] sm:$0xff] %v2331_v51 }
 0x7ea PF: > { %s4692_s19 = sld [smem:[#allocation23_spill]] }
 0x7f0   : > { %p2984_p7 = scmp.ne.s32.totalorder %s4692_s19, 2 }
 0x7f1   : > { %s4693_s8 = sld [smem:[#allocation48_spill]] (!%p2984_p7) }
 0x7f2   : > { %2340 = sbr.rel (%p2984_p7) target bundleno = 2475 (0x9ab), region = 124 }
 0x7f7   : > { %v3602_v53 = vld [vmem:[%s4263_s3 + $0x38] sm:$0xff]   ;;  %v3911_v54 = vmov 0.0   ;;  %v3603_v55 = vld [vmem:[%s4263_s3 + $0x30] sm:$0xff]   ;;  %vm3912_vm4 = vmmov 0   ;;  %v3604_v56 = vld [vmem:[%s4263_s3 + $0x28] sm:$0xff]   ;;  %s2568_s10 = scalar_lea.vmem %s4693_s8, %s4307_s5 }
 0x7f8   : > { %3286 = vmatprep.subr.bf16.mxu0 %v3911_v54  ;;  %3306 = vmatprep.subr.bf16.mxu1 %v3911_v54  ;;  %v3610_v57 = vld [vmem:[%s4269_s16 + $0x38] sm:$0xff]   ;;  %v3605_v58 = vld [vmem:[%s4263_s3 + $0x20] sm:$0xff]   ;;  %v3611_v60 = vld [vmem:[%s4269_s16 + $0x30] sm:$0xff]  }
 0x7f9   : > { %3287 = vmatpush3.bf16.msra.mxu0 %v3602_v53  ;;  %3302 = vmatprep.mubr.msk.bf16.mxu0 %vm3912_vm4, %v3911_v54  ;;  %v3606_v61 = vld [vmem:[%s4263_s3 + $0x18] sm:$0xff]   ;;  %v3612_v62 = vld [vmem:[%s4269_s16 + $0x28] sm:$0xff]   ;;  %v3607_v63 = vld [vmem:[%s4263_s3 + $0x10] sm:$0xff]  }
 0x7fa   : > { %3288 = vmatprep.subr.bf16.mxu0 %v3911_v54  ;;  %3322 = vmatprep.mubr.msk.bf16.mxu1 %vm3912_vm4, %v3911_v54  ;;  %v3613_v0 = vld [vmem:[%s4269_s16 + $0x20] sm:$0xff]   ;;  %v3608_v1 = vld [vmem:[%s4263_s3 + $0x8] sm:$0xff]   ;;  %v3614_v3 = vld [vmem:[%s4269_s16 + $0x18] sm:$0xff]  }
 0x7fb   : > { %3307 = vmatpush3.bf16.msra.mxu1 %v3610_v57  ;;  %v3609_v4 = vld [vmem:[%s4263_s3] sm:$0xff]   ;;  %v3615_v5 = vld [vmem:[%s4269_s16 + $0x10] sm:$0xff]   ;;  %v3616_v6 = vld [vmem:[%s4269_s16 + $0x8] sm:$0xff]  }
 0x7fc   : > { %3308 = vmatprep.subr.bf16.mxu1 %v3911_v54  ;;  %v3617_v7 = vld [vmem:[%s4269_s16] sm:$0xff]  }
 0x7fd   : > { %3289 = vmatpush3.bf16.msra.mxu0 %v3603_v55  ;;  %v2985_v8 = vld [vmem:[%s4317_s23] ss:$0 sm:$0xff] }
 0x7fe   : > { %3290 = vmatprep.subr.bf16.mxu0 %v3911_v54  ;;  %v2994_v18 = vld [vmem:[%s4322_s11] ss:$0 sm:$0xff] }
 0x7ff   : > { %3309 = vmatpush3.bf16.msra.mxu1 %v3611_v60 }
 0x800   : > { %3310 = vmatprep.subr.bf16.mxu1 %v3911_v54 }
 0x801   : > { %3291 = vmatpush3.bf16.msra.mxu0 %v3604_v56 }
 0x802   : > { %3292 = vmatprep.subr.bf16.mxu0 %v3911_v54 }
 0x803   : > { %3311 = vmatpush3.bf16.msra.mxu1 %v3612_v62 }
 0x804   : > { %3312 = vmatprep.subr.bf16.mxu1 %v3911_v54 }
 0x805   : > { %3293 = vmatpush3.bf16.msra.mxu0 %v3605_v58 }
 0x806   : > { %3294 = vmatprep.subr.bf16.mxu0 %v3911_v54 }
 0x807   : > { %3313 = vmatpush3.bf16.msra.mxu1 %v3613_v0 }
 0x808   : > { %3314 = vmatprep.subr.bf16.mxu1 %v3911_v54 }
 0x809   : > { %3295 = vmatpush3.bf16.msra.mxu0 %v3606_v61 }
 0x80a   : > { %3296 = vmatprep.subr.bf16.mxu0 %v3911_v54 }
 0x80b   : > { %3315 = vmatpush3.bf16.msra.mxu1 %v3614_v3 }
 0x80c   : > { %3316 = vmatprep.subr.bf16.mxu1 %v3911_v54 }
 0x80d   : > { %3297 = vmatpush3.bf16.msra.mxu0 %v3607_v63 }
 0x80e   : > { %3298 = vmatprep.subr.bf16.mxu0 %v3911_v54 }
 0x80f   : > { %3317 = vmatpush3.bf16.msra.mxu1 %v3615_v5 }
 0x810   : > { %3318 = vmatprep.subr.bf16.mxu1 %v3911_v54 }
 0x811   : > { %3299 = vmatpush3.bf16.msra.mxu0 %v3608_v1 }
 0x812   : > { %3300 = vmatprep.subr.bf16.mxu0 %v3911_v54 }
 0x813   : > { %3319 = vmatpush3.bf16.msra.mxu1 %v3616_v6 }
 0x814   : > { %3320 = vmatprep.subr.bf16.mxu1 %v3911_v54 }
 0x815   : > { %3301 = vmatpush3.bf16.msra.mxu0 %v3609_v4 }
 0x817   : > { %3321 = vmatpush3.bf16.msra.mxu1 %v3617_v7 }
 0x818   : > { %3303 = vmatmul.mubr.bf16.vlgmr.msra.gmra.mxu0 %v4472_v47 }
 0x8d8   : > { %v2446_v9 = vpop.f32.mrf.mxu0 }
 0x8d9   : > { %v2447_v12 = vadd.f32 %v2985_v8, %v2446_v9 }
 0x8da   : > { %v3304_v10 = vpop.f32.mrf.mxu0 }
 0x8db   : > { %v2453_v17 = vmax.f32 %v2447_v12, 0.0 }
 0x8dc   : > { %v2449_v14 = vpop.f32.mrf.mxu0 }
 0x8dd   : > { %v2450_v15 = vadd.f32 %v2985_v8, %v2449_v14 }
 0x8de   : > { %v3305_v16 = vpop.f32.mrf.mxu0 }
 0x8df   : > { %v2454_v11 = vmax.f32 %v2450_v15, 0.0 }
 0x8e1   : > { %v2455_v47 = vpack.c.bf16 %v2454_v11, %v2453_v17 }
 0x8e3   : > { %3323 = vmatmul.mubr.bf16.vlgmr.msra.gmra.mxu1 %v2455_v47 }
 0x9a3   : > { %v2561_v19 = vpop.f32.mrf.mxu1 }
 0x9a4   : > { %v2562_v20 = vadd.f32 %v2994_v18, %v2561_v19 }
 0x9a5   : > { %v3324_v21 = vpop.f32.mrf.mxu1 }
 0x9a6   : > { %2569 = vst [vmem:[%s2568_s10] sm:$0xff] %v2562_v20 }
 0x9a7   : > { %v2564_v13 = vpop.f32.mrf.mxu1 }
 0x9a8   : > { %v2565_v22 = vadd.f32 %v2994_v18, %v2564_v13 }
 0x9a9   : > { %v3325_v23 = vpop.f32.mrf.mxu1 }
 0x9aa   : > { %2570 = vst [vmem:[%s2568_s10 + $0x8] sm:$0xff] %v2565_v22 }
 0x9ab PF: > { %s39_s0 = sadd.s32 1, %s3892_s0   ;;  %s4694_s21 = sld [smem:[#allocation18_spill]] }
 0x9ac   : > { %p36_p0 = scmp.ge.s32.totalorder %s39_s0, 8   ;;  %s4695_s22 = sld [smem:[#allocation19_spill]] }
 0x9ad   : > { %s4696_s23 = sld [smem:[#allocation31_spill]] }
 0x9ae   : > { %s4697_s24 = sld [smem:[#allocation20_spill]] }
 0x9af   : > { %s4698_s25 = sld [smem:[#allocation21_spill]] }
 0x9b0   : > { %s4699_s26 = sld [smem:[#allocation29_spill]]  ;;  %38 = sbr.rel (!%p36_p0) target bundleno = 31 (0x1f), region = 242 }
 0x9b1   : > { %s4700_s27 = sld [smem:[#allocation24_spill]] }
 0x9b2   : > { %s4701_s28 = sld [smem:[#allocation25_spill]] }
 0x9b3   : > { %s4702_s29 = sld [smem:[#allocation26_spill]] }
 0x9b4   : > { %s4703_s30 = sld [smem:[#allocation27_spill]] }
 0x9b5   :  { %2594 = vsyncpa [#allocation4], 1 }
 0x9b6   :  { %2596 = vsyncpa [#allocation4 + $0x1], 1 }
 0x9b7   :  { %2597 = vsyncpa [#allocation6], 1 }
 0x9b8   :  { %2599 = vsyncpa [#allocation6 + $0x1], 1 }
 0x9b9   :  { %2600 = vsyncpa [#allocation9], 1 }
 0x9ba   :  { %2602 = vsyncpa [#allocation9 + $0x1], 1 }
 0x9bb   :  { %2603 = vsyncpa [#allocation12], 1 }
 0x9bc   :  { %2605 = vsyncpa [#allocation12 + $0x1], 1 }

// kernel: deepgraphlet_forward.1
= control target key start
LH: loop header
LB: loop body
LE: loop exit
PB: predicated region body
PF: predicated region fallthrough
CT: control target
= control target key end

     0   :  { %s4585_s0 = inlined_call_operand.vmem [shape: bf16[32,128], index: 0, kind: input, shape index: {}]   ;;  %s4586_s1 = inlined_call_operand.vmem [shape: bf16[32,32], index: 1, kind: input, shape index: {}]   ;;  %s4587_s2 = inlined_call_operand.hbm [shape: bf16[3,128,384], index: 2, kind: input, shape index: {}]   ;;  %s4588_s3 = inlined_call_operand.vmem [shape: f32[3,1,384], index: 3, kind: input, shape index: {}]   ;;  %s4589_s4 = inlined_call_operand.hbm [shape: bf16[3,128,384], index: 4, kind: input, shape index: {}]   ;;  %s4590_s5 = inlined_call_operand.vmem [shape: f32[3,1,384], index: 5, kind: input, shape index: {}]   ;;  %s4591_s6 = inlined_call_operand.hbm [shape: bf16[3,128,128], index: 6, kind: input, shape index: {}]   ;;  %s4592_s7 = inlined_call_operand.vmem [shape: f32[3,1,128], index: 7, kind: input, shape index: {}]   ;;  %s4593_s8 = inlined_call_operand.hbm [shape: bf16[3,128,128], index: 8, kind: input, shape index: {}]   ;;  %s4594_s9 = inlined_call_operand.vmem [shape: f32[3,1,128], index: 9, kind: input, shape index: {}]   ;;  %s4595_s10 = inlined_call_operand.hbm [shape: bf16[3,128,128], index: 10, kind: input, shape index: {}]   ;;  %s4596_s11 = inlined_call_operand.vmem [shape: f32[3,1,128], index: 11, kind: input, shape index: {}]   ;;  %s4597_s12 = inlined_call_operand.hbm [shape: bf16[3,128,128], index: 12, kind: input, shape index: {}]   ;;  %s4598_s13 = inlined_call_operand.vmem [shape: f32[3,1,128], index: 13, kind: input, shape index: {}]   ;;  %s4599_s14 = inlined_call_operand.vmem [shape: f32[32,128], index: 14, kind: output, shape index: {0}]   ;;  %s4600_s15 = inlined_call_operand.vmem [shape: f32[32,128], index: 15, kind: output, shape index: {1}]   ;;  %s4601_s16 = inlined_call_operand.vmem [shape: f32[32,128], index: 16, kind: output, shape index: {2}]  }
   0x1   :  { %4622 = sst [smem:[#allocation32_spill]] %s4585_s0 }
   0x2   :  { %4623 = sst [smem:[#allocation33_spill]] %s4586_s1 }
   0x3   :  { %4624 = sst [smem:[#allocation34_spill]] %s4587_s2 }
   0x4   :  { %4625 = sst [smem:[#allocation35_spill]] %s4588_s3 }
   0x5   :  { %4626 = sst [smem:[#allocation36_spill]] %s4589_s4 }
   0x6   :  { %4627 = sst [smem:[#allocation37_spill]] %s4590_s5 }
   0x7   :  { %4628 = sst [smem:[#allocation38_spill]] %s4591_s6 }
   0x8   :  { %4629 = sst [smem:[#allocation39_spill]] %s4592_s7 }
   0x9   :  { %4630 = sst [smem:[#allocation40_spill]] %s4593_s8 }
   0xa   :  { %4631 = sst [smem:[#allocation41_spill]] %s4594_s9 }
   0xb   :  { %4632 = sst [smem:[#allocation42_spill]] %s4595_s10 }
   0xc   :  { %4633 = sst [smem:[#allocation43_spill]] %s4596_s11 }
   0xd   :  { %4634 = sst [smem:[#allocation44_spill]] %s4597_s12 }
   0xe   :  { %4635 = sst [smem:[#allocation45_spill]] %s4598_s13 }
   0xf   :  { %4636 = sst [smem:[#allocation46_spill]] %s4599_s14 }
  0x10   :  { %4637 = sst [smem:[#allocation47_spill]] %s4600_s15 }
  0x11   :  { %4638 = sst [smem:[#allocation48_spill]] %s4601_s16 }
  0x12   :  { %22 = vsyncpa [#allocation4], 0 }
  0x13   :  { %24 = vsyncpa [#allocation4 + $0x1], 0 }
  0x14   :  { %25 = vsyncpa [#allocation6], 0 }
  0x15   :  { %27 = vsyncpa [#allocation6 + $0x1], 0 }
  0x16   :  { %28 = vsyncpa [#allocation9], 0 }
  0x17   :  { %30 = vsyncpa [#allocation9 + $0x1], 0 }
  0x18   :  { %31 = vsyncpa [#allocation12], 0 }
  0x19   :  { %33 = vsyncpa [#allocation12 + $0x1], 0  ;;  %s3998_s21 = smov 0   ;;  %s4000_s22 = smov 0  }
  0x1a   :  { %s4002_s23 = smov 0   ;;  %s4004_s24 = smov 0  }
  0x1b   :  { %s4006_s25 = smov 0   ;;  %s4008_s26 = smov 0  }
  0x1c   :  { %s4010_s27 = smov 0   ;;  %s4012_s28 = smov 0  }
  0x1d   :  { %s4014_s29 = smov 0   ;;  %s4016_s30 = smov 0  }
  0x1e   :  { %s4018_s0 = smov 0  }
  0x1f LB: > { %4639 = sst [smem:[#allocation18_spill]] %s3856_s22  ;;  %s4604_s17 = sadd.s32 4294967295, %s3892_s0   ;;  %s3892_s0 = sphi %s4018_s0, %s39_s0   ;;  %s3888_s30 = sphi %s4016_s30, %s4703_s30   ;;  %s3884_s29 = sphi %s4014_s29, %s4702_s29   ;;  %s3880_s28 = sphi %s4012_s28, %s4701_s28   ;;  %s3876_s27 = sphi %s4010_s27, %s4700_s27   ;;  %s3872_s26 = sphi %s4008_s26, %s4699_s26   ;;  %s3868_s25 = sphi %s4006_s25, %s4698_s25   ;;  %s3864_s24 = sphi %s4004_s24, %s4697_s24   ;;  %s3860_s23 = sphi %s4002_s23, %s4696_s23   ;;  %s3856_s22 = sphi %s4000_s22, %s4695_s22   ;;  %s3852_s21 = sphi %s3998_s21, %s4694_s21  }
  0x20   : > { %4640 = sst [smem:[#allocation19_spill]] %s3860_s23  ;;  %s48_s18 = sadd.s32 1, %s3884_s29 }
  0x21   : > { %4641 = sst [smem:[#allocation20_spill]] %s3868_s25  ;;  %p49_p0 = scmp.ge.s32.totalorder %s48_s18, 2 }
  0x22   : > { %4642 = sst [smem:[#allocation21_spill]] %s3872_s26  ;;  %s51_s19 = sadd.s32 1, %s3888_s30 }
  0x23   : > { %4643 = sst [smem:[#allocation22_spill]] %s3876_s27  ;;  %s105_s20 = sadd.s32 1, %s3872_s26 }
  0x24   : > { %4644 = sst [smem:[#allocation23_spill]] %s3880_s28  ;;  %p112_p1 = scmp.ne.s32.totalorder %s3872_s26, %s3868_s25 }
  0x25   : > { %4645 = sst [smem:[#allocation24_spill]] %s3884_s29  ;;  %s4705_s18 = smov (%p49_p0, %s48_s18), 0 }
  0x26   : > { %4646 = sst [smem:[#allocation25_spill]] %s3888_s30  ;;  %s4707_s19 = smov (!%p49_p0, %s51_s19), %s3888_s30 }
  0x27   : > { %4647 = sst [smem:[#allocation26_spill]] %s4705_s18  ;;  %p113_p2 = scmp.eq.s32.totalorder %s3892_s0, 0 }
  0x28   : > { %p118_p3 = scmp.ne.s32.totalorder %s3868_s25, %s3864_s24  ;;  %p53_p4 = scmp.ge.s32.totalorder %s4707_s19, 3 }
  0x29   : > { %p4064_p5 = scmp.eq.s32.totalorder %s4604_s17, 0  ;;  %p114_p6 = por %p113_p2, %p112_p1 }
  0x2a   : > { %s4709_s19 = smov (%p53_p4, %s4707_s19), 0  ;;  %p4617_p8 = scmp.lt.s32.totalorder %s3892_s0, 6 }
  0x2b   : > { %4649 = sst [smem:[#allocation27_spill]] %s4709_s19  ;;  %p4074_p7 = por %p4064_p5, %p118_p3 }
  0x2c   : > { %s102_s24 = ssub.s32 %s3888_s30, %s4709_s19  ;;  %s4082_s29 = sand.u32 1, %s3872_s26  }
  0x2d   : > { %s4650_s18 = scalar_select %p4074_p7, 1, 0 }
  0x2e   : > { %p103_p9 = scmp.eq.s32.totalorder %s102_s24, 0  ;;  %s4606_s17 = smul.u32 192, %s4082_s29 }
  0x2f   : > { %4651 = sst [smem:[#allocation28_spill]] %s4650_s18  ;;  %s4607_s15 = smul.u32 3072, %s3888_s30 }
  0x30   : > { %p4088_p10 = pnand %p4617_p8, %p114_p6  ;;  %s4608_s11 = sand.u32 1, %s3892_s0  }
  0x31   : > { %s4093_s13 = scalar_select %p103_p9, %s3872_s26, %s105_s20  }
  0x32   : > { %s4654_s4 = sld [smem:[#allocation36_spill]]  ;;  %s567_s9 = scalar_lea.vmem [#allocation5], %s4606_s17 }
  0x33   : > { %4653 = sst [smem:[#allocation29_spill]] %s4093_s13  ;;  %s574_s24 = sshll.u32 %s567_s9, 4  ;;  %s575_s24 = int_to_ptr.vmem [resolvable:$true] %s574_s24 }
  0x34   : > { %p2847_p11 = scmp.ge.s32.totalorder %s3892_s0, 1  ;;  %s4106_s7 = scalar_lea.sflag [#allocation6], %s4608_s11 }
  0x35   : > { %p3620_p12 = pneg %p4088_p10  ;;  %s3631_s28 = scalar_lea.vmem %s575_s24, 3072 }
  0x36   : > { %p3632_p13 = scmp.ne.s32.totalorder %s575_s24, %s3631_s28  ;;  %s3894_s20 = smov [#allocation5]  }
  0x37   : > { %s3636_s13 = sshll.u32 %s3894_s20, 4  ;;  %s3637_s13 = int_to_ptr.vmem [resolvable:$false] %s3636_s13 }
  0x38   : > { %s573_s1 = scalar_lea.hbm %s4654_s4, %s4607_s15  ;;  %p3634_p0 = pnand %p3632_p13, %p3620_p12 }
  0x39   : > { %s3638_s3 = scalar_lea.vmem %s3637_s13, 6144  ;;  %p3639_p3 = scmp.lt.s32.totalorder %s575_s24, %s3637_s13 }
  0x3a   : > { %p3635_p1 = pneg %p3634_p0  ;;  %p3640_p4 = scmp.lt.s32.totalorder %s3638_s3, %s3631_s28 }
  0x3c   : > { %p3641_p6 = por %p3640_p4, %p3639_p3 }
  0x3e   : > { %p3642_p9 = pnand %p3641_p6, %p3635_p1 }
  0x40   : > { %3645 = shalt.err (!%p3642_p9)
}
  0x41   : > { %s4610_s5 = smov 192   ;;  %s4611_s9 = smov 12  }
  0x42   : > { %3350 = dma.hbm_to_vmem [thread:$0]  (!%p4088_p10), %s573_s1, 3072, %s575_s24, %s4106_s7, %s4610_s5, %s4610_s5, %s4611_s9  }
  0x43   : > { %p721_p13 = scmp.lt.s32.totalorder %s3892_s0, 7  ;;  %s2835_s13 = sshll.u32 %s4082_s29, 6 }
  0x44   : > { %s3005_s28 = sshll.u32 %s3888_s30, 10  ;;  %s4657_s6 = sld [smem:[#allocation38_spill]] }
  0x45   : > { %p4124_p0 = pnand %p2847_p11, %p721_p13  ;;  %s595_s11 = scalar_lea.vmem [#allocation7], %s2835_s13 }
  0x46   : > { %s602_s4 = sshll.u32 %s595_s11, 4  ;;  %s4658_s8 = sld [smem:[#allocation40_spill]]  ;;  %s4133_s4 = int_to_ptr.vmem [resolvable:$true] %s602_s4 }
  0x47   : > { %s4655_s20 = scalar_select %p4124_p0, 1, 0 }
  0x48   : > { %s622_s5 = scalar_lea.vmem [#allocation8], %s2835_s13  ;;  %s4659_s27 = sand.u32 1, %s3892_s0  }
  0x49   : > { %4656 = sst [smem:[#allocation30_spill]] %s4655_s20  ;;  %s629_s9 = sshll.u32 %s622_s5, 4  ;;  %s630_s9 = int_to_ptr.vmem [resolvable:$true] %s629_s9 }
  0x4a   : > { %s4131_s15 = scalar_lea.hbm %s4657_s6, %s3005_s28  ;;  %s4140_s18 = scalar_lea.sflag [#allocation9], %s4659_s27 }
  0x4b   : > { %s3659_s25 = scalar_lea.vmem %s630_s9, 1024  ;;  %s3897_s17 = smov [#allocation8]  }
  0x4c   : > { %s628_s24 = scalar_lea.hbm %s4658_s8, %s3005_s28  ;;  %p3660_p11 = scmp.ne.s32.totalorder %s630_s9, %s3659_s25 }
  0x4d   : > { %s3664_s11 = sshll.u32 %s3897_s17, 4  ;;  %s3665_s11 = int_to_ptr.vmem [resolvable:$false] %s3664_s11 }
  0x4e   : > { %p3662_p1 = pnand %p3660_p11, %p3620_p12  ;;  %s3666_s3 = scalar_lea.vmem %s3665_s11, 2048 }
  0x4f   : > { %p3667_p4 = scmp.lt.s32.totalorder %s630_s9, %s3665_s11  ;;  %p3668_p6 = scmp.lt.s32.totalorder %s3666_s3, %s3659_s25 }
  0x50   : > { %p3663_p3 = pneg %p3662_p1 }
  0x51   : > { %p3669_p9 = por %p3668_p6, %p3667_p4 }
  0x53   : > { %p3670_p13 = pnand %p3669_p9, %p3663_p3 }
  0x55   : > { %3673 = shalt.err (!%p3670_p13)
}
  0x56   : > { %s3898_s26 = smov 64   ;;  %s3899_s27 = smov 4  }
  0x57   : > { %3356 = dma.hbm_to_vmem [thread:$0]  (!%p4088_p10), %s628_s24, 1024, %s630_s9, %s4140_s18, %s3898_s26, %s3898_s26, %s3899_s27  }
  0x58   : > { %s4660_s5 = smul.u32 3072, %s3888_s30  ;;  %s4661_s2 = sld [smem:[#allocation34_spill]] }
  0x59   : > { %s4662_s1 = smul.u32 192, %s4082_s29  ;;  %s536_s3 = scalar_lea.sflag [#allocation4], %s4082_s29 }
  0x5a   : > { %s3900_s8 = smov [#allocation3]  }
  0x5b   : > { %s539_s17 = scalar_lea.vmem [#allocation3], %s4662_s1  ;;  %s3692_s20 = sshll.u32 %s3900_s8, 4  ;;  %s3693_s20 = int_to_ptr.vmem [resolvable:$false] %s3692_s20 }
  0x5c   : > { %s546_s11 = sshll.u32 %s539_s17, 4  ;;  %s3694_s9 = scalar_lea.vmem %s3693_s20, 6144  ;;  %s547_s11 = int_to_ptr.vmem [resolvable:$true] %s546_s11 }
  0x5d   : > { %s3687_s6 = scalar_lea.vmem %s547_s11, 3072  ;;  %p3695_p4 = scmp.lt.s32.totalorder %s547_s11, %s3693_s20 }
  0x5e   : > { %s545_s25 = scalar_lea.hbm %s4661_s2, %s4660_s5  ;;  %p3688_p11 = scmp.ne.s32.totalorder %s547_s11, %s3687_s6 }
  0x5f   : > { %p3696_p6 = scmp.lt.s32.totalorder %s3694_s9, %s3687_s6 }
  0x60   : > { %p3690_p1 = pnand %p3688_p11, %p3620_p12 }
  0x61   : > { %p3697_p9 = por %p3696_p6, %p3695_p4 }
  0x62   : > { %p3691_p3 = pneg %p3690_p1 }
  0x64   : > { %p3698_p13 = pnand %p3697_p9, %p3691_p3 }
  0x66   : > { %3701 = shalt.err (!%p3698_p13)
}
  0x67   : > { %s4663_s24 = smov 12   ;;  %s4664_s5 = smov 192  }
  0x68   : > { %3347 = dma.hbm_to_vmem [thread:$0]  (!%p4088_p10), %s545_s25, 3072, %s547_s11, %s536_s3, %s4664_s5, %s4664_s5, %s4663_s24  }
  0x69   : > { %s3715_s29 = scalar_lea.vmem %s4133_s4, 1024  ;;  %s3901_s6 = smov [#allocation7]  }
  0x6a   : > { %p3716_p11 = scmp.ne.s32.totalorder %s4133_s4, %s3715_s29  ;;  %s3720_s8 = sshll.u32 %s3901_s6, 4  ;;  %s3721_s8 = int_to_ptr.vmem [resolvable:$false] %s3720_s8 }
  0x6b   : > { %s3722_s20 = scalar_lea.vmem %s3721_s8, 2048  ;;  %p3723_p3 = scmp.lt.s32.totalorder %s4133_s4, %s3721_s8 }
  0x6c   : > { %p3718_p1 = pnand %p3716_p11, %p3620_p12  ;;  %p3724_p4 = scmp.lt.s32.totalorder %s3722_s20, %s3715_s29 }
  0x6e   : > { %p3719_p8 = pneg %p3718_p1  ;;  %p3725_p6 = por %p3724_p4, %p3723_p3 }
  0x70   : > { %p3726_p9 = pnand %p3725_p6, %p3719_p8 }
  0x72   : > { %3729 = shalt.err (!%p3726_p9)
}
  0x73   : > { %3353 = dma.hbm_to_vmem [thread:$0]  (!%p4088_p10), %s4131_s15, 1024, %s4133_s4, %s4106_s7, %s3898_s26, %s3898_s26, %s3899_s27  }
  0x74   : > { %p310_p8 = scmp.eq.s32.totalorder %s3888_s30, 1  ;;  %p312_p12 = scmp.eq.s32.totalorder %s3888_s30, 2 }
  0x75   : > { %p314_p13 = scmp.eq.s32.totalorder %s4709_s19, 1  ;;  %p316_p11 = scmp.eq.s32.totalorder %s4709_s19, 2 }
  0x76   : > { %s311_s14 = scalar_select %p310_p8, 1, 0 }
  0x77   : > { %s315_s13 = scalar_select %p314_p13, 1, 0 }
  0x78   : > { %s4711_s14 = smov (%p312_p12, %s311_s14), 2  ;;  %s321_s28 = sadd.s32 1, %s3860_s23 }
  0x79   : > { %s4713_s13 = smov (%p316_p11, %s315_s13), 2  ;;  %p328_p1 = scmp.ne.s32.totalorder %s3860_s23, %s3856_s22 }
  0x7a   : > { %s318_s25 = ssub.s32 %s4711_s14, %s4713_s13  ;;  %p334_p3 = scmp.ne.s32.totalorder %s3856_s22, %s3852_s21 }
  0x7b   : > { %p319_p4 = scmp.eq.s32.totalorder %s318_s25, 0  ;;  %p330_p10 = por %p328_p1, %p113_p2 }
  0x7c   : > { %p4197_p6 = por %p334_p3, %p4064_p5  ;;  %s647_s7 = sand.u32 1, %s3860_s23  }
  0x7d   : > { %s4203_s15 = scalar_select %p319_p4, %s3860_s23, %s321_s28  }
  0x7e   : > { %s2841_s1 = sshll.u32 %s647_s7, 6  ;;  %s3007_s17 = sshll.u32 %s4711_s14, 10 }
  0x7f   : > { %4666 = sst [smem:[#allocation31_spill]] %s4203_s15  ;;  %s649_s24 = scalar_lea.vmem [#allocation10], %s2841_s1 }
  0x80   : > { %s4667_s10 = sld [smem:[#allocation42_spill]]  ;;  %s660_s5 = sshll.u32 %s649_s24, 4  ;;  %s661_s5 = int_to_ptr.vmem [resolvable:$true] %s660_s5 }
  0x81   : > { %p4668_p9 = scmp.lt.s32.totalorder %s3892_s0, 6  ;;  %s3743_s16 = scalar_lea.vmem %s661_s5, 1024 }
  0x82   : > { %p3744_p5 = scmp.ne.s32.totalorder %s661_s5, %s3743_s16  ;;  %s3902_s29 = smov [#allocation10]  }
  0x83   : > { %p4211_p8 = pnand %p4668_p9, %p330_p10  ;;  %s3748_s6 = sshll.u32 %s3902_s29, 4  ;;  %s3749_s6 = int_to_ptr.vmem [resolvable:$false] %s3748_s6 }
  0x84   : > { %s3750_s8 = scalar_lea.vmem %s3749_s6, 2048  ;;  %p3751_p11 = scmp.lt.s32.totalorder %s661_s5, %s3749_s6 }
  0x85   : > { %p3732_p2 = pneg %p4211_p8  ;;  %p3752_p1 = scmp.lt.s32.totalorder %s3750_s8, %s3743_s16 }
  0x86   : > { %s659_s9 = scalar_lea.hbm %s4667_s10, %s3007_s17 }
  0x87   : > { %p3746_p12 = pnand %p3744_p5, %p3732_p2  ;;  %p3753_p3 = por %p3752_p1, %p3751_p11 }
  0x89   : > { %p3747_p13 = pneg %p3746_p12 }
  0x8b   : > { %p3754_p4 = pnand %p3753_p3, %p3747_p13 }
  0x8d   : > { %3757 = shalt.err (!%p3754_p4)
}
  0x8e   : > { %3359 = dma.hbm_to_vmem [thread:$0]  (!%p4211_p8), %s659_s9, 1024, %s661_s5, %s4140_s18, %s3898_s26, %s3898_s26, %s3899_s27  }
  0x8f   : > { %s4670_s12 = sld [smem:[#allocation44_spill]]  ;;  %s688_s28 = scalar_lea.vmem [#allocation11], %s2841_s1 }
  0x90   : > { %s699_s25 = sshll.u32 %s688_s28, 4  ;;  %s685_s11 = scalar_lea.sflag [#allocation12], %s647_s7  ;;  %s700_s25 = int_to_ptr.vmem [resolvable:$true] %s699_s25 }
  0x91   : > { %s3771_s3 = scalar_lea.vmem %s700_s25, 1024  ;;  %s3903_s24 = smov [#allocation11]  }
  0x92   : > { %p3772_p10 = scmp.ne.s32.totalorder %s700_s25, %s3771_s3  ;;  %s3776_s16 = sshll.u32 %s3903_s24, 4  ;;  %s3777_s16 = int_to_ptr.vmem [resolvable:$false] %s3776_s16 }
  0x93   : > { %s3778_s29 = scalar_lea.vmem %s3777_s16, 2048  ;;  %p3779_p12 = scmp.lt.s32.totalorder %s700_s25, %s3777_s16 }
  0x94   : > { %p3774_p9 = pnand %p3772_p10, %p3732_p2  ;;  %p3780_p13 = scmp.lt.s32.totalorder %s3778_s29, %s3771_s3 }
  0x95   : > { %s698_s13 = scalar_lea.hbm %s4670_s12, %s3007_s17 }
  0x96   : > { %p3775_p5 = pneg %p3774_p9  ;;  %p3781_p11 = por %p3780_p13, %p3779_p12 }
  0x98   : > { %p3782_p1 = pnand %p3781_p11, %p3775_p5 }
  0x9a   : > { %3785 = shalt.err (!%p3782_p1)
}
  0x9b   : > { %3362 = dma.hbm_to_vmem [thread:$0]  (!%p4211_p8), %s698_s13, 1024, %s700_s25, %s685_s11, %s3898_s26, %s3898_s26, %s3899_s27  }
  0x9c   : > { %725 = sbr.rel (%p4124_p0) target bundleno = 2475 (0x9ab), region = 76  ;;  %s4672_s7 = sld [smem:[#allocation20_spill]] (!%p4124_p0) }
  0xa2   : > { %s727_s17 = sand.u32 1, %s4672_s7  }
  0xa3   : > { %s3330_s9 = smul.u32 192, %s727_s17  ;;  %s728_s5 = scalar_lea.sflag [#allocation4], %s727_s17 }
  0xa5   : > { %s4240_s6 = scalar_lea.vmem [#allocation3], %s3330_s9 }
  0xa6   : > { %3831 = dma.done.wait (%p4074_p7), %s728_s5, 3072  }
  0xa7   : > { %3833 = vsyncadd (%p4074_p7), %s728_s5, 4294964224  ;;  %s4674_s21 = sadd.s32 4294967295, %s3892_s0   ;;  %s4248_s27 = scalar_lea.vmem [#allocation5], %s3330_s9 }
  0xa8   : > { %s736_s8 = sand.u32 1, %s4674_s21  }
  0xa9   : > { %s737_s26 = scalar_lea.sflag [#allocation6], %s736_s8 }
  0xaa   : > { %3835 = dma.done.wait (%p4074_p7), %s737_s26, 4096  }
  0xab   : > { %3837 = vsyncadd (%p4074_p7), %s737_s26, 4294963200  ;;  %s2848_s20 = sshll.u32 %s727_s17, 6  ;;  %s755_s13 = scalar_lea.sflag [#allocation9], %s736_s8 }
  0xac   : > { %s4254_s14 = scalar_lea.vmem [#allocation7], %s2848_s20  ;;  %s4256_s28 = scalar_lea.vmem [#allocation8], %s2848_s20 }
  0xad   : > { %3839 = dma.done.wait (%p4074_p7), %s755_s13, 1024  }
  0xae   : > { %3841 = vsyncadd (%p4074_p7), %s755_s13, 4294966272  ;;  %s765_s25 = sand.u32 1, %s3856_s22  }
  0xaf   : > { %s2850_s11 = sshll.u32 %s765_s25, 6 }
  0xb0   : > { %s4263_s3 = scalar_lea.vmem [#allocation10], %s2850_s11 }
  0xb1   : > { %3843 = dma.done.wait (%p4197_p6), %s755_s13, 1024  }
  0xb2   : > { %3845 = vsyncadd (%p4197_p6), %s755_s13, 4294966272  ;;  %s773_s24 = scalar_lea.sflag [#allocation12], %s765_s25  ;;  %s4269_s16 = scalar_lea.vmem [#allocation11], %s2850_s11 }
  0xb3   : > { %3847 = dma.done.wait (%p4197_p6), %s773_s24, 1024  }
  0xb4   : > { %3849 = vsyncadd (%p4197_p6), %s773_s24, 4294966272  ;;  %s4675_s29 = sld [smem:[#allocation22_spill]] }
  0xb5   : > { %s4676_s18 = sld [smem:[#allocation23_spill]] }
  0xb6   : > { %s4677_s5 = sld [smem:[#allocation39_spill]] }
  0xb7   : > { %s4678_s13 = sld [smem:[#allocation41_spill]] }
  0xb8   : > { %s4679_s2 = sld [smem:[#allocation33_spill]] }
  0xb9   : > { %s4680_s30 = sld [smem:[#allocation35_spill]] }
  0xba   : > { %s2852_s7 = sshll.u32 %s4675_s29, 1  ;;  %s4681_s17 = sld [smem:[#allocation37_spill]] }
  0xbb   : > { %p884_p7 = scmp.lt.s32.totalorder %s4676_s18, 2  ;;  %p879_p0 = scmp.lt.s32.totalorder %s2852_s7, 3 }
  0xbc   : > { %p902_p8 = scmp.eq.s32.totalorder %s4676_s18, 1  ;;  %p904_p6 = scmp.eq.s32.totalorder %s4676_s18, 2 }
  0xbd   : > { %s4279_s1 = scalar_select %p884_p7, %s4676_s18, 2 }
  0xbe   : > { %s4715_s7 = smov (!%p879_p0, %s2852_s7), 3  ;;  %p930_p2 = scmp.lt.s32.totalorder %s4676_s18, 0 }
  0xbf   : > { %s3331_s4 = smul.u32 3, %s4279_s1  ;;  %s894_s21 = scalar_lea.vmem %s4677_s5, %s4279_s1 }
  0xc0   : > { %s2853_s8 = sshll.u32 %s4715_s7, 2  ;;  %s897_s25 = scalar_lea.vmem %s4678_s13, %s4279_s1 }
  0xc1   : > { %s4293_s10 = scalar_lea.vmem %s4679_s2, %s2853_s8  ;;  %s4298_s15 = scalar_lea.vmem %s4680_s30, %s3331_s4 }
  0xc2   : > { %s4303_s9 = scalar_lea.vmem %s4681_s17, %s3331_s4  ;;  %s4307_s5 = sshll.u32 %s4675_s29, 4 }
  0xc3   : > { %s903_s7 = scalar_select %p902_p8, 1, 0 }
  0xc4   : > { %s931_s26 = ssub.s32 0, %s4676_s18  ;;  %p943_p3 = scmp.eq.s32.totalorder %s4676_s18, 0 }
  0xc5   : > { %s4717_s7 = smov (%p904_p6, %s903_s7), 2  ;;  %s2855_s2 = smin.u32 %s4676_s18, %s931_s26 }
  0xc6   : > { %p906_p4 = scmp.lt.s32.totalorder %s4717_s7, 2  ;;  %s933_s8 = sand.u32 1, %s2855_s2  }
  0xc7   : > { %p944_p10 = scmp.eq.s32.totalorder %s4675_s29, 0  ;;  %s934_s12 = ssub.s32 0, %s933_s8 }
  0xc8   : > { %s4719_s7 = smov (!%p906_p4, %s4717_s7), 2  ;;  %s4682_s22 = sld [smem:[#allocation43_spill]] }
  0xc9   : > { %p945_p9 = pnand %p944_p10, %p943_p3  ;;  %s4683_s13 = sld [smem:[#allocation45_spill]] }
  0xca   : > { %s4721_s12 = smov (!%p930_p2, %s934_s12), %s933_s8  ;;  %s4684_s26 = sld [smem:[#allocation32_spill]] (!%p945_p9) }
  0xcb   : > { %p2857_p5 = scmp.lt.s32.totalorder %s4721_s12, 0  ;;  %s940_s24 = sadd.s32 2, %s4721_s12 }
  0xcc   : > { %948 = sbr.rel (%p945_p9) target bundleno = 211 (0xd3), region = 104 }
  0xcd   : > { %s4723_s24 = smov (!%p2857_p5, %s940_s24), %s4721_s12 }
  0xce   : > { %s4317_s23 = scalar_lea.vmem %s4682_s22, %s4719_s7  ;;  %s942_s29 = ssub.s32 1, %s4723_s24 }
  0xcf   : > { %s4322_s11 = scalar_lea.vmem %s4683_s13, %s4719_s7 }
  0xd0   : > { %s4685_s2 = smov (!%p945_p9), %s4684_s26 }
  0xd1   : > { %v949_v0 = vld [vmem:[%s4684_s26] sm:$0xff]   ;;  %v951_v1 = vld [vmem:[%s4685_s2 + $0x8] sm:$0xff]  }
  0xd2   : > { %954 = vst [vmem:[#allocation2 + $0x10] sm:$0xff] %v949_v0   ;;  %956 = vst [vmem:[#allocation2 + $0x18] sm:$0xff] %v951_v1  }
  0xd3 PF: > { %s3009_s7 = sshll.u32 %s942_s29, 4  ;;  %v3904_v2 = vmov 0.0   ;;  %vm3905_vm0 = vmmov 0   ;;  %v3468_v5 = vld [vmem:[%s4240_s6 + $0xac] ss:$12 sps:$4 sm:$0xff]   ;;  %v3467_v7 = vld [vmem:[%s4293_s10] sm:$0xff]  }
  0xd4   : > { %3118 = vmatprep.subr.bf16.mxu0 %v3904_v2  ;;  %3122 = vmatprep.mubr.msk.bf16.mxu0 %vm3905_vm0, %v3904_v2  ;;  %s4336_s8 = scalar_lea.vmem [#allocation2], %s3009_s7  ;;  %v3470_v6 = vld [vmem:[%s4240_s6 + $0xa8] ss:$12 sps:$4 sm:$0xff]   ;;  %v3471_v8 = vld [vmem:[%s4240_s6 + $0xb0] ss:$12 sps:$4 sm:$0xff]   ;;  %vm992_vm1 = vcmask 261120  }
  0xd5   : > { %1215 = vmatprep.subr.bf16.mxu1 %v3468_v5  ;;  %v3472_v9 = vld [vmem:[%s4240_s6 + $0x94] ss:$12 sps:$4 sm:$0xff]   ;;  %v3474_v10 = vld [vmem:[%s4240_s6 + $0x90] ss:$12 sps:$4 sm:$0xff]   ;;  %v3475_v12 = vld [vmem:[%s4240_s6 + $0x98] ss:$12 sps:$4 sm:$0xff]  }
  0xd6   : > { %1216 = vmatpush1.bf16.msra.mxu1 %v3470_v6  ;;  %v3476_v11 = vld [vmem:[%s4240_s6 + $0x7c] ss:$12 sps:$4 sm:$0xff]   ;;  %v3478_v13 = vld [vmem:[%s4240_s6 + $0x78] ss:$12 sps:$4 sm:$0xff]   ;;  %v3479_v15 = vld [vmem:[%s4240_s6 + $0x80] ss:$12 sps:$4 sm:$0xff]  }
  0xd7   : > { %1217 = vmatprep.subr.bf16.mxu1 %v3472_v9  ;;  %v3480_v14 = vld [vmem:[%s4240_s6 + $0x64] ss:$12 sps:$4 sm:$0xff]   ;;  %v3482_v16 = vld [vmem:[%s4240_s6 + $0x60] ss:$12 sps:$4 sm:$0xff]   ;;  %v3483_v18 = vld [vmem:[%s4240_s6 + $0x68] ss:$12 sps:$4 sm:$0xff]  }
  0xd8   : > { %v3484_v17 = vld [vmem:[%s4240_s6 + $0x4c] ss:$12 sps:$4 sm:$0xff]   ;;  %v3486_v19 = vld [vmem:[%s4240_s6 + $0x48] ss:$12 sps:$4 sm:$0xff]   ;;  %v3490_v21 = vld [vmem:[%s4240_s6 + $0x30] ss:$12 sps:$4 sm:$0xff]  }
  0xd9   : > { %v3465_v3 = vld [vmem:[%s4336_s8 + $0x8] sm:$0xff]   ;;  %v3466_v4 = vld [vmem:[%s4336_s8] sm:$0xff]   ;;  %v3487_v22 = vld [vmem:[%s4240_s6 + $0x50] ss:$12 sps:$4 sm:$0xff]   ;;  %v3906_v31 = vmov 0   ;;  %s965_s10 = sshra.s32 %s4307_s5, 3 }
  0xda   : > { %3119 = vmatpush3.bf16.msra.mxu0 %v3465_v3  ;;  %1218 = vmatpush1.bf16.msra.mxu1 %v3474_v10  ;;  %v3488_v20 = vld [vmem:[%s4240_s6 + $0x34] ss:$12 sps:$4 sm:$0xff]   ;;  %v3492_v23 = vld [vmem:[%s4240_s6 + $0x1c] ss:$12 sps:$4 sm:$0xff]   ;;  %v3494_v24 = vld [vmem:[%s4240_s6 + $0x18] ss:$12 sps:$4 sm:$0xff]  }
  0xdb   : > { %3120 = vmatprep.subr.bf16.mxu0 %v3904_v2  ;;  %1219 = vmatprep.subr.bf16.mxu1 %v3476_v11  ;;  %v3491_v25 = vld [vmem:[%s4240_s6 + $0x38] ss:$12 sps:$4 sm:$0xff]   ;;  %v3495_v26 = vld [vmem:[%s4240_s6 + $0x20] ss:$12 sps:$4 sm:$0xff]   ;;  %v3499_v29 = vld [vmem:[%s4240_s6 + $0x8] ss:$12 sps:$4 sm:$0xff]  }
  0xdc   : > { %v3496_v27 = vld [vmem:[%s4240_s6 + $0x4] ss:$12 sps:$4 sm:$0xff]   ;;  %v3498_v28 = vld [vmem:[%s4240_s6] ss:$12 sps:$4 sm:$0xff]   ;;  %1247 = vmatprep.mubr.bf16.mxu1 %v3906_v31  ;;  %v3500_v35 = vld [vmem:[%s4248_s27 + $0xa8] ss:$12 sps:$4 sm:$0xff]  }
  0xdd   : > { %v3502_v30 = vld [vmem:[%s4248_s27 + $0xac] ss:$12 sps:$4 sm:$0xff]   ;;  %v3524_v36 = vld [vmem:[%s4248_s27 + $0xb0] ss:$12 sps:$4 sm:$0xff]   ;;  %v3505_v38 = vld [vmem:[%s4248_s27 + $0x94] ss:$12 sps:$4 sm:$0xff]  }
  0xde   : > { %3121 = vmatpush3.bf16.msra.mxu0 %v3466_v4  ;;  %1220 = vmatpush1.bf16.msra.mxu1 %v3478_v13  ;;  %v3503_v40 = vld [vmem:[%s4248_s27 + $0x90] ss:$12 sps:$4 sm:$0xff]   ;;  %v3526_v41 = vld [vmem:[%s4248_s27 + $0x98] ss:$12 sps:$4 sm:$0xff]   ;;  %v3527_v44 = vld [vmem:[%s4248_s27 + $0x80] ss:$12 sps:$4 sm:$0xff]  }
  0xdf   : > { %3126 = vmatprep.subr.bf16.mxu0 %v3904_v2  ;;  %1221 = vmatprep.subr.bf16.mxu1 %v3480_v14  ;;  %v3508_v42 = vld [vmem:[%s4248_s27 + $0x7c] ss:$12 sps:$4 sm:$0xff]   ;;  %v3506_v43 = vld [vmem:[%s4248_s27 + $0x78] ss:$12 sps:$4 sm:$0xff]   ;;  %v3509_v46 = vld [vmem:[%s4248_s27 + $0x60] ss:$12 sps:$4 sm:$0xff]  }
  0xe0   : > { %v3511_v45 = vld [vmem:[%s4248_s27 + $0x64] ss:$12 sps:$4 sm:$0xff]   ;;  %v3528_v47 = vld [vmem:[%s4248_s27 + $0x68] ss:$12 sps:$4 sm:$0xff]   ;;  %v3514_v48 = vld [vmem:[%s4248_s27 + $0x4c] ss:$12 sps:$4 sm:$0xff]  }
  0xe1   : > { %3123 = vmatmul.mubr.msk.bf16.vlgmr.msra.gmra.mxu0 %vm992_vm1, %v3467_v7  ;;  %v3512_v49 = vld [vmem:[%s4248_s27 + $0x48] ss:$12 sps:$4 sm:$0xff]   ;;  %v3529_v50 = vld [vmem:[%s4248_s27 + $0x50] ss:$12 sps:$4 sm:$0xff]   ;;  %v3530_v53 = vld [vmem:[%s4248_s27 + $0x38] ss:$12 sps:$4 sm:$0xff]  }
  0xe2   : > { %3127 = vmatpush3.bf16.msra.mxu0 %v3471_v8  ;;  %3142 = vmatprep.mubr.msk.bf16.mxu0 %vm3905_vm0, %v3904_v2  ;;  %v3517_v51 = vld [vmem:[%s4248_s27 + $0x34] ss:$12 sps:$4 sm:$0xff]   ;;  %v3515_v52 = vld [vmem:[%s4248_s27 + $0x30] ss:$12 sps:$4 sm:$0xff]   ;;  %s4404_s6 = sshll.u32 %s965_s10, 2  ;;  %v3535_v63 = vld [vmem:[%s4254_s14 + $0x28] sm:$0xff]  }
  0xe3   : > { %3128 = vmatprep.subr.bf16.mxu0 %v3904_v2  ;;  %1222 = vmatpush1.bf16.msra.mxu1 %v3482_v16  ;;  %v3520_v54 = vld [vmem:[%s4248_s27 + $0x1c] ss:$12 sps:$4 sm:$0xff]   ;;  %v3518_v55 = vld [vmem:[%s4248_s27 + $0x18] ss:$12 sps:$4 sm:$0xff]   ;;  %v3531_v56 = vld [vmem:[%s4248_s27 + $0x20] ss:$12 sps:$4 sm:$0xff]   ;;  %s968_s12 = scalar_lea.vmem %s4336_s8, %s4404_s6 [#allocation2] }
  0xe4   : > { %1223 = vmatprep.subr.bf16.mxu1 %v3484_v17  ;;  %v3523_v57 = vld [vmem:[%s4248_s27 + $0x4] ss:$12 sps:$4 sm:$0xff]   ;;  %v3521_v58 = vld [vmem:[%s4248_s27] ss:$12 sps:$4 sm:$0xff]   ;;  %v3532_v60 = vld [vmem:[%s4248_s27 + $0x8] ss:$12 sps:$4 sm:$0xff]  }
  0xe5   : > { %v4413_v59 = vld [vmem:[%s968_s12] sm:$0xff]   ;;  %v3533_v61 = vld [vmem:[%s4254_s14 + $0x38] sm:$0xff]   ;;  %v3534_v62 = vld [vmem:[%s4254_s14 + $0x30] sm:$0xff]   ;;  %p2936_p12 = scmp.ne.s32.totalorder %s4723_s24, 0 }
  0xe6   : > { %3129 = vmatpush3.bf16.msra.mxu0 %v3475_v12  ;;  %v3536_v0 = vld [vmem:[%s4254_s14 + $0x20] sm:$0xff]   ;;  %v3537_v1 = vld [vmem:[%s4254_s14 + $0x18] sm:$0xff]   ;;  %v3538_v3 = vld [vmem:[%s4254_s14 + $0x10] sm:$0xff]  }
  0xe7   : > { %3130 = vmatprep.subr.bf16.mxu0 %v3904_v2  ;;  %1224 = vmatpush1.bf16.msra.mxu1 %v3486_v19  ;;  %v3539_v4 = vld [vmem:[%s4254_s14 + $0x8] sm:$0xff]   ;;  %v3540_v5 = vld [vmem:[%s4254_s14] sm:$0xff]   ;;  %v3541_v6 = vld [vmem:[%s4256_s28 + $0x38] sm:$0xff]  }
  0xe8   : > { %1225 = vmatprep.subr.bf16.mxu1 %v3488_v20  ;;  %v3542_v7 = vld [vmem:[%s4256_s28 + $0x30] sm:$0xff]   ;;  %v3543_v8 = vld [vmem:[%s4256_s28 + $0x28] sm:$0xff]   ;;  %v3544_v9 = vld [vmem:[%s4256_s28 + $0x20] sm:$0xff]  }
  0xe9   : > { %v3545_v10 = vld [vmem:[%s4256_s28 + $0x18] sm:$0xff]   ;;  %v1070_v20 = vld [vmem:[%s4298_s15] sm:$0x7] }
  0xea   : > { %3131 = vmatpush3.bf16.msra.mxu0 %v3479_v15  ;;  %v1072_v15 = vlaneseq }
  0xeb   : > { %3132 = vmatprep.subr.bf16.mxu0 %v3904_v2  ;;  %1226 = vmatpush1.bf16.msra.mxu1 %v3490_v21 }
  0xec   : > { %1227 = vmatprep.subr.bf16.mxu1 %v3492_v23  ;;  %v1073_v17 = vshrl.u32 %v1072_v15, 7  ;;  %v971_v15 = vunpack.c.l.bf16 %v4413_v59 }
  0xee   : > { %3133 = vmatpush3.bf16.msra.mxu0 %v3483_v18  ;;  %v1074_v19 = vsub.s32 0, %v1073_v17 }
  0xef   : > { %3134 = vmatprep.subr.bf16.mxu0 %v3904_v2  ;;  %1228 = vmatpush1.bf16.msra.mxu1 %v3494_v24 }
  0xf0   : > { %1229 = vmatprep.subr.bf16.mxu1 %v3496_v27  ;;  %v1075_v23 = vrot.slane %v1070_v20, %v1074_v19 }
  0xf2   : > { %3135 = vmatpush3.bf16.msra.mxu0 %v3487_v22  ;;  %v1331_v22 = vld [vmem:[%s4303_s9] sm:$0x7] }
  0xf3   : > { %3136 = vmatprep.subr.bf16.mxu0 %v3904_v2  ;;  %1230 = vmatpush1.bf16.msra.mxu1 %v3498_v28  ;;  %v1336_v24 = vrot.slane %v1331_v22, %v1074_v19 }
  0xf4   : > { %1482 = vmatprep.subr.bf16.mxu1 %v3502_v30 }
  0xf6   : > { %3137 = vmatpush3.bf16.msra.mxu0 %v3491_v25 }
  0xf7   : > { %3138 = vmatprep.subr.bf16.mxu0 %v3904_v2 }
  0xfa   : > { %3139 = vmatpush3.bf16.msra.mxu0 %v3495_v26  ;;  %v1078_v26 = vsub.s32 1, %v1073_v17 }
  0xfb   : > { %3140 = vmatprep.subr.bf16.mxu0 %v3904_v2 }
  0xfe   : > { %3141 = vmatpush3.bf16.msra.mxu0 %v3499_v29 }
  0xff   : > { %3146 = vmatprep.subr.bf16.mxu0 %v3904_v2 }
 0x1a1   : > { %v1030_v32 = vpop.f32.mrf.mxu0 }
 0x1a3   : > { %v3124_v33 = vpop.f32.mrf.mxu0 }
 0x1a5   : > { %v1033_v34 = vpop.f32.mrf.mxu0 }
 0x1a6   : > { %v1037_v37 = vpack.c.bf16 %v1033_v34, %v1030_v32  ;;  %v1079_v34 = vrot.slane %v1070_v20, %v1078_v26 }
 0x1a7   : > { %v3125_v39 = vpop.f32.mrf.mxu0 }
 0x1a8   : > { %1248 = vmatmul.mubr.bf16.vlgmr.msra.gmra.mxu1 %v1037_v37  ;;  %3143 = vmatmul.mubr.bf16.vlgmr.msra.gmra.mxu0 %v1037_v37 }
 0x1a9   : > { %1483 = vmatpush1.bf16.msra.mxu1 %v3500_v35  ;;  %3147 = vmatpush3.bf16.msra.mxu0 %v3524_v36 }
 0x1aa   : > { %1484 = vmatprep.subr.bf16.mxu1 %v3505_v38  ;;  %1514 = vmatprep.mubr.bf16.mxu1 %v3906_v31  ;;  %v1340_v31 = vrot.slane %v1331_v22, %v1078_v26 }
 0x1ab   : > { %3148 = vmatprep.subr.bf16.mxu0 %v3904_v2  ;;  %3162 = vmatprep.mubr.msk.bf16.mxu0 %vm3905_vm0, %v3904_v2 }
 0x1ad   : > { %1485 = vmatpush1.bf16.msra.mxu1 %v3503_v40  ;;  %3149 = vmatpush3.bf16.msra.mxu0 %v3526_v41 }
 0x1ae   : > { %1486 = vmatprep.subr.bf16.mxu1 %v3508_v42  ;;  %3150 = vmatprep.subr.bf16.mxu0 %v3904_v2 }
 0x1b1   : > { %1487 = vmatpush1.bf16.msra.mxu1 %v3506_v43  ;;  %3151 = vmatpush3.bf16.msra.mxu0 %v3527_v44 }
 0x1b2   : > { %1488 = vmatprep.subr.bf16.mxu1 %v3511_v45  ;;  %3152 = vmatprep.subr.bf16.mxu0 %v3904_v2 }
 0x1b5   : > { %1489 = vmatpush1.bf16.msra.mxu1 %v3509_v46  ;;  %3153 = vmatpush3.bf16.msra.mxu0 %v3528_v47 }
 0x1b6   : > { %1490 = vmatprep.subr.bf16.mxu1 %v3514_v48  ;;  %3154 = vmatprep.subr.bf16.mxu0 %v3904_v2 }
 0x1b9   : > { %1491 = vmatpush1.bf16.msra.mxu1 %v3512_v49  ;;  %3155 = vmatpush3.bf16.msra.mxu0 %v3529_v50 }
 0x1ba   : > { %1492 = vmatprep.subr.bf16.mxu1 %v3517_v51  ;;  %3156 = vmatprep.subr.bf16.mxu0 %v3904_v2 }
 0x1bd   : > { %1493 = vmatpush1.bf16.msra.mxu1 %v3515_v52  ;;  %3157 = vmatpush3.bf16.msra.mxu0 %v3530_v53 }
 0x1be   : > { %1494 = vmatprep.subr.bf16.mxu1 %v3520_v54  ;;  %3158 = vmatprep.subr.bf16.mxu0 %v3904_v2 }
 0x1c1   : > { %1495 = vmatpush1.bf16.msra.mxu1 %v3518_v55  ;;  %3159 = vmatpush3.bf16.msra.mxu0 %v3531_v56 }
 0x1c2   : > { %1496 = vmatprep.subr.bf16.mxu1 %v3523_v57  ;;  %3160 = vmatprep.subr.bf16.mxu0 %v3904_v2  ;;  %v1082_v57 = vsub.s32 2, %v1073_v17 }
 0x1c5   : > { %1497 = vmatpush1.bf16.msra.mxu1 %v3521_v58  ;;  %3161 = vmatpush3.bf16.msra.mxu0 %v3532_v60  ;;  %v1344_v58 = vrot.slane %v1331_v22, %v1082_v57 }
 0x1c6   : > { %3166 = vmatprep.subr.bf16.mxu1 %v3904_v2  ;;  %3186 = vmatprep.subr.bf16.mxu0 %v3904_v2 }
 0x1c8   : > { %1515 = vmatmul.mubr.bf16.vlgmr.msra.gmra.mxu1 %v4413_v59  ;;  %3163 = vmatmul.mubr.bf16.vlgmr.msra.gmra.mxu0 %v4413_v59 }
 0x1c9   : > { %3182 = vmatprep.mubr.msk.bf16.mxu1 %vm3905_vm0, %v3904_v2  ;;  %3202 = vmatprep.mubr.msk.bf16.mxu0 %vm3905_vm0, %v3904_v2 }
 0x1ca   : > { %3167 = vmatpush3.bf16.msra.mxu1 %v3533_v61  ;;  %3187 = vmatpush3.bf16.msra.mxu0 %v3541_v6 }
 0x1cb   : > { %3168 = vmatprep.subr.bf16.mxu1 %v3904_v2  ;;  %3188 = vmatprep.subr.bf16.mxu0 %v3904_v2 }
 0x1ce   : > { %3169 = vmatpush3.bf16.msra.mxu1 %v3534_v62  ;;  %3189 = vmatpush3.bf16.msra.mxu0 %v3542_v7  ;;  %v1083_v62 = vrot.slane %v1070_v20, %v1082_v57 }
 0x1cf   : > { %3170 = vmatprep.subr.bf16.mxu1 %v3904_v2  ;;  %3190 = vmatprep.subr.bf16.mxu0 %v3904_v2 }
 0x1d2   : > { %3171 = vmatpush3.bf16.msra.mxu1 %v3535_v63  ;;  %3191 = vmatpush3.bf16.msra.mxu0 %v3543_v8 }
 0x1d3   : > { %3172 = vmatprep.subr.bf16.mxu1 %v3904_v2  ;;  %3192 = vmatprep.subr.bf16.mxu0 %v3904_v2 }
 0x1d6   : > { %3173 = vmatpush3.bf16.msra.mxu1 %v3536_v0  ;;  %3193 = vmatpush3.bf16.msra.mxu0 %v3544_v9 }
 0x1d7   : > { %3174 = vmatprep.subr.bf16.mxu1 %v3904_v2  ;;  %3194 = vmatprep.subr.bf16.mxu0 %v3904_v2 }
 0x1da   : > { %3175 = vmatpush3.bf16.msra.mxu1 %v3537_v1  ;;  %3195 = vmatpush3.bf16.msra.mxu0 %v3545_v10 }
 0x1db   : > { %3176 = vmatprep.subr.bf16.mxu1 %v3904_v2  ;;  %3196 = vmatprep.subr.bf16.mxu0 %v3904_v2 }
 0x1de   : > { %3177 = vmatpush3.bf16.msra.mxu1 %v3538_v3 }
 0x1df   : > { %3178 = vmatprep.subr.bf16.mxu1 %v3904_v2 }
 0x1e2   : > { %3179 = vmatpush3.bf16.msra.mxu1 %v3539_v4 }
 0x1e3   : > { %3180 = vmatprep.subr.bf16.mxu1 %v3904_v2 }
 0x1e6   : > { %3181 = vmatpush3.bf16.msra.mxu1 %v3540_v5 }
 0x268   : > { %v1292_v11 = vpop.f32.mrf.mxu0  ;;  %v1249_v16 = vpop.f32.mrf.mxu1 }
 0x269   : > { %v1250_v29 = vadd.f32 %v1249_v16, %v1075_v23  ;;  %v1293_v4 = vadd.f32 %v1292_v11, %v1083_v62 }
 0x26a   : > { %v3144_v12 = vpop.f32.mrf.mxu0  ;;  %v1251_v18 = vpop.f32.mrf.mxu1 }
 0x26b   : > { %v1252_v44 = vadd.f32 %v1251_v18, %v1079_v34  ;;  %v972_v18 = vunpack.c.h.bf16 %v4413_v59  ;;  %v3548_v59 = vld [vmem:[%s4256_s28] sm:$0xff]  }
 0x26c   : > { %v4450_v13 = vpop.f32.mrf.mxu0  ;;  %v1253_v21 = vpop.f32.mrf.mxu1 }
 0x26d   : > { %v1254_v38 = vadd.f32 %v1253_v21, %v1075_v23  ;;  %v1296_v9 = vadd.f32 %v4450_v13, %v1083_v62 }
 0x26e   : > { %v3145_v14 = vpop.f32.mrf.mxu0  ;;  %v1255_v25 = vpop.f32.mrf.mxu1 }
 0x26f   : > { %v1256_v49 = vadd.f32 %v1255_v25, %v1079_v34 }
 0x288   : > { %v1516_v27 = vpop.f32.mrf.mxu1  ;;  %v1559_v28 = vpop.f32.mrf.mxu0 }
 0x289   : > { %v1517_v30 = vadd.f32 %v1516_v27, %v1336_v24  ;;  %v1560_v0 = vadd.f32 %v1559_v28, %v1344_v58  ;;  %v3546_v27 = vld [vmem:[%s4256_s28 + $0x10] sm:$0xff]   ;;  %v3547_v28 = vld [vmem:[%s4256_s28 + $0x8] sm:$0xff]   ;;  %s1851_s28 = scalar_lea.vmem (!%p2936_p12), [#allocation2], %s4404_s6 }
 0x28a   : > { %v1518_v32 = vpop.f32.mrf.mxu1  ;;  %v3164_v33 = vpop.f32.mrf.mxu0  ;;  %3197 = vmatpush3.bf16.msra.mxu0 %v3546_v27 }
 0x28b   : > { %v1566_v35 = vadd.f32 %v1517_v30, %v1250_v29  ;;  %v1519_v40 = vadd.f32 %v1518_v32, %v1340_v31  ;;  %3198 = vmatprep.subr.bf16.mxu0 %v3904_v2  ;;  %v2918_v29 = vld [vmem:[%s894_s21] ss:$0 sm:$0xff] }
 0x28c   : > { %v1520_v36 = vpop.f32.mrf.mxu1  ;;  %v1562_v37 = vpop.f32.mrf.mxu0 }
 0x28d   : > { %v2914_v39 = vmul.f32 -1.442695, %v1566_v35  ;;  %v1521_v41 = vadd.f32 %v1520_v36, %v1336_v24  ;;  %v1580_v47 = vadd.f32 %v1519_v40, %v1252_v44  ;;  %v1563_v7 = vadd.f32 %v1562_v37, %v1344_v58 }
 0x28e   : > { %v1522_v42 = vpop.f32.mrf.mxu1  ;;  %v3165_v43 = vpop.f32.mrf.mxu0  ;;  %3199 = vmatpush3.bf16.msra.mxu0 %v3547_v28 }
 0x28f   : > { %3550 = vpow2.f32 %v2914_v39  ;;  %v1567_v45 = vadd.f32 %v1521_v41, %v1254_v38  ;;  %v1523_v46 = vadd.f32 %v1522_v42, %v1340_v31  ;;  %v2916_v51 = vmul.f32 -1.442695, %v1580_v47  ;;  %3200 = vmatprep.subr.bf16.mxu0 %v3904_v2  ;;  %v2927_v2 = vld [vmem:[%s897_s25] ss:$0 sm:$0xff] }
 0x291   : > { %v2915_v48 = vmul.f32 -1.442695, %v1567_v45  ;;  %v1581_v50 = vadd.f32 %v1523_v46, %v1256_v49 }
 0x292   : > { %3201 = vmatpush3.bf16.msra.mxu0 %v3548_v59 }
 0x293   : > { %3552 = vpow2.f32 %v2915_v48  ;;  %v2917_v52 = vmul.f32 -1.442695, %v1581_v50 }
 0x294   : > { %3554 = vpow2.f32 %v2916_v51 }
 0x295   : > { %3556 = vpow2.f32 %v2917_v52 }
 0x29c   : > { %v3551_v53 = vpop.eup %3550 }
 0x29d   : > { %v1574_v54 = vadd.f32 1.0, %v3551_v53 }
 0x29f   : > { %3558 = vrcp.f32 %v1574_v54 }
 0x2a0   : > { %v3553_v55 = vpop.eup %3552 }
 0x2a1   : > { %v1575_v56 = vadd.f32 1.0, %v3553_v55  ;;  %v3555_v60 = vpop.eup %3554 }
 0x2a2   : > { %v3557_v61 = vpop.eup %3556  ;;  %v1588_v63 = vadd.f32 1.0, %v3555_v60 }
 0x2a3   : > { %3560 = vrcp.f32 %v1575_v56  ;;  %v1589_v3 = vadd.f32 1.0, %v3557_v61 }
 0x2a4   : > { %3562 = vrcp.f32 %v1588_v63 }
 0x2a5   : > { %3564 = vrcp.f32 %v1589_v3 }
 0x2ac   : > { %v3559_v1 = vpop.eup %3558 }
 0x2ad   : > { %v1594_v5 = vmul.f32 %v3559_v1, %v1560_v0 }
 0x2af   : > { %v1596_v6 = vadd.f32 %v1594_v5, %v1293_v4 }
 0x2b0   : > { %v3561_v8 = vpop.eup %3560 }
 0x2b1   : > { %3566 = vtanh.f32 %v1596_v6  ;;  %v1595_v10 = vmul.f32 %v3561_v8, %v1563_v7  ;;  %v3563_v14 = vpop.eup %3562 }
 0x2b2   : > { %v3565_v16 = vpop.eup %3564  ;;  %v1600_v17 = vsub.f32 1.0, %v3563_v14  ;;  %v1604_v20 = vmul.f32 %v3563_v14, %v971_v15 }
 0x2b3   : > { %v1597_v12 = vadd.f32 %v1595_v10, %v1296_v9  ;;  %v1601_v21 = vsub.f32 1.0, %v3565_v16  ;;  %v1605_v24 = vmul.f32 %v3565_v16, %v972_v18 }
 0x2b5   : > { %3568 = vtanh.f32 %v1597_v12 }
 0x2be   : > { %v3567_v11 = vpop.eup %3566 }
 0x2bf   : > { %v1602_v19 = vmul.f32 %v3567_v11, %v1600_v17 }
 0x2c1   : > { %v1606_v13 = vadd.f32 %v1604_v20, %v1602_v19 }
 0x2c2   : > { %v3569_v22 = vpop.eup %3568 }
 0x2c3   : > { %v1603_v23 = vmul.f32 %v3569_v22, %v1601_v21 }
 0x2c5   : > { %v1607_v25 = vadd.f32 %v1605_v24, %v1603_v23 }
 0x2c7   : > { %v1608_v26 = vpack.c.bf16 %v1607_v25, %v1606_v13 }
 0x2c9   : > { %3183 = vmatmul.mubr.bf16.vlgmr.msra.gmra.mxu1 %v1608_v26 }
 0x389   : > { %v1714_v30 = vpop.f32.mrf.mxu1 }
 0x38a   : > { %v1715_v32 = vadd.f32 %v2918_v29, %v1714_v30 }
 0x38b   : > { %v3184_v31 = vpop.f32.mrf.mxu1 }
 0x38c   : > { %v1721_v36 = vmax.f32 %v1715_v32, 0.0 }
 0x38d   : > { %v1717_v33 = vpop.f32.mrf.mxu1 }
 0x38e   : > { %v1718_v34 = vadd.f32 %v2918_v29, %v1717_v33 }
 0x38f   : > { %v3185_v35 = vpop.f32.mrf.mxu1 }
 0x390   : > { %v1722_v37 = vmax.f32 %v1718_v34, 0.0 }
 0x392   : > { %v1723_v38 = vpack.c.bf16 %v1722_v37, %v1721_v36 }
 0x394   : > { %3203 = vmatmul.mubr.bf16.vlgmr.msra.gmra.mxu0 %v1723_v38 }
 0x454   : > { %v1829_v39 = vpop.f32.mrf.mxu0 }
 0x455   : > { %v1830_v41 = vadd.f32 %v2927_v2, %v1829_v39 }
 0x456   : > { %v3204_v40 = vpop.f32.mrf.mxu0 }
 0x457   : > { %v1836_v45 = vmax.f32 %v1830_v41, 0.0 }
 0x458   : > { %v1832_v42 = vpop.f32.mrf.mxu0 }
 0x459   : > { %v1833_v43 = vadd.f32 %v2927_v2, %v1832_v42  ;;  %1842 = sbr.rel (%p2936_p12) target bundleno = 1120 (0x460), region = 108 }
 0x45a   : > { %v3205_v44 = vpop.f32.mrf.mxu0 }
 0x45b   : > { %v1837_v46 = vmax.f32 %v1833_v43, 0.0 }
 0x45d   : > { %v4472_v47 = vpack.c.bf16 %v1837_v46, %v1836_v45 }
 0x45f   : > { %3018 = vst [vmem:[%s1851_s28] sm:$0xff] %v4472_v47  }
 0x460 PF: > { %p2940_p13 = scmp.ne.s32.totalorder %s4723_s24, 1 }
 0x461   : > { %s2709_s1 = scalar_lea.vmem (!%p2940_p13), [#allocation2], %s4404_s6 }
 0x462   : > { %1857 = sbr.rel (%p2940_p13) target bundleno = 1128 (0x468), region = 112 }
 0x467   : > { %3024 = vst [vmem:[%s2709_s1 + $0x10] sm:$0xff] %v4472_v47  }
 0x468 PF: > { %s4688_s21 = sld [smem:[#allocation23_spill]] }
 0x46e   : > { %p2946_p11 = scmp.ne.s32.totalorder %s4688_s21, 0 }
 0x46f   : > { %s4689_s13 = sld [smem:[#allocation46_spill]] (!%p2946_p11) }
 0x470   : > { %1872 = sbr.rel (%p2946_p11) target bundleno = 1577 (0x629), region = 116 }
 0x475   : > { %v3570_v48 = vld [vmem:[%s4263_s3 + $0x38] sm:$0xff]   ;;  %v3907_v49 = vmov 0.0   ;;  %v3571_v50 = vld [vmem:[%s4263_s3 + $0x30] sm:$0xff]   ;;  %vm3908_vm2 = vmmov 0   ;;  %v3572_v51 = vld [vmem:[%s4263_s3 + $0x28] sm:$0xff]   ;;  %s2100_s24 = scalar_lea.vmem %s4689_s13, %s4307_s5 }
 0x476   : > { %3206 = vmatprep.subr.bf16.mxu0 %v3907_v49  ;;  %3226 = vmatprep.subr.bf16.mxu1 %v3907_v49  ;;  %v3578_v52 = vld [vmem:[%s4269_s16 + $0x38] sm:$0xff]   ;;  %v3573_v53 = vld [vmem:[%s4263_s3 + $0x20] sm:$0xff]   ;;  %v3579_v54 = vld [vmem:[%s4269_s16 + $0x30] sm:$0xff]  }
 0x477   : > { %3207 = vmatpush3.bf16.msra.mxu0 %v3570_v48  ;;  %3222 = vmatprep.mubr.msk.bf16.mxu0 %vm3908_vm2, %v3907_v49  ;;  %v3574_v55 = vld [vmem:[%s4263_s3 + $0x18] sm:$0xff]   ;;  %v3580_v56 = vld [vmem:[%s4269_s16 + $0x28] sm:$0xff]   ;;  %v3575_v57 = vld [vmem:[%s4263_s3 + $0x10] sm:$0xff]  }
 0x478   : > { %3208 = vmatprep.subr.bf16.mxu0 %v3907_v49  ;;  %3242 = vmatprep.mubr.msk.bf16.mxu1 %vm3908_vm2, %v3907_v49  ;;  %v3581_v58 = vld [vmem:[%s4269_s16 + $0x20] sm:$0xff]   ;;  %v3576_v60 = vld [vmem:[%s4263_s3 + $0x8] sm:$0xff]   ;;  %v3582_v61 = vld [vmem:[%s4269_s16 + $0x18] sm:$0xff]  }
 0x479   : > { %3227 = vmatpush3.bf16.msra.mxu1 %v3578_v52  ;;  %v3577_v62 = vld [vmem:[%s4263_s3] sm:$0xff]   ;;  %v3583_v63 = vld [vmem:[%s4269_s16 + $0x10] sm:$0xff]   ;;  %v3584_v0 = vld [vmem:[%s4269_s16 + $0x8] sm:$0xff]  }
 0x47a   : > { %3228 = vmatprep.subr.bf16.mxu1 %v3907_v49  ;;  %v3585_v1 = vld [vmem:[%s4269_s16] sm:$0xff]  }
 0x47b   : > { %3209 = vmatpush3.bf16.msra.mxu0 %v3571_v50  ;;  %v2947_v3 = vld [vmem:[%s4317_s23] ss:$0 sm:$0xff] }
 0x47c   : > { %3210 = vmatprep.subr.bf16.mxu0 %v3907_v49  ;;  %v2956_v15 = vld [vmem:[%s4322_s11] ss:$0 sm:$0xff] }
 0x47d   : > { %3229 = vmatpush3.bf16.msra.mxu1 %v3579_v54 }
 0x47e   : > { %3230 = vmatprep.subr.bf16.mxu1 %v3907_v49 }
 0x47f   : > { %3211 = vmatpush3.bf16.msra.mxu0 %v3572_v51 }
 0x480   : > { %3212 = vmatprep.subr.bf16.mxu0 %v3907_v49 }
 0x481   : > { %3231 = vmatpush3.bf16.msra.mxu1 %v3580_v56 }
 0x482   : > { %3232 = vmatprep.subr.bf16.mxu1 %v3907_v49 }
 0x483   : > { %3213 = vmatpush3.bf16.msra.mxu0 %v3573_v53 }
 0x484   : > { %3214 = vmatprep.subr.bf16.mxu0 %v3907_v49 }
 0x485   : > { %3233 = vmatpush3.bf16.msra.mxu1 %v3581_v58 }
 0x486   : > { %3234 = vmatprep.subr.bf16.mxu1 %v3907_v49 }
 0x487   : > { %3215 = vmatpush3.bf16.msra.mxu0 %v3574_v55 }
 0x488   : > { %3216 = vmatprep.subr.bf16.mxu0 %v3907_v49 }
 0x489   : > { %3235 = vmatpush3.bf16.msra.mxu1 %v3582_v61 }
 0x48a   : > { %3236 = vmatprep.subr.bf16.mxu1 %v3907_v49 }
 0x48b   : > { %3217 = vmatpush3.bf16.msra.mxu0 %v3575_v57 }
 0x48c   : > { %3218 = vmatprep.subr.bf16.mxu0 %v3907_v49 }
 0x48d   : > { %3237 = vmatpush3.bf16.msra.mxu1 %v3583_v63 }
 0x48e   : > { %3238 = vmatprep.subr.bf16.mxu1 %v3907_v49 }
 0x48f   : > { %3219 = vmatpush3.bf16.msra.mxu0 %v3576_v60 }
 0x490   : > { %3220 = vmatprep.subr.bf16.mxu0 %v3907_v49 }
 0x491   : > { %3239 = vmatpush3.bf16.msra.mxu1 %v3584_v0 }
 0x492   : > { %3240 = vmatprep.subr.bf16.mxu1 %v3907_v49 }
 0x493   : > { %3221 = vmatpush3.bf16.msra.mxu0 %v3577_v62 }
 0x495   : > { %3241 = vmatpush3.bf16.msra.mxu1 %v3585_v1 }
 0x496   : > { %3223 = vmatmul.mubr.bf16.vlgmr.msra.gmra.mxu0 %v4472_v47 }
 0x556   : > { %v1978_v4 = vpop.f32.mrf.mxu0 }
 0x557   : > { %v1979_v6 = vadd.f32 %v2947_v3, %v1978_v4 }
 0x558   : > { %v3224_v5 = vpop.f32.mrf.mxu0 }
 0x559   : > { %v1985_v10 = vmax.f32 %v1979_v6, 0.0 }
 0x55a   : > { %v1981_v7 = vpop.f32.mrf.mxu0 }
 0x55b   : > { %v1982_v8 = vadd.f32 %v2947_v3, %v1981_v7 }
 0x55c   : > { %v3225_v9 = vpop.f32.mrf.mxu0 }
 0x55d   : > { %v1986_v12 = vmax.f32 %v1982_v8, 0.0 }
 0x55f   : > { %v1987_v14 = vpack.c.bf16 %v1986_v12, %v1985_v10 }
 0x561   : > { %3243 = vmatmul.mubr.bf16.vlgmr.msra.gmra.mxu1 %v1987_v14 }
 0x621   : > { %v2093_v16 = vpop.f32.mrf.mxu1 }
 0x622   : > { %v2094_v17 = vadd.f32 %v2956_v15, %v2093_v16 }
 0x623   : > { %v3244_v11 = vpop.f32.mrf.mxu1 }
 0x624   : > { %2101 = vst [vmem:[%s2100_s24] sm:$0xff] %v2094_v17 }
 0x625   : > { %v2096_v18 = vpop.f32.mrf.mxu1 }
 0x626   : > { %v2097_v19 = vadd.f32 %v2956_v15, %v2096_v18 }
 0x627   : > { %v3245_v20 = vpop.f32.mrf.mxu1 }
 0x628   : > { %2102 = vst [vmem:[%s2100_s24 + $0x8] sm:$0xff] %v2097_v19 }
 0x629 PF: > { %s4690_s29 = sld [smem:[#allocation23_spill]] }
 0x62f   : > { %p2965_p1 = scmp.ne.s32.totalorder %s4690_s29, 1 }
 0x630   : > { %s4691_s26 = sld [smem:[#allocation47_spill]] (!%p2965_p1) }
 0x631   : > { %2106 = sbr.rel (%p2965_p1) target bundleno = 2026 (0x7ea), region = 120 }
 0x636   : > { %v3586_v21 = vld [vmem:[%s4263_s3 + $0x38] sm:$0xff]   ;;  %v3909_v13 = vmov 0.0   ;;  %v3587_v22 = vld [vmem:[%s4263_s3 + $0x30] sm:$0xff]   ;;  %vm3910_vm3 = vmmov 0   ;;  %v3588_v23 = vld [vmem:[%s4263_s3 + $0x28] sm:$0xff]   ;;  %s2334_s30 = scalar_lea.vmem %s4691_s26, %s4307_s5 }
 0x637   : > { %3246 = vmatprep.subr.bf16.mxu0 %v3909_v13  ;;  %3266 = vmatprep.subr.bf16.mxu1 %v3909_v13  ;;  %v3594_v24 = vld [vmem:[%s4269_s16 + $0x38] sm:$0xff]   ;;  %v3589_v25 = vld [vmem:[%s4263_s3 + $0x20] sm:$0xff]   ;;  %v3595_v26 = vld [vmem:[%s4269_s16 + $0x30] sm:$0xff]  }
 0x638   : > { %3247 = vmatpush3.bf16.msra.mxu0 %v3586_v21  ;;  %3262 = vmatprep.mubr.msk.bf16.mxu0 %vm3910_vm3, %v3909_v13  ;;  %v3590_v27 = vld [vmem:[%s4263_s3 + $0x18] sm:$0xff]   ;;  %v3596_v28 = vld [vmem:[%s4269_s16 + $0x28] sm:$0xff]   ;;  %v3591_v59 = vld [vmem:[%s4263_s3 + $0x10] sm:$0xff]  }
 0x639   : > { %3248 = vmatprep.subr.bf16.mxu0 %v3909_v13  ;;  %3282 = vmatprep.mubr.msk.bf16.mxu1 %vm3910_vm3, %v3909_v13  ;;  %v3597_v29 = vld [vmem:[%s4269_s16 + $0x20] sm:$0xff]   ;;  %v3592_v30 = vld [vmem:[%s4263_s3 + $0x8] sm:$0xff]   ;;  %v3598_v31 = vld [vmem:[%s4269_s16 + $0x18] sm:$0xff]  }
 0x63a   : > { %3267 = vmatpush3.bf16.msra.mxu1 %v3594_v24  ;;  %v3593_v32 = vld [vmem:[%s4263_s3] sm:$0xff]   ;;  %v3599_v33 = vld [vmem:[%s4269_s16 + $0x10] sm:$0xff]   ;;  %v3600_v34 = vld [vmem:[%s4269_s16 + $0x8] sm:$0xff]  }
 0x63b   : > { %3268 = vmatprep.subr.bf16.mxu1 %v3909_v13  ;;  %v3601_v35 = vld [vmem:[%s4269_s16] sm:$0xff]  }
 0x63c   : > { %3249 = vmatpush3.bf16.msra.mxu0 %v3587_v22  ;;  %v2966_v36 = vld [vmem:[%s4317_s23] ss:$0 sm:$0xff] }
 0x63d   : > { %3250 = vmatprep.subr.bf16.mxu0 %v3909_v13  ;;  %v2975_v45 = vld [vmem:[%s4322_s11] ss:$0 sm:$0xff] }
 0x63e   : > { %3269 = vmatpush3.bf16.msra.mxu1 %v3595_v26 }
 0x63f   : > { %3270 = vmatprep.subr.bf16.mxu1 %v3909_v13 }
 0x640   : > { %3251 = vmatpush3.bf16.msra.mxu0 %v3588_v23 }
 0x641   : > { %3252 = vmatprep.subr.bf16.mxu0 %v3909_v13 }
 0x642   : > { %3271 = vmatpush3.bf16.msra.mxu1 %v3596_v28 }
 0x643   : > { %3272 = vmatprep.subr.bf16.mxu1 %v3909_v13 }
 0x644   : > { %3253 = vmatpush3.bf16.msra.mxu0 %v3589_v25 }
 0x645   : > { %3254 = vmatprep.subr.bf16.mxu0 %v3909_v13 }
 0x646   : > { %3273 = vmatpush3.bf16.msra.mxu1 %v3597_v29 }
 0x647   : > { %3274 = vmatprep.subr.bf16.mxu1 %v3909_v13 }
 0x648   : > { %3255 = vmatpush3.bf16.msra.mxu0 %v3590_v27 }
 0x649   : > { %3256 = vmatprep.subr.bf16.mxu0 %v3909_v13 }
 0x64a   : > { %3275 = vmatpush3.bf16.msra.mxu1 %v3598_v31 }
 0x64b   : > { %3276 = vmatprep.subr.bf16.mxu1 %v3909_v13 }
 0x64c   : > { %3257 = vmatpush3.bf16.msra.mxu0 %v3591_v59 }
 0x64d   : > { %3258 = vmatprep.subr.bf16.mxu0 %v3909_v13 }
 0x64e   : > { %3277 = vmatpush3.bf16.msra.mxu1 %v3599_v33 }
 0x64f   : > { %3278 = vmatprep.subr.bf16.mxu1 %v3909_v13 }
 0x650   : > { %3259 = vmatpush3.bf16.msra.mxu0 %v3592_v30 }
 0x651   : > { %3260 = vmatprep.subr.bf16.mxu0 %v3909_v13 }
 0x652   : > { %3279 = vmatpush3.bf16.msra.mxu1 %v3600_v34 }
 0x653   : > { %3280 = vmatprep.subr.bf16.mxu1 %v3909_v13 }
 0x654   : > { %3261 = vmatpush3.bf16.msra.mxu0 %v3593_v32 }
 0x656   : > { %3281 = vmatpush3.bf16.msra.mxu1 %v3601_v35 }
 0x657   : > { %3263 = vmatmul.mubr.bf16.vlgmr.msra.gmra.mxu0 %v4472_v47 }
 0x717   : > { %v2212_v37 = vpop.f32.mrf.mxu0 }
 0x718   : > { %v2213_v2 = vadd.f32 %v2966_v36, %v2212_v37 }
 0x719   : > { %v3264_v38 = vpop.f32.mrf.mxu0 }
 0x71a   : > { %v2219_v42 = vmax.f32 %v2213_v2, 0.0 }
 0x71b   : > { %v2215_v39 = vpop.f32.mrf.mxu0 }
 0x71c   : > { %v2216_v40 = vadd.f32 %v2966_v36, %v2215_v39 }
 0x71d   : > { %v3265_v41 = vpop.f32.mrf.mxu0 }
 0x71e   : > { %v2220_v43 = vmax.f32 %v2216_v40, 0.0 }
 0x720   : > { %v2221_v44 = vpack.c.bf16 %v2220_v43, %v2219_v42 }
 0x722   : > { %3283 = vmatmul.mubr.bf16.vlgmr.msra.gmra.mxu1 %v2221_v44 }
 0x7e2   : > { %v2327_v46 = vpop.f32.mrf.mxu1 }
 0x7e3   : > { %v2328_v48 = vadd.f32 %v2975_v45, %v2327_v46 }
 0x7e4   : > { %v3284_v49 = vpop.f32.mrf.mxu1 }
 0x7e5   : > { %2335 = vst [vmem:[%s2334_s30] sm:$0xff] %v2328_v48 }
 0x7e6   : > { %v2330_v50 = vpop.f32.mrf.mxu1 }
 0x7e7   : > { %v2331_v51 = vadd.f32 %v2975_v45, %v2330_v50 }
 0x7e8   : > { %v3285_v52 = vpop.f32.mrf.mxu1 }
 0x7e9   : > { %2336 = vst [vmem:[%s2334_s30 + $0x8] sm:$0xff] %v2331_v51 }
 0x7ea PF: > { %s4692_s19 = sld [smem:[#allocation23_spill]] }
 0x7f0   : > { %p2984_p7 = scmp.ne.s32.totalorder %s4692_s19, 2 }
 0x7f1   : > { %s4693_s8 = sld [smem:[#allocation48_spill]] (!%p2984_p7) }
 0x7f2   : > { %2340 = sbr.rel (%p2984_p7) target bundleno = 2475 (0x9ab), region = 124 }
 0x7f7   : > { %v3602_v53 = vld [vmem:[%s4263_s3 + $0x38] sm:$0xff]   ;;  %v3911_v54 = vmov 0.0   ;;  %v3603_v55 = vld [vmem:[%s4263_s3 + $0x30] sm:$0xff]   ;;  %vm3912_vm4 = vmmov 0   ;;  %v3604_v56 = vld [vmem:[%s4263_s3 + $0x28] sm:$0xff]   ;;  %s2568_s10 = scalar_lea.vmem %s4693_s8, %s4307_s5 }
 0x7f8   : > { %3286 = vmatprep.subr.bf16.mxu0 %v3911_v54  ;;  %3306 = vmatprep.subr.bf16.mxu1 %v3911_v54  ;;  %v3610_v57 = vld [vmem:[%s4269_s16 + $0x38] sm:$0xff]   ;;  %v3605_v58 = vld [vmem:[%s4263_s3 + $0x20] sm:$0xff]   ;;  %v3611_v60 = vld [vmem:[%s4269_s16 + $0x30] sm:$0xff]  }
 0x7f9   : > { %3287 = vmatpush3.bf16.msra.mxu0 %v3602_v53  ;;  %3302 = vmatprep.mubr.msk.bf16.mxu0 %vm3912_vm4, %v3911_v54  ;;  %v3606_v61 = vld [vmem:[%s4263_s3 + $0x18] sm:$0xff]   ;;  %v3612_v62 = vld [vmem:[%s4269_s16 + $0x28] sm:$0xff]   ;;  %v3607_v63 = vld [vmem:[%s4263_s3 + $0x10] sm:$0xff]  }
 0x7fa   : > { %3288 = vmatprep.subr.bf16.mxu0 %v3911_v54  ;;  %3322 = vmatprep.mubr.msk.bf16.mxu1 %vm3912_vm4, %v3911_v54  ;;  %v3613_v0 = vld [vmem:[%s4269_s16 + $0x20] sm:$0xff]   ;;  %v3608_v1 = vld [vmem:[%s4263_s3 + $0x8] sm:$0xff]   ;;  %v3614_v3 = vld [vmem:[%s4269_s16 + $0x18] sm:$0xff]  }
 0x7fb   : > { %3307 = vmatpush3.bf16.msra.mxu1 %v3610_v57  ;;  %v3609_v4 = vld [vmem:[%s4263_s3] sm:$0xff]   ;;  %v3615_v5 = vld [vmem:[%s4269_s16 + $0x10] sm:$0xff]   ;;  %v3616_v6 = vld [vmem:[%s4269_s16 + $0x8] sm:$0xff]  }
 0x7fc   : > { %3308 = vmatprep.subr.bf16.mxu1 %v3911_v54  ;;  %v3617_v7 = vld [vmem:[%s4269_s16] sm:$0xff]  }
 0x7fd   : > { %3289 = vmatpush3.bf16.msra.mxu0 %v3603_v55  ;;  %v2985_v8 = vld [vmem:[%s4317_s23] ss:$0 sm:$0xff] }
 0x7fe   : > { %3290 = vmatprep.subr.bf16.mxu0 %v3911_v54  ;;  %v2994_v18 = vld [vmem:[%s4322_s11] ss:$0 sm:$0xff] }
 0x7ff   : > { %3309 = vmatpush3.bf16.msra.mxu1 %v3611_v60 }
 0x800   : > { %3310 = vmatprep.subr.bf16.mxu1 %v3911_v54 }
 0x801   : > { %3291 = vmatpush3.bf16.msra.mxu0 %v3604_v56 }
 0x802   : > { %3292 = vmatprep.subr.bf16.mxu0 %v3911_v54 }
 0x803   : > { %3311 = vmatpush3.bf16.msra.mxu1 %v3612_v62 }
 0x804   : > { %3312 = vmatprep.subr.bf16.mxu1 %v3911_v54 }
 0x805   : > { %3293 = vmatpush3.bf16.msra.mxu0 %v3605_v58 }
 0x806   : > { %3294 = vmatprep.subr.bf16.mxu0 %v3911_v54 }
 0x807   : > { %3313 = vmatpush3.bf16.msra.mxu1 %v3613_v0 }
 0x808   : > { %3314 = vmatprep.subr.bf16.mxu1 %v3911_v54 }
 0x809   : > { %3295 = vmatpush3.bf16.msra.mxu0 %v3606_v61 }
 0x80a   : > { %3296 = vmatprep.subr.bf16.mxu0 %v3911_v54 }
 0x80b   : > { %3315 = vmatpush3.bf16.msra.mxu1 %v3614_v3 }
 0x80c   : > { %3316 = vmatprep.subr.bf16.mxu1 %v3911_v54 }
 0x80d   : > { %3297 = vmatpush3.bf16.msra.mxu0 %v3607_v63 }
 0x80e   : > { %3298 = vmatprep.subr.bf16.mxu0 %v3911_v54 }
 0x80f   : > { %3317 = vmatpush3.bf16.msra.mxu1 %v3615_v5 }
 0x810   : > { %3318 = vmatprep.subr.bf16.mxu1 %v3911_v54 }
 0x811   : > { %3299 = vmatpush3.bf16.msra.mxu0 %v3608_v1 }
 0x812   : > { %3300 = vmatprep.subr.bf16.mxu0 %v3911_v54 }
 0x813   : > { %3319 = vmatpush3.bf16.msra.mxu1 %v3616_v6 }
 0x814   : > { %3320 = vmatprep.subr.bf16.mxu1 %v3911_v54 }
 0x815   : > { %3301 = vmatpush3.bf16.msra.mxu0 %v3609_v4 }
 0x817   : > { %3321 = vmatpush3.bf16.msra.mxu1 %v3617_v7 }
 0x818   : > { %3303 = vmatmul.mubr.bf16.vlgmr.msra.gmra.mxu0 %v4472_v47 }
 0x8d8   : > { %v2446_v9 = vpop.f32.mrf.mxu0 }
 0x8d9   : > { %v2447_v12 = vadd.f32 %v2985_v8, %v2446_v9 }
 0x8da   : > { %v3304_v10 = vpop.f32.mrf.mxu0 }
 0x8db   : > { %v2453_v17 = vmax.f32 %v2447_v12, 0.0 }
 0x8dc   : > { %v2449_v14 = vpop.f32.mrf.mxu0 }
 0x8dd   : > { %v2450_v15 = vadd.f32 %v2985_v8, %v2449_v14 }
 0x8de   : > { %v3305_v16 = vpop.f32.mrf.mxu0 }
 0x8df   : > { %v2454_v11 = vmax.f32 %v2450_v15, 0.0 }
 0x8e1   : > { %v2455_v47 = vpack.c.bf16 %v2454_v11, %v2453_v17 }
 0x8e3   : > { %3323 = vmatmul.mubr.bf16.vlgmr.msra.gmra.mxu1 %v2455_v47 }
 0x9a3   : > { %v2561_v19 = vpop.f32.mrf.mxu1 }
 0x9a4   : > { %v2562_v20 = vadd.f32 %v2994_v18, %v2561_v19 }
 0x9a5   : > { %v3324_v21 = vpop.f32.mrf.mxu1 }
 0x9a6   : > { %2569 = vst [vmem:[%s2568_s10] sm:$0xff] %v2562_v20 }
 0x9a7   : > { %v2564_v13 = vpop.f32.mrf.mxu1 }
 0x9a8   : > { %v2565_v22 = vadd.f32 %v2994_v18, %v2564_v13 }
 0x9a9   : > { %v3325_v23 = vpop.f32.mrf.mxu1 }
 0x9aa   : > { %2570 = vst [vmem:[%s2568_s10 + $0x8] sm:$0xff] %v2565_v22 }
 0x9ab PF: > { %s39_s0 = sadd.s32 1, %s3892_s0   ;;  %s4694_s21 = sld [smem:[#allocation18_spill]] }
 0x9ac   : > { %p36_p0 = scmp.ge.s32.totalorder %s39_s0, 8   ;;  %s4695_s22 = sld [smem:[#allocation19_spill]] }
 0x9ad   : > { %s4696_s23 = sld [smem:[#allocation31_spill]] }
 0x9ae   : > { %s4697_s24 = sld [smem:[#allocation20_spill]] }
 0x9af   : > { %s4698_s25 = sld [smem:[#allocation21_spill]] }
 0x9b0   : > { %s4699_s26 = sld [smem:[#allocation29_spill]]  ;;  %38 = sbr.rel (!%p36_p0) target bundleno = 31 (0x1f), region = 242 }
 0x9b1   : > { %s4700_s27 = sld [smem:[#allocation24_spill]] }
 0x9b2   : > { %s4701_s28 = sld [smem:[#allocation25_spill]] }
 0x9b3   : > { %s4702_s29 = sld [smem:[#allocation26_spill]] }
 0x9b4   : > { %s4703_s30 = sld [smem:[#allocation27_spill]] }
 0x9b5   :  { %2594 = vsyncpa [#allocation4], 1 }
 0x9b6   :  { %2596 = vsyncpa [#allocation4 + $0x1], 1 }
 0x9b7   :  { %2597 = vsyncpa [#allocation6], 1 }
 0x9b8   :  { %2599 = vsyncpa [#allocation6 + $0x1], 1 }
 0x9b9   :  { %2600 = vsyncpa [#allocation9], 1 }
 0x9ba   :  { %2602 = vsyncpa [#allocation9 + $0x1], 1 }
 0x9bb   :  { %2603 = vsyncpa [#allocation12], 1 }
 0x9bc   :  { %2605 = vsyncpa [#allocation12 + $0x1], 1 }

</bundles_post_ra>
